<compile_context>
chip_gen: v7x
topology: tpu7x:2x2x1
jax: 0.10.0
libtpu: 0.0.40
codegen_flags: <defaults>
</compile_context>

<pallas_src>
import functools

import jax
import jax.numpy as jnp
from jax import lax
from jax.experimental import pallas as pl
from jax.experimental.pallas import tpu as pltpu


# ----------------------------- helpers ------------------------------------------

def _round_up(x, m):
    return (x + m - 1) // m * m


def _apply_act(y, act):
    if act == "relu":
        return jnp.maximum(y, 0.0)
    if act == "lrelu":
        return jnp.where(y >= 0, y, 0.2 * y)
    if act == "tanh":
        return jnp.tanh(y)
    return y


# --------------------- fused conv-as-matmul Pallas kernel -------------------------

def _conv_mm_kernel(*refs, in_act, bn, grouped, bias_act, count, eps):
    """One U-Net conv layer as a single fused matmul:
         lhs = act_in(A)                      # consumer LeakyReLU/ReLU, f32 math, bf16 dot
         y   = lhs @ B                        # MXU, f32 accumulation
         y   = BN(y)                          # optional: in-kernel batch stats + affine
         y   = act_out(y + bias)              # optional: outermost bias + Tanh
    Ref order: A, B, [gamma, beta, [Q]], [bias], O.
    """
    it = iter(refs)
    a_ref = next(it)
    b_ref = next(it)
    if bn:
        g_ref = next(it)
        be_ref = next(it)
        q_ref = next(it) if grouped else None
    if bias_act is not None:
        sft_ref = next(it)
    o_ref = next(it)

    if in_act == "none":
        lhs = a_ref[...]                                        # already bf16
    else:
        lhs = _apply_act(a_ref[...].astype(jnp.float32), in_act).astype(jnp.bfloat16)

    y = jnp.dot(lhs, b_ref[...], preferred_element_type=jnp.float32)

    if bn:
        # Padded A rows are exactly zero (prologue is act-only, relu/lrelu(0)=0), so they do
        # not perturb the sums; `count` is the true element count per channel.
        s1 = jnp.sum(y, axis=0, keepdims=True)                  # (1, N) per-column sums
        s2 = jnp.sum(y * y, axis=0, keepdims=True)
        if grouped:
            # Sub-pixel up conv: columns are (parity, channel); sum the 4 parity groups of
            # each channel (and broadcast back per column) with a tiny f32 matmul.
            q = q_ref[...]
            s1 = jnp.dot(s1, q, preferred_element_type=jnp.float32)
            s2 = jnp.dot(s2, q, preferred_element_type=jnp.float32)
        mean = s1 * (1.0 / count)
        # single-pass biased variance (E[x^2]-E[x]^2, clamped) -- adequate at these scales
        var = jnp.maximum(s2 * (1.0 / count) - mean * mean, 0.0)
        scl = g_ref[...] * lax.rsqrt(var + eps)
        y = y * scl + (be_ref[...] - mean * scl)

    if bias_act is not None:
        y = _apply_act(y + sft_ref[...], bias_act)

    o_ref[...] = y.astype(o_ref.dtype)


def conv_matmul(a, b, *, in_act="none", bn=None, group4=False,
                bias=None, bias_act=None, out_dtype=jnp.bfloat16, eps=1e-5):
    """act_out( BN( act_in(a) @ b ) + bias ) as one pallas_call.

    a: (m, K) bf16 im2col patches; b: (K, n) weights (cast to bf16).
    bn: None or (gamma, beta).  group4=True when output columns are ordered
    (parity, channel) (sub-pixel ConvTranspose) and BN channels are n // 4.
    """
    m, k = a.shape
    k2, n = b.shape
    assert k == k2

    tm = min(256, _round_up(m, 16))
    mp = _round_up(m, tm)
    np_ = _round_up(n, 128)
    tn = np_ if np_ <= 256 else 128
    assert np_ % tn == 0
    grid = (mp // tm, np_ // tn)

    ap = a if mp == m else jnp.pad(a, ((0, mp - m), (0, 0)))
    bp = b.astype(jnp.bfloat16)
    if np_ != n:
        bp = jnp.pad(bp, ((0, 0), (0, np_ - n)))

    in_specs = [pl.BlockSpec((tm, k), lambda i, j: (i, 0)),     # full-extent K block
                pl.BlockSpec((k, tn), lambda i, j: (0, j))]
    operands = [ap, bp]

    grouped = False
    count = 0
    if bn is not None:
        # In-kernel BN needs all rows (and all parity columns) of the layer in one block.
        # TODO(synk): add a separate stats-pass fallback for layers whose M/N grid exceeds 1.
        assert grid == (1, 1), "in-kernel BatchNorm requires a single-block grid"
        gamma, beta = bn
        if group4:
            cout = n // 4
            gcols = jnp.tile(gamma.astype(jnp.float32), 4)
            bcols = jnp.tile(beta.astype(jnp.float32), 4)
            count = 4 * m
            grouped = True
        else:
            gcols = gamma.astype(jnp.float32)
            bcols = beta.astype(jnp.float32)
            count = m
        gcols = jnp.pad(gcols, (0, np_ - n)).reshape(1, np_)
        bcols = jnp.pad(bcols, (0, np_ - n)).reshape(1, np_)
        in_specs += [pl.BlockSpec((1, tn), lambda i, j: (0, j)),
                     pl.BlockSpec((1, tn), lambda i, j: (0, j))]
        operands += [gcols, bcols]
        if grouped:
            idx = jnp.arange(np_)
            ch = idx % cout
            valid = idx < n
            qmat = ((ch[:, None] == ch[None, :]) & valid[:, None] & valid[None, :]
                    ).astype(jnp.float32)                        # (np_, np_) parity group-sum
            in_specs += [pl.BlockSpec((tn, tn), lambda i, j: (0, 0))]
            operands += [qmat]

    if bias is not None or bias_act is not None:
        sft = jnp.zeros((n,), jnp.float32) if bias is None else bias.astype(jnp.float32)
        sft = jnp.pad(sft, (0, np_ - n)).reshape(1, np_)
        in_specs += [pl.BlockSpec((1, tn), lambda i, j: (0, j))]
        operands += [sft]
        ba = bias_act if bias_act is not None else "none"
    else:
        ba = None

    out = pl.pallas_call(
        functools.partial(_conv_mm_kernel, in_act=in_act, bn=bn is not None,
                          grouped=grouped, bias_act=ba, count=count, eps=eps),
        out_shape=jax.ShapeDtypeStruct((mp, np_), out_dtype),
        grid=grid,
        in_specs=in_specs,
        out_specs=pl.BlockSpec((tm, tn), lambda i, j: (i, j)),
        compiler_params=pltpu.CompilerParams(
            dimension_semantics=("parallel", "parallel")),
    )(*operands)
    return out[:m, :n]


# ----------------------------- conv layer glue (im2col in bf16) --------------------
# TODO(synk): the 16-tap / 9-tap strided im2col gather, spatial zero-pad, channel concat and
# the sub-pixel interleave stay as XLA glue -- strided windows have no clean BlockSpec form.

def _conv_down_layer(x_nhwc, w, *, in_act, bn):
    """Conv2d(k=4, s=2, p=1, bias=False).  The consumer's LeakyReLU (if any) runs inside the
    matmul prologue; BatchNorm (if any) runs inside the matmul epilogue."""
    n, h, wd, c = x_nhwc.shape
    xb = x_nhwc.astype(jnp.bfloat16)
    xp = jnp.pad(xb, ((0, 0), (1, 1), (1, 1), (0, 0)))
    ho, wo = h // 2, wd // 2
    cols = [xp[:, ky:ky + 2 * ho:2, kx:kx + 2 * wo:2, :]
            for ky in range(4) for kx in range(4)]
    patches = jnp.concatenate(cols, axis=-1).reshape(n * ho * wo, 16 * c)
    c_out = w.shape[0]
    wmat = jnp.transpose(w, (2, 3, 1, 0)).reshape(16 * c, c_out)    # (ky,kx,cin) x cout
    y = conv_matmul(patches, wmat, in_act=in_act, bn=bn)
    return y.reshape(n, ho, wo, c_out)


def _upconv_weight_mat(w):
    """Combined 4-phase weight matrix [9*C_in, 4*C_out] for ConvTranspose2d(k=4, s=2, p=1)
    evaluated on the un-dilated input (columns ordered (parity_a, parity_b, cout))."""
    cin, cout = w.shape[0], w.shape[1]
    wf = jnp.transpose(w[:, :, ::-1, ::-1], (2, 3, 0, 1))           # flipped, (ky,kx,ci,co)
    b9 = jnp.zeros((3, 3, cin, 2, 2, cout), jnp.float32)
    for a in range(2):
        for b in range(2):
            for dy in range(2):
                for dx in range(2):
                    b9 = b9.at[a + dy, b + dx, :, a, b, :].set(wf[a + 2 * dy, b + 2 * dx])
    return b9.reshape(9 * cin, 4 * cout)


def _conv_up_layer(x_nhwc, w, *, bn=None, bias=None, bias_act=None,
                   out_dtype=jnp.bfloat16):
    """ConvTranspose2d(k=4, s=2, p=1): one 9-tap stride-1 matmul producing all 4 output
    parities; ReLU prologue, parity-grouped BatchNorm epilogue (or bias+Tanh for the
    outermost layer) fused in-kernel; XLA interleave to (n, 2h, 2w, cout)."""
    n, h, wd, cin = x_nhwc.shape
    cout = w.shape[1]
    xb = x_nhwc.astype(jnp.bfloat16)
    xp = jnp.pad(xb, ((0, 0), (1, 1), (1, 1), (0, 0)))
    cols = [xp[:, ty:ty + h, tx:tx + wd, :] for ty in range(3) for tx in range(3)]
    p9 = jnp.concatenate(cols, axis=-1).reshape(n * h * wd, 9 * cin)
    bmat = _upconv_weight_mat(w)
    shift = jnp.tile(bias, 4) if bias is not None else None        # per (a,b,cout) column
    y = conv_matmul(p9, bmat, in_act="relu", bn=bn, group4=bn is not None,
                    bias=shift, bias_act=bias_act, out_dtype=out_dtype)
    y = y.reshape(n, h, wd, 2, 2, cout)
    y = jnp.transpose(y, (0, 1, 3, 2, 4, 5)).reshape(n, 2 * h, 2 * wd, cout)
    return y


# ----------------------------- parameter init ----------------------------------

def init_params(key, input_nc, output_nc, ngf, num_downs):
    assert input_nc == output_nc
    assert num_downs >= 5
    keys = iter(jax.random.split(key, 8 * num_downs + 8))

    def nrm(shape, scale=0.02):
        return scale * jax.random.normal(next(keys), shape, jnp.float32)

    # down path (outermost -> innermost): (C_in, C_out, has_bn)
    down_io = [(input_nc, ngf, False),
               (ngf, 2 * ngf, True),
               (2 * ngf, 4 * ngf, True),
               (4 * ngf, 8 * ngf, True)]
    down_io += [(8 * ngf, 8 * ngf, True)] * (num_downs - 5)
    down_io += [(8 * ngf, 8 * ngf, False)]              # innermost down: no BN

    # up path (innermost -> outermost): (C_in, C_out, is_outermost)
    up_io = [(8 * ngf, 8 * ngf, False)]
    up_io += [(16 * ngf, 8 * ngf, False)] * (num_downs - 5)
    up_io += [(16 * ngf, 4 * ngf, False),
              (8 * ngf, 2 * ngf, False),
              (4 * ngf, ngf, False),
              (2 * ngf, output_nc, True)]

    downs = []
    for cin, cout, has_bn in down_io:
        p = {"w": nrm((cout, cin, 4, 4)), "bn": None}
        if has_bn:
            p["bn"] = (1.0 + nrm((cout,)), nrm((cout,)))
        downs.append(p)

    ups = []
    for cin, cout, outermost in up_io:
        p = {"w": nrm((cin, cout, 4, 4)), "bn": None, "b": None}
        if outermost:
            p["b"] = nrm((cout,))
        else:
            p["bn"] = (1.0 + nrm((cout,)), nrm((cout,)))
        ups.append(p)

    return {"down": downs, "up": ups}


# ----------------------------- U-Net forward (Pallas) ------------------------------

def unet_forward(x_nchw, params):
    # learn_residual=False, use_dropout=False (default UnetGenerator config)
    x = jnp.transpose(x_nchw, (0, 2, 3, 1)).astype(jnp.bfloat16)   # NHWC, bf16 internal

    downs, ups = params["down"], params["up"]
    skips = []
    h = x
    for i, p in enumerate(downs):
        h = _conv_down_layer(h, p["w"],
                             in_act="none" if i == 0 else "lrelu",
                             bn=p["bn"])
        skips.append(h)                                            # BN already applied in-kernel

    n_up = len(ups)
    h = skips[-1]
    for j, p in enumerate(ups):
        if j > 0:
            h = jnp.concatenate([h, skips[n_up - 1 - j]], axis=-1)  # cat([up, skip], channel)
        if j == n_up - 1:
            h = _conv_up_layer(h, p["w"], bias=p["b"], bias_act="tanh",
                               out_dtype=jnp.float32)
        else:
            h = _conv_up_layer(h, p["w"], bn=p["bn"])

    return jnp.transpose(h, (0, 3, 1, 2))                          # back to NCHW


# ----------------------------- pure-JAX reference -----------------------------------

def _ref_conv_down(x, w):
    return lax.conv_general_dilated(
        x, jnp.transpose(w, (2, 3, 1, 0)), window_strides=(2, 2),
        padding=((1, 1), (1, 1)), dimension_numbers=("NHWC", "HWIO", "NHWC"))


def _ref_conv_up(x, w):
    wf = jnp.transpose(w[:, :, ::-1, ::-1], (2, 3, 0, 1))
    return lax.conv_general_dilated(
        x, wf, window_strides=(1, 1), padding=((2, 2), (2, 2)),
        lhs_dilation=(2, 2), dimension_numbers=("NHWC", "HWIO", "NHWC"))


def _ref_bn(x, gamma, beta, eps=1e-5):
    mean = jnp.mean(x, axis=(0, 1, 2))
    var = jnp.mean((x - mean) ** 2, axis=(0, 1, 2))
    return (x - mean) * lax.rsqrt(var + eps) * gamma + beta


def unet_forward_ref(x_nchw, params):
    h = jnp.transpose(x_nchw, (0, 2, 3, 1)).astype(jnp.float32)
    skips = []
    for i, p in enumerate(params["down"]):
        if i > 0:
            h = jnp.where(h >= 0, h, 0.2 * h)
        h = _ref_conv_down(h, p["w"])
        if p["bn"] is not None:
            h = _ref_bn(h, p["bn"][0], p["bn"][1])
        skips.append(h)
    n_up = len(params["up"])
    h = skips[-1]
    for j, p in enumerate(params["up"]):
        h = jnp.maximum(h, 0.0)
        h = _ref_conv_up(h, p["w"])
        if j == n_up - 1:
            h = jnp.tanh(h + p["b"])
        else:
            h = _ref_bn(h, p["bn"][0], p["bn"][1])
            h = jnp.concatenate([h, skips[n_up - 2 - j]], axis=-1)
    return jnp.transpose(h, (0, 3, 1, 2))


# ----------------------------- main ---------------------------------------------

if __name__ == "__main__":
    key = jax.random.PRNGKey(0)
    kx, kparams = jax.random.split(key)

    # num_downs=5 => spatial must be divisible by 2**5
    N, C, H, W = 2, 3, 32, 32
    ngf, num_downs = 8, 5

    x = jax.random.normal(kx, (N, C, H, W), jnp.float32)
    params = init_params(kparams, input_nc=C, output_nc=C, ngf=ngf, num_downs=num_downs)

    fwd = jax.jit(unet_forward)
    out = jax.block_until_ready(fwd(x, params))

    assert out.shape == (N, C, H, W), out.shape
    assert bool(jnp.all(jnp.isfinite(out)))
    assert bool(jnp.all(jnp.abs(out) <= 1.0 + 1e-6))          # Tanh range

    # cross-check against a plain-JAX (lax.conv) implementation of the same module
    ref = jax.block_until_ready(jax.jit(unet_forward_ref)(x, params))
    err = float(jnp.max(jnp.abs(out - ref)))
    assert err < 0.1, err                                     # bf16-MXU / bf16-storage tolerance

    print("KERNEL_OK")
</pallas_src>

<mosaic_0001>
module attributes {stable_mosaic.version = 11 : i64} {
  func.func @_conv_mm_kernel(%arg0: i32, %arg1: i32, %arg2: memref<256x48xbf16, #tpu.memory_space<vmem>>, %arg3: memref<48x128xbf16, #tpu.memory_space<vmem>>, %arg4: memref<256x128xbf16, #tpu.memory_space<vmem>>) attributes {dimension_semantics = [#tpu.dimension_semantics<parallel>, #tpu.dimension_semantics<parallel>], iteration_bounds = array<i64: 2, 1>, scalar_prefetch = 0 : i64, scratch_operands = 0 : i64, tpu.core_type = #tpu.core_type<tc>, window_params = [{transform_indices = @transform_0, window_bounds = array<i64: 256, 48>}, {transform_indices = @transform_1, window_bounds = array<i64: 48, 128>}, {transform_indices = @transform_2, window_bounds = array<i64: 256, 128>}]} {
    %c0 = arith.constant 0 : index
    %c0_0 = arith.constant 0 : index
    %0 = vector.load %arg2[%c0, %c0_0] : memref<256x48xbf16, #tpu.memory_space<vmem>>, vector<256x48xbf16>
    %c0_1 = arith.constant 0 : index
    %c0_2 = arith.constant 0 : index
    %1 = vector.load %arg3[%c0_1, %c0_2] : memref<48x128xbf16, #tpu.memory_space<vmem>>, vector<48x128xbf16>
    %cst = arith.constant dense<0.000000e+00> : vector<256x128xf32>
    %2 = tpu.matmul %0, %1, %cst {dimension_numbers = #tpu.dot_dimension_numbers<[1], [0], [0], [1], [0, 0, 1, 1], [], []>} : vector<256x48xbf16>, vector<48x128xbf16>, vector<256x128xf32> -> vector<256x128xf32>
    %3 = arith.truncf %2 : vector<256x128xf32> to vector<256x128xbf16>
    %c0_3 = arith.constant 0 : index
    %c0_4 = arith.constant 0 : index
    %4 = vector.load %arg4[%c0_3, %c0_4] : memref<256x128xbf16, #tpu.memory_space<vmem>>, vector<256x128xbf16>
    tpu.vector_store %arg4[%c0_3, %c0_4], %3 {strides = array<i32>} : memref<256x128xbf16, #tpu.memory_space<vmem>>, vector<256x128xbf16>,
    return
  }
  func.func @transform_0(%arg0: i32, %arg1: i32) -> (i32, i32) {
    %c0_i32 = arith.constant 0 : i32
    %c0_i32_0 = arith.constant 0 : i32
    return %arg0, %c0_i32 : i32, i32
  }
  func.func @transform_1(%arg0: i32, %arg1: i32) -> (i32, i32) {
    %c0_i32 = arith.constant 0 : i32
    %c0_i32_0 = arith.constant 0 : i32
    return %c0_i32, %arg1 : i32, i32
  }
  func.func @transform_2(%arg0: i32, %arg1: i32) -> (i32, i32) {
    %c0_i32 = arith.constant 0 : i32
    return %arg0, %arg1 : i32, i32
  }
}

module attributes {stable_mosaic.version = 11 : i64} {
  func.func @_conv_mm_kernel(%arg0: i32, %arg1: i32, %arg2: memref<128x128xbf16, #tpu.memory_space<vmem>>, %arg3: memref<128x128xbf16, #tpu.memory_space<vmem>>, %arg4: memref<1x128xf32, #tpu.memory_space<vmem>>, %arg5: memref<1x128xf32, #tpu.memory_space<vmem>>, %arg6: memref<128x128xbf16, #tpu.memory_space<vmem>>) attributes {dimension_semantics = [#tpu.dimension_semantics<parallel>, #tpu.dimension_semantics<parallel>], iteration_bounds = array<i64: 1, 1>, scalar_prefetch = 0 : i64, scratch_operands = 0 : i64, tpu.core_type = #tpu.core_type<tc>, window_params = [{transform_indices = @transform_0, window_bounds = array<i64: 128, 128>}, {transform_indices = @transform_1, window_bounds = array<i64: 128, 128>}, {transform_indices = @transform_2, window_bounds = array<i64: 1, 128>}, {transform_indices = @transform_3, window_bounds = array<i64: 1, 128>}, {transform_indices = @transform_4, window_bounds = array<i64: 128, 128>}]} {
    %c0 = arith.constant 0 : index
    %c0_0 = arith.constant 0 : index
    %0 = vector.load %arg2[%c0, %c0_0] : memref<128x128xbf16, #tpu.memory_space<vmem>>, vector<128x128xbf16>
    %1 = arith.extf %0 : vector<128x128xbf16> to vector<128x128xf32>
    %cst = arith.constant 0.000000e+00 : f32
    %2 = vector.broadcast %cst : f32 to vector<128x128xf32>
    %3 = arith.cmpf oge, %1, %2 : vector<128x128xf32>
    %cst_1 = arith.constant 2.000000e-01 : f32
    %4 = vector.broadcast %cst_1 : f32 to vector<128x128xf32>
    %5 = arith.mulf %4, %1 : vector<128x128xf32>
    %6 = arith.select %3, %1, %5 : vector<128x128xi1>, vector<128x128xf32>
    %7 = arith.truncf %6 : vector<128x128xf32> to vector<128x128xbf16>
    %c0_2 = arith.constant 0 : index
    %c0_3 = arith.constant 0 : index
    %8 = vector.load %arg3[%c0_2, %c0_3] : memref<128x128xbf16, #tpu.memory_space<vmem>>, vector<128x128xbf16>
    %cst_4 = arith.constant dense<0.000000e+00> : vector<128x128xf32>
    %9 = tpu.matmul %7, %8, %cst_4 {dimension_numbers = #tpu.dot_dimension_numbers<[1], [0], [0], [1], [0, 0, 1, 1], [], []>} : vector<128x128xbf16>, vector<128x128xbf16>, vector<128x128xf32> -> vector<128x128xf32>
    %cst_5 = arith.constant dense<0.000000e+00> : vector<128xf32>
    %10 = vector.multi_reduction <add>, %9, %cst_5 [0] : vector<128x128xf32> to vector<128xf32>
    %11 = vector.shape_cast %10 : vector<128xf32> to vector<1x128xf32>
    %12 = arith.mulf %9, %9 : vector<128x128xf32>
    %cst_6 = arith.constant dense<0.000000e+00> : vector<128xf32>
    %13 = vector.multi_reduction <add>, %12, %cst_6 [0] : vector<128x128xf32> to vector<128xf32>
    %14 = vector.shape_cast %13 : vector<128xf32> to vector<1x128xf32>
    %cst_7 = arith.constant 7.812500e-03 : f32
    %15 = vector.broadcast %cst_7 : f32 to vector<1x128xf32>
    %16 = arith.mulf %11, %15 : vector<1x128xf32>
    %cst_8 = arith.constant 7.812500e-03 : f32
    %17 = vector.broadcast %cst_8 : f32 to vector<1x128xf32>
    %18 = arith.mulf %14, %17 : vector<1x128xf32>
    %19 = arith.mulf %16, %16 : vector<1x128xf32>
    %20 = arith.subf %18, %19 : vector<1x128xf32>
    %cst_9 = arith.constant 0.000000e+00 : f32
    %21 = vector.broadcast %cst_9 : f32 to vector<1x128xf32>
    %22 = arith.maximumf %20, %21 : vector<1x128xf32>
    %c0_10 = arith.constant 0 : index
    %c0_11 = arith.constant 0 : index
    %23 = vector.load %arg4[%c0_10, %c0_11] : memref<1x128xf32, #tpu.memory_space<vmem>>, vector<1x128xf32>
    %cst_12 = arith.constant 9.99999974E-6 : f32
    %24 = vector.broadcast %cst_12 : f32 to vector<1x128xf32>
    %25 = arith.addf %22, %24 : vector<1x128xf32>
    %26 = math.rsqrt %25 : vector<1x128xf32>
    %27 = arith.mulf %23, %26 : vector<1x128xf32>
    %28 = vector.broadcast %27 : vector<1x128xf32> to vector<128x128xf32>
    %29 = arith.mulf %9, %28 : vector<128x128xf32>
    %c0_13 = arith.constant 0 : index
    %c0_14 = arith.constant 0 : index
    %30 = vector.load %arg5[%c0_13, %c0_14] : memref<1x128xf32, #tpu.memory_space<vmem>>, vector<1x128xf32>
    %31 = arith.mulf %16, %27 : vector<1x128xf32>
    %32 = arith.subf %30, %31 : vector<1x128xf32>
    %33 = vector.broadcast %32 : vector<1x128xf32> to vector<128x128xf32>
    %34 = arith.addf %29, %33 : vector<128x128xf32>
    %35 = arith.truncf %34 : vector<128x128xf32> to vector<128x128xbf16>
    %c0_15 = arith.constant 0 : index
    %c0_16 = arith.constant 0 : index
    %36 = vector.load %arg6[%c0_15, %c0_16] : memref<128x128xbf16, #tpu.memory_space<vmem>>, vector<128x128xbf16>
    tpu.vector_store %arg6[%c0_15, %c0_16], %35 {strides = array<i32>} : memref<128x128xbf16, #tpu.memory_space<vmem>>, vector<128x128xbf16>,
    return
  }
  func.func @transform_0(%arg0: i32, %arg1: i32) -> (i32, i32) {
    %c0_i32 = arith.constant 0 : i32
    %c0_i32_0 = arith.constant 0 : i32
    return %arg0, %c0_i32 : i32, i32
  }
  func.func @transform_1(%arg0: i32, %arg1: i32) -> (i32, i32) {
    %c0_i32 = arith.constant 0 : i32
    %c0_i32_0 = arith.constant 0 : i32
    return %c0_i32, %arg1 : i32, i32
  }
  func.func @transform_2(%arg0: i32, %arg1: i32) -> (i32, i32) {
    %c0_i32 = arith.constant 0 : i32
    %c0_i32_0 = arith.constant 0 : i32
    return %c0_i32, %arg1 : i32, i32
  }
  func.func @transform_3(%arg0: i32, %arg1: i32) -> (i32, i32) {
    %c0_i32 = arith.constant 0 : i32
    %c0_i32_0 = arith.constant 0 : i32
    return %c0_i32, %arg1 : i32, i32
  }
  func.func @transform_4(%arg0: i32, %arg1: i32) -> (i32, i32) {
    %c0_i32 = arith.constant 0 : i32
    return %arg0, %arg1 : i32, i32
  }
}

module attributes {stable_mosaic.version = 11 : i64} {
  func.func @_conv_mm_kernel(%arg0: i32, %arg1: i32, %arg2: memref<32x256xbf16, #tpu.memory_space<vmem>>, %arg3: memref<256x128xbf16, #tpu.memory_space<vmem>>, %arg4: memref<1x128xf32, #tpu.memory_space<vmem>>, %arg5: memref<1x128xf32, #tpu.memory_space<vmem>>, %arg6: memref<32x128xbf16, #tpu.memory_space<vmem>>) attributes {dimension_semantics = [#tpu.dimension_semantics<parallel>, #tpu.dimension_semantics<parallel>], iteration_bounds = array<i64: 1, 1>, scalar_prefetch = 0 : i64, scratch_operands = 0 : i64, tpu.core_type = #tpu.core_type<tc>, window_params = [{transform_indices = @transform_0, window_bounds = array<i64: 32, 256>}, {transform_indices = @transform_1, window_bounds = array<i64: 256, 128>}, {transform_indices = @transform_2, window_bounds = array<i64: 1, 128>}, {transform_indices = @transform_3, window_bounds = array<i64: 1, 128>}, {transform_indices = @transform_4, window_bounds = array<i64: 32, 128>}]} {
    %c0 = arith.constant 0 : index
    %c0_0 = arith.constant 0 : index
    %0 = vector.load %arg2[%c0, %c0_0] : memref<32x256xbf16, #tpu.memory_space<vmem>>, vector<32x256xbf16>
    %1 = arith.extf %0 : vector<32x256xbf16> to vector<32x256xf32>
    %cst = arith.constant 0.000000e+00 : f32
    %2 = vector.broadcast %cst : f32 to vector<32x256xf32>
    %3 = arith.cmpf oge, %1, %2 : vector<32x256xf32>
    %cst_1 = arith.constant 2.000000e-01 : f32
    %4 = vector.broadcast %cst_1 : f32 to vector<32x256xf32>
    %5 = arith.mulf %4, %1 : vector<32x256xf32>
    %6 = arith.select %3, %1, %5 : vector<32x256xi1>, vector<32x256xf32>
    %7 = arith.truncf %6 : vector<32x256xf32> to vector<32x256xbf16>
    %c0_2 = arith.constant 0 : index
    %c0_3 = arith.constant 0 : index
    %8 = vector.load %arg3[%c0_2, %c0_3] : memref<256x128xbf16, #tpu.memory_space<vmem>>, vector<256x128xbf16>
    %cst_4 = arith.constant dense<0.000000e+00> : vector<32x128xf32>
    %9 = tpu.matmul %7, %8, %cst_4 {dimension_numbers = #tpu.dot_dimension_numbers<[1], [0], [0], [1], [0, 0, 1, 1], [], []>} : vector<32x256xbf16>, vector<256x128xbf16>, vector<32x128xf32> -> vector<32x128xf32>
    %cst_5 = arith.constant dense<0.000000e+00> : vector<128xf32>
    %10 = vector.multi_reduction <add>, %9, %cst_5 [0] : vector<32x128xf32> to vector<128xf32>
    %11 = vector.shape_cast %10 : vector<128xf32> to vector<1x128xf32>
    %12 = arith.mulf %9, %9 : vector<32x128xf32>
    %cst_6 = arith.constant dense<0.000000e+00> : vector<128xf32>
    %13 = vector.multi_reduction <add>, %12, %cst_6 [0] : vector<32x128xf32> to vector<128xf32>
    %14 = vector.shape_cast %13 : vector<128xf32> to vector<1x128xf32>
    %cst_7 = arith.constant 3.125000e-02 : f32
    %15 = vector.broadcast %cst_7 : f32 to vector<1x128xf32>
    %16 = arith.mulf %11, %15 : vector<1x128xf32>
    %cst_8 = arith.constant 3.125000e-02 : f32
    %17 = vector.broadcast %cst_8 : f32 to vector<1x128xf32>
    %18 = arith.mulf %14, %17 : vector<1x128xf32>
    %19 = arith.mulf %16, %16 : vector<1x128xf32>
    %20 = arith.subf %18, %19 : vector<1x128xf32>
    %cst_9 = arith.constant 0.000000e+00 : f32
    %21 = vector.broadcast %cst_9 : f32 to vector<1x128xf32>
    %22 = arith.maximumf %20, %21 : vector<1x128xf32>
    %c0_10 = arith.constant 0 : index
    %c0_11 = arith.constant 0 : index
    %23 = vector.load %arg4[%c0_10, %c0_11] : memref<1x128xf32, #tpu.memory_space<vmem>>, vector<1x128xf32>
    %cst_12 = arith.constant 9.99999974E-6 : f32
    %24 = vector.broadcast %cst_12 : f32 to vector<1x128xf32>
    %25 = arith.addf %22, %24 : vector<1x128xf32>
    %26 = math.rsqrt %25 : vector<1x128xf32>
    %27 = arith.mulf %23, %26 : vector<1x128xf32>
    %28 = vector.broadcast %27 : vector<1x128xf32> to vector<32x128xf32>
    %29 = arith.mulf %9, %28 : vector<32x128xf32>
    %c0_13 = arith.constant 0 : index
    %c0_14 = arith.constant 0 : index
    %30 = vector.load %arg5[%c0_13, %c0_14] : memref<1x128xf32, #tpu.memory_space<vmem>>, vector<1x128xf32>
    %31 = arith.mulf %16, %27 : vector<1x128xf32>
    %32 = arith.subf %30, %31 : vector<1x128xf32>
    %33 = vector.broadcast %32 : vector<1x128xf32> to vector<32x128xf32>
    %34 = arith.addf %29, %33 : vector<32x128xf32>
    %35 = arith.truncf %34 : vector<32x128xf32> to vector<32x128xbf16>
    %c0_15 = arith.constant 0 : index
    %c0_16 = arith.constant 0 : index
    %36 = vector.load %arg6[%c0_15, %c0_16] : memref<32x128xbf16, #tpu.memory_space<vmem>>, vector<32x128xbf16>
    tpu.vector_store %arg6[%c0_15, %c0_16], %35 {strides = array<i32>} : memref<32x128xbf16, #tpu.memory_space<vmem>>, vector<32x128xbf16>,
    return
  }
  func.func @transform_0(%arg0: i32, %arg1: i32) -> (i32, i32) {
    %c0_i32 = arith.constant 0 : i32
    %c0_i32_0 = arith.constant 0 : i32
    return %arg0, %c0_i32 : i32, i32
  }
  func.func @transform_1(%arg0: i32, %arg1: i32) -> (i32, i32) {
    %c0_i32 = arith.constant 0 : i32
    %c0_i32_0 = arith.constant 0 : i32
    return %c0_i32, %arg1 : i32, i32
  }
  func.func @transform_2(%arg0: i32, %arg1: i32) -> (i32, i32) {
    %c0_i32 = arith.constant 0 : i32
    %c0_i32_0 = arith.constant 0 : i32
    return %c0_i32, %arg1 : i32, i32
  }
  func.func @transform_3(%arg0: i32, %arg1: i32) -> (i32, i32) {
    %c0_i32 = arith.constant 0 : i32
    %c0_i32_0 = arith.constant 0 : i32
    return %c0_i32, %arg1 : i32, i32
  }
  func.func @transform_4(%arg0: i32, %arg1: i32) -> (i32, i32) {
    %c0_i32 = arith.constant 0 : i32
    return %arg0, %arg1 : i32, i32
  }
}

module attributes {stable_mosaic.version = 11 : i64} {
  func.func @_conv_mm_kernel(%arg0: i32, %arg1: i32, %arg2: memref<16x512xbf16, #tpu.memory_space<vmem>>, %arg3: memref<512x128xbf16, #tpu.memory_space<vmem>>, %arg4: memref<1x128xf32, #tpu.memory_space<vmem>>, %arg5: memref<1x128xf32, #tpu.memory_space<vmem>>, %arg6: memref<16x128xbf16, #tpu.memory_space<vmem>>) attributes {dimension_semantics = [#tpu.dimension_semantics<parallel>, #tpu.dimension_semantics<parallel>], iteration_bounds = array<i64: 1, 1>, scalar_prefetch = 0 : i64, scratch_operands = 0 : i64, tpu.core_type = #tpu.core_type<tc>, window_params = [{transform_indices = @transform_0, window_bounds = array<i64: 16, 512>}, {transform_indices = @transform_1, window_bounds = array<i64: 512, 128>}, {transform_indices = @transform_2, window_bounds = array<i64: 1, 128>}, {transform_indices = @transform_3, window_bounds = array<i64: 1, 128>}, {transform_indices = @transform_4, window_bounds = array<i64: 16, 128>}]} {
    %c0 = arith.constant 0 : index
    %c0_0 = arith.constant 0 : index
    %0 = vector.load %arg2[%c0, %c0_0] : memref<16x512xbf16, #tpu.memory_space<vmem>>, vector<16x512xbf16>
    %1 = arith.extf %0 : vector<16x512xbf16> to vector<16x512xf32>
    %cst = arith.constant 0.000000e+00 : f32
    %2 = vector.broadcast %cst : f32 to vector<16x512xf32>
    %3 = arith.cmpf oge, %1, %2 : vector<16x512xf32>
    %cst_1 = arith.constant 2.000000e-01 : f32
    %4 = vector.broadcast %cst_1 : f32 to vector<16x512xf32>
    %5 = arith.mulf %4, %1 : vector<16x512xf32>
    %6 = arith.select %3, %1, %5 : vector<16x512xi1>, vector<16x512xf32>
    %7 = arith.truncf %6 : vector<16x512xf32> to vector<16x512xbf16>
    %c0_2 = arith.constant 0 : index
    %c0_3 = arith.constant 0 : index
    %8 = vector.load %arg3[%c0_2, %c0_3] : memref<512x128xbf16, #tpu.memory_space<vmem>>, vector<512x128xbf16>
    %cst_4 = arith.constant dense<0.000000e+00> : vector<16x128xf32>
    %9 = tpu.matmul %7, %8, %cst_4 {dimension_numbers = #tpu.dot_dimension_numbers<[1], [0], [0], [1], [0, 0, 1, 1], [], []>} : vector<16x512xbf16>, vector<512x128xbf16>, vector<16x128xf32> -> vector<16x128xf32>
    %cst_5 = arith.constant dense<0.000000e+00> : vector<128xf32>
    %10 = vector.multi_reduction <add>, %9, %cst_5 [0] : vector<16x128xf32> to vector<128xf32>
    %11 = vector.shape_cast %10 : vector<128xf32> to vector<1x128xf32>
    %12 = arith.mulf %9, %9 : vector<16x128xf32>
    %cst_6 = arith.constant dense<0.000000e+00> : vector<128xf32>
    %13 = vector.multi_reduction <add>, %12, %cst_6 [0] : vector<16x128xf32> to vector<128xf32>
    %14 = vector.shape_cast %13 : vector<128xf32> to vector<1x128xf32>
    %cst_7 = arith.constant 1.250000e-01 : f32
    %15 = vector.broadcast %cst_7 : f32 to vector<1x128xf32>
    %16 = arith.mulf %11, %15 : vector<1x128xf32>
    %cst_8 = arith.constant 1.250000e-01 : f32
    %17 = vector.broadcast %cst_8 : f32 to vector<1x128xf32>
    %18 = arith.mulf %14, %17 : vector<1x128xf32>
    %19 = arith.mulf %16, %16 : vector<1x128xf32>
    %20 = arith.subf %18, %19 : vector<1x128xf32>
    %cst_9 = arith.constant 0.000000e+00 : f32
    %21 = vector.broadcast %cst_9 : f32 to vector<1x128xf32>
    %22 = arith.maximumf %20, %21 : vector<1x128xf32>
    %c0_10 = arith.constant 0 : index
    %c0_11 = arith.constant 0 : index
    %23 = vector.load %arg4[%c0_10, %c0_11] : memref<1x128xf32, #tpu.memory_space<vmem>>, vector<1x128xf32>
    %cst_12 = arith.constant 9.99999974E-6 : f32
    %24 = vector.broadcast %cst_12 : f32 to vector<1x128xf32>
    %25 = arith.addf %22, %24 : vector<1x128xf32>
    %26 = math.rsqrt %25 : vector<1x128xf32>
    %27 = arith.mulf %23, %26 : vector<1x128xf32>
    %28 = vector.broadcast %27 : vector<1x128xf32> to vector<16x128xf32>
    %29 = arith.mulf %9, %28 : vector<16x128xf32>
    %c0_13 = arith.constant 0 : index
    %c0_14 = arith.constant 0 : index
    %30 = vector.load %arg5[%c0_13, %c0_14] : memref<1x128xf32, #tpu.memory_space<vmem>>, vector<1x128xf32>
    %31 = arith.mulf %16, %27 : vector<1x128xf32>
    %32 = arith.subf %30, %31 : vector<1x128xf32>
    %33 = vector.broadcast %32 : vector<1x128xf32> to vector<16x128xf32>
    %34 = arith.addf %29, %33 : vector<16x128xf32>
    %35 = arith.truncf %34 : vector<16x128xf32> to vector<16x128xbf16>
    %c0_15 = arith.constant 0 : index
    %c0_16 = arith.constant 0 : index
    %36 = vector.load %arg6[%c0_15, %c0_16] : memref<16x128xbf16, #tpu.memory_space<vmem>>, vector<16x128xbf16>
    tpu.vector_store %arg6[%c0_15, %c0_16], %35 {strides = array<i32>} : memref<16x128xbf16, #tpu.memory_space<vmem>>, vector<16x128xbf16>,
    return
  }
  func.func @transform_0(%arg0: i32, %arg1: i32) -> (i32, i32) {
    %c0_i32 = arith.constant 0 : i32
    %c0_i32_0 = arith.constant 0 : i32
    return %arg0, %c0_i32 : i32, i32
  }
  func.func @transform_1(%arg0: i32, %arg1: i32) -> (i32, i32) {
    %c0_i32 = arith.constant 0 : i32
    %c0_i32_0 = arith.constant 0 : i32
    return %c0_i32, %arg1 : i32, i32
  }
  func.func @transform_2(%arg0: i32, %arg1: i32) -> (i32, i32) {
    %c0_i32 = arith.constant 0 : i32
    %c0_i32_0 = arith.constant 0 : i32
    return %c0_i32, %arg1 : i32, i32
  }
  func.func @transform_3(%arg0: i32, %arg1: i32) -> (i32, i32) {
    %c0_i32 = arith.constant 0 : i32
    %c0_i32_0 = arith.constant 0 : i32
    return %c0_i32, %arg1 : i32, i32
  }
  func.func @transform_4(%arg0: i32, %arg1: i32) -> (i32, i32) {
    %c0_i32 = arith.constant 0 : i32
    return %arg0, %arg1 : i32, i32
  }
}

module attributes {stable_mosaic.version = 11 : i64} {
  func.func @_conv_mm_kernel(%arg0: i32, %arg1: i32, %arg2: memref<16x1024xbf16, #tpu.memory_space<vmem>>, %arg3: memref<1024x128xbf16, #tpu.memory_space<vmem>>, %arg4: memref<16x128xbf16, #tpu.memory_space<vmem>>) attributes {dimension_semantics = [#tpu.dimension_semantics<parallel>, #tpu.dimension_semantics<parallel>], iteration_bounds = array<i64: 1, 1>, scalar_prefetch = 0 : i64, scratch_operands = 0 : i64, tpu.core_type = #tpu.core_type<tc>, window_params = [{transform_indices = @transform_0, window_bounds = array<i64: 16, 1024>}, {transform_indices = @transform_1, window_bounds = array<i64: 1024, 128>}, {transform_indices = @transform_2, window_bounds = array<i64: 16, 128>}]} {
    %c0 = arith.constant 0 : index
    %c0_0 = arith.constant 0 : index
    %0 = vector.load %arg2[%c0, %c0_0] : memref<16x1024xbf16, #tpu.memory_space<vmem>>, vector<16x1024xbf16>
    %1 = arith.extf %0 : vector<16x1024xbf16> to vector<16x1024xf32>
    %cst = arith.constant 0.000000e+00 : f32
    %2 = vector.broadcast %cst : f32 to vector<16x1024xf32>
    %3 = arith.cmpf oge, %1, %2 : vector<16x1024xf32>
    %cst_1 = arith.constant 2.000000e-01 : f32
    %4 = vector.broadcast %cst_1 : f32 to vector<16x1024xf32>
    %5 = arith.mulf %4, %1 : vector<16x1024xf32>
    %6 = arith.select %3, %1, %5 : vector<16x1024xi1>, vector<16x1024xf32>
    %7 = arith.truncf %6 : vector<16x1024xf32> to vector<16x1024xbf16>
    %c0_2 = arith.constant 0 : index
    %c0_3 = arith.constant 0 : index
    %8 = vector.load %arg3[%c0_2, %c0_3] : memref<1024x128xbf16, #tpu.memory_space<vmem>>, vector<1024x128xbf16>
    %cst_4 = arith.constant dense<0.000000e+00> : vector<16x128xf32>
    %9 = tpu.matmul %7, %8, %cst_4 {dimension_numbers = #tpu.dot_dimension_numbers<[1], [0], [0], [1], [0, 0, 1, 1], [], []>} : vector<16x1024xbf16>, vector<1024x128xbf16>, vector<16x128xf32> -> vector<16x128xf32>
    %10 = arith.truncf %9 : vector<16x128xf32> to vector<16x128xbf16>
    %c0_5 = arith.constant 0 : index
    %c0_6 = arith.constant 0 : index
    %11 = vector.load %arg4[%c0_5, %c0_6] : memref<16x128xbf16, #tpu.memory_space<vmem>>, vector<16x128xbf16>
    tpu.vector_store %arg4[%c0_5, %c0_6], %10 {strides = array<i32>} : memref<16x128xbf16, #tpu.memory_space<vmem>>, vector<16x128xbf16>,
    return
  }
  func.func @transform_0(%arg0: i32, %arg1: i32) -> (i32, i32) {
    %c0_i32 = arith.constant 0 : i32
    %c0_i32_0 = arith.constant 0 : i32
    return %arg0, %c0_i32 : i32, i32
  }
  func.func @transform_1(%arg0: i32, %arg1: i32) -> (i32, i32) {
    %c0_i32 = arith.constant 0 : i32
    %c0_i32_0 = arith.constant 0 : i32
    return %c0_i32, %arg1 : i32, i32
  }
  func.func @transform_2(%arg0: i32, %arg1: i32) -> (i32, i32) {
    %c0_i32 = arith.constant 0 : i32
    return %arg0, %arg1 : i32, i32
  }
}

module attributes {stable_mosaic.version = 11 : i64} {
  func.func @_conv_mm_kernel(%arg0: i32, %arg1: i32, %arg2: memref<16x576xbf16, #tpu.memory_space<vmem>>, %arg3: memref<576x256xbf16, #tpu.memory_space<vmem>>, %arg4: memref<1x256xf32, #tpu.memory_space<vmem>>, %arg5: memref<1x256xf32, #tpu.memory_space<vmem>>, %arg6: memref<256x256xf32, #tpu.memory_space<vmem>>, %arg7: memref<16x256xbf16, #tpu.memory_space<vmem>>) attributes {dimension_semantics = [#tpu.dimension_semantics<parallel>, #tpu.dimension_semantics<parallel>], iteration_bounds = array<i64: 1, 1>, scalar_prefetch = 0 : i64, scratch_operands = 0 : i64, tpu.core_type = #tpu.core_type<tc>, window_params = [{transform_indices = @transform_0, window_bounds = array<i64: 16, 576>}, {transform_indices = @transform_1, window_bounds = array<i64: 576, 256>}, {transform_indices = @transform_2, window_bounds = array<i64: 1, 256>}, {transform_indices = @transform_3, window_bounds = array<i64: 1, 256>}, {pipeline_mode = #tpu.pipeline_mode<synchronous>, transform_indices = @transform_4, window_bounds = array<i64: 256, 256>}, {transform_indices = @transform_5, window_bounds = array<i64: 16, 256>}]} {
    %c0 = arith.constant 0 : index
    %c0_0 = arith.constant 0 : index
    %0 = vector.load %arg2[%c0, %c0_0] : memref<16x576xbf16, #tpu.memory_space<vmem>>, vector<16x576xbf16>
    %1 = arith.extf %0 : vector<16x576xbf16> to vector<16x576xf32>
    %cst = arith.constant 0.000000e+00 : f32
    %2 = vector.broadcast %cst : f32 to vector<16x576xf32>
    %3 = arith.maximumf %1, %2 : vector<16x576xf32>
    %4 = arith.truncf %3 : vector<16x576xf32> to vector<16x576xbf16>
    %c0_1 = arith.constant 0 : index
    %c0_2 = arith.constant 0 : index
    %5 = vector.load %arg3[%c0_1, %c0_2] : memref<576x256xbf16, #tpu.memory_space<vmem>>, vector<576x256xbf16>
    %cst_3 = arith.constant dense<0.000000e+00> : vector<16x256xf32>
    %6 = tpu.matmul %4, %5, %cst_3 {dimension_numbers = #tpu.dot_dimension_numbers<[1], [0], [0], [1], [0, 0, 1, 1], [], []>} : vector<16x576xbf16>, vector<576x256xbf16>, vector<16x256xf32> -> vector<16x256xf32>
    %cst_4 = arith.constant dense<0.000000e+00> : vector<256xf32>
    %7 = vector.multi_reduction <add>, %6, %cst_4 [0] : vector<16x256xf32> to vector<256xf32>
    %8 = vector.shape_cast %7 : vector<256xf32> to vector<1x256xf32>
    %9 = arith.mulf %6, %6 : vector<16x256xf32>
    %cst_5 = arith.constant dense<0.000000e+00> : vector<256xf32>
    %10 = vector.multi_reduction <add>, %9, %cst_5 [0] : vector<16x256xf32> to vector<256xf32>
    %11 = vector.shape_cast %10 : vector<256xf32> to vector<1x256xf32>
    %c0_6 = arith.constant 0 : index
    %c0_7 = arith.constant 0 : index
    %12 = vector.load %arg6[%c0_6, %c0_7] : memref<256x256xf32, #tpu.memory_space<vmem>>, vector<256x256xf32>
    %cst_8 = arith.constant dense<0.000000e+00> : vector<1x256xf32>
    %13 = tpu.matmul %8, %12, %cst_8 {dimension_numbers = #tpu.dot_dimension_numbers<[1], [0], [0], [1], [0, 0, 1, 1], [], []>} : vector<1x256xf32>, vector<256x256xf32>, vector<1x256xf32> -> vector<1x256xf32>
    %cst_9 = arith.constant dense<0.000000e+00> : vector<1x256xf32>
    %14 = tpu.matmul %11, %12, %cst_9 {dimension_numbers = #tpu.dot_dimension_numbers<[1], [0], [0], [1], [0, 0, 1, 1], [], []>} : vector<1x256xf32>, vector<256x256xf32>, vector<1x256xf32> -> vector<1x256xf32>
    %cst_10 = arith.constant 1.250000e-01 : f32
    %15 = vector.broadcast %cst_10 : f32 to vector<1x256xf32>
    %16 = arith.mulf %13, %15 : vector<1x256xf32>
    %cst_11 = arith.constant 1.250000e-01 : f32
    %17 = vector.broadcast %cst_11 : f32 to vector<1x256xf32>
    %18 = arith.mulf %14, %17 : vector<1x256xf32>
    %19 = arith.mulf %16, %16 : vector<1x256xf32>
    %20 = arith.subf %18, %19 : vector<1x256xf32>
    %cst_12 = arith.constant 0.000000e+00 : f32
    %21 = vector.broadcast %cst_12 : f32 to vector<1x256xf32>
    %22 = arith.maximumf %20, %21 : vector<1x256xf32>
    %c0_13 = arith.constant 0 : index
    %c0_14 = arith.constant 0 : index
    %23 = vector.load %arg4[%c0_13, %c0_14] : memref<1x256xf32, #tpu.memory_space<vmem>>, vector<1x256xf32>
    %cst_15 = arith.constant 9.99999974E-6 : f32
    %24 = vector.broadcast %cst_15 : f32 to vector<1x256xf32>
    %25 = arith.addf %22, %24 : vector<1x256xf32>
    %26 = math.rsqrt %25 : vector<1x256xf32>
    %27 = arith.mulf %23, %26 : vector<1x256xf32>
    %28 = vector.broadcast %27 : vector<1x256xf32> to vector<16x256xf32>
    %29 = arith.mulf %6, %28 : vector<16x256xf32>
    %c0_16 = arith.constant 0 : index
    %c0_17 = arith.constant 0 : index
    %30 = vector.load %arg5[%c0_16, %c0_17] : memref<1x256xf32, #tpu.memory_space<vmem>>, vector<1x256xf32>
    %31 = arith.mulf %16, %27 : vector<1x256xf32>
    %32 = arith.subf %30, %31 : vector<1x256xf32>
    %33 = vector.broadcast %32 : vector<1x256xf32> to vector<16x256xf32>
    %34 = arith.addf %29, %33 : vector<16x256xf32>
    %35 = arith.truncf %34 : vector<16x256xf32> to vector<16x256xbf16>
    %c0_18 = arith.constant 0 : index
    %c0_19 = arith.constant 0 : index
    %36 = vector.load %arg7[%c0_18, %c0_19] : memref<16x256xbf16, #tpu.memory_space<vmem>>, vector<16x256xbf16>
    tpu.vector_store %arg7[%c0_18, %c0_19], %35 {strides = array<i32>} : memref<16x256xbf16, #tpu.memory_space<vmem>>, vector<16x256xbf16>,
    return
  }
  func.func @transform_0(%arg0: i32, %arg1: i32) -> (i32, i32) {
    %c0_i32 = arith.constant 0 : i32
    %c0_i32_0 = arith.constant 0 : i32
    return %arg0, %c0_i32 : i32, i32
  }
  func.func @transform_1(%arg0: i32, %arg1: i32) -> (i32, i32) {
    %c0_i32 = arith.constant 0 : i32
    %c0_i32_0 = arith.constant 0 : i32
    return %c0_i32, %arg1 : i32, i32
  }
  func.func @transform_2(%arg0: i32, %arg1: i32) -> (i32, i32) {
    %c0_i32 = arith.constant 0 : i32
    %c0_i32_0 = arith.constant 0 : i32
    return %c0_i32, %arg1 : i32, i32
  }
  func.func @transform_3(%arg0: i32, %arg1: i32) -> (i32, i32) {
    %c0_i32 = arith.constant 0 : i32
    %c0_i32_0 = arith.constant 0 : i32
    return %c0_i32, %arg1 : i32, i32
  }
  func.func @transform_4(%arg0: i32, %arg1: i32) -> (i32, i32) {
    %c0_i32 = arith.constant 0 : i32
    %c0_i32_0 = arith.constant 0 : i32
    %c0_i32_1 = arith.constant 0 : i32
    return %c0_i32, %c0_i32_0 : i32, i32
  }
  func.func @transform_5(%arg0: i32, %arg1: i32) -> (i32, i32) {
    %c0_i32 = arith.constant 0 : i32
    return %arg0, %arg1 : i32, i32
  }
}

module attributes {stable_mosaic.version = 11 : i64} {
  func.func @_conv_mm_kernel(%arg0: i32, %arg1: i32, %arg2: memref<16x1152xbf16, #tpu.memory_space<vmem>>, %arg3: memref<1152x128xbf16, #tpu.memory_space<vmem>>, %arg4: memref<1x128xf32, #tpu.memory_space<vmem>>, %arg5: memref<1x128xf32, #tpu.memory_space<vmem>>, %arg6: memref<128x128xf32, #tpu.memory_space<vmem>>, %arg7: memref<16x128xbf16, #tpu.memory_space<vmem>>) attributes {dimension_semantics = [#tpu.dimension_semantics<parallel>, #tpu.dimension_semantics<parallel>], iteration_bounds = array<i64: 1, 1>, scalar_prefetch = 0 : i64, scratch_operands = 0 : i64, tpu.core_type = #tpu.core_type<tc>, window_params = [{transform_indices = @transform_0, window_bounds = array<i64: 16, 1152>}, {transform_indices = @transform_1, window_bounds = array<i64: 1152, 128>}, {transform_indices = @transform_2, window_bounds = array<i64: 1, 128>}, {transform_indices = @transform_3, window_bounds = array<i64: 1, 128>}, {pipeline_mode = #tpu.pipeline_mode<synchronous>, transform_indices = @transform_4, window_bounds = array<i64: 128, 128>}, {transform_indices = @transform_5, window_bounds = array<i64: 16, 128>}]} {
    %c0 = arith.constant 0 : index
    %c0_0 = arith.constant 0 : index
    %0 = vector.load %arg2[%c0, %c0_0] : memref<16x1152xbf16, #tpu.memory_space<vmem>>, vector<16x1152xbf16>
    %1 = arith.extf %0 : vector<16x1152xbf16> to vector<16x1152xf32>
    %cst = arith.constant 0.000000e+00 : f32
    %2 = vector.broadcast %cst : f32 to vector<16x1152xf32>
    %3 = arith.maximumf %1, %2 : vector<16x1152xf32>
    %4 = arith.truncf %3 : vector<16x1152xf32> to vector<16x1152xbf16>
    %c0_1 = arith.constant 0 : index
    %c0_2 = arith.constant 0 : index
    %5 = vector.load %arg3[%c0_1, %c0_2] : memref<1152x128xbf16, #tpu.memory_space<vmem>>, vector<1152x128xbf16>
    %cst_3 = arith.constant dense<0.000000e+00> : vector<16x128xf32>
    %6 = tpu.matmul %4, %5, %cst_3 {dimension_numbers = #tpu.dot_dimension_numbers<[1], [0], [0], [1], [0, 0, 1, 1], [], []>} : vector<16x1152xbf16>, vector<1152x128xbf16>, vector<16x128xf32> -> vector<16x128xf32>
    %cst_4 = arith.constant dense<0.000000e+00> : vector<128xf32>
    %7 = vector.multi_reduction <add>, %6, %cst_4 [0] : vector<16x128xf32> to vector<128xf32>
    %8 = vector.shape_cast %7 : vector<128xf32> to vector<1x128xf32>
    %9 = arith.mulf %6, %6 : vector<16x128xf32>
    %cst_5 = arith.constant dense<0.000000e+00> : vector<128xf32>
    %10 = vector.multi_reduction <add>, %9, %cst_5 [0] : vector<16x128xf32> to vector<128xf32>
    %11 = vector.shape_cast %10 : vector<128xf32> to vector<1x128xf32>
    %c0_6 = arith.constant 0 : index
    %c0_7 = arith.constant 0 : index
    %12 = vector.load %arg6[%c0_6, %c0_7] : memref<128x128xf32, #tpu.memory_space<vmem>>, vector<128x128xf32>
    %cst_8 = arith.constant dense<0.000000e+00> : vector<1x128xf32>
    %13 = tpu.matmul %8, %12, %cst_8 {dimension_numbers = #tpu.dot_dimension_numbers<[1], [0], [0], [1], [0, 0, 1, 1], [], []>} : vector<1x128xf32>, vector<128x128xf32>, vector<1x128xf32> -> vector<1x128xf32>
    %cst_9 = arith.constant dense<0.000000e+00> : vector<1x128xf32>
    %14 = tpu.matmul %11, %12, %cst_9 {dimension_numbers = #tpu.dot_dimension_numbers<[1], [0], [0], [1], [0, 0, 1, 1], [], []>} : vector<1x128xf32>, vector<128x128xf32>, vector<1x128xf32> -> vector<1x128xf32>
    %cst_10 = arith.constant 3.125000e-02 : f32
    %15 = vector.broadcast %cst_10 : f32 to vector<1x128xf32>
    %16 = arith.mulf %13, %15 : vector<1x128xf32>
    %cst_11 = arith.constant 3.125000e-02 : f32
    %17 = vector.broadcast %cst_11 : f32 to vector<1x128xf32>
    %18 = arith.mulf %14, %17 : vector<1x128xf32>
    %19 = arith.mulf %16, %16 : vector<1x128xf32>
    %20 = arith.subf %18, %19 : vector<1x128xf32>
    %cst_12 = arith.constant 0.000000e+00 : f32
    %21 = vector.broadcast %cst_12 : f32 to vector<1x128xf32>
    %22 = arith.maximumf %20, %21 : vector<1x128xf32>
    %c0_13 = arith.constant 0 : index
    %c0_14 = arith.constant 0 : index
    %23 = vector.load %arg4[%c0_13, %c0_14] : memref<1x128xf32, #tpu.memory_space<vmem>>, vector<1x128xf32>
    %cst_15 = arith.constant 9.99999974E-6 : f32
    %24 = vector.broadcast %cst_15 : f32 to vector<1x128xf32>
    %25 = arith.addf %22, %24 : vector<1x128xf32>
    %26 = math.rsqrt %25 : vector<1x128xf32>
    %27 = arith.mulf %23, %26 : vector<1x128xf32>
    %28 = vector.broadcast %27 : vector<1x128xf32> to vector<16x128xf32>
    %29 = arith.mulf %6, %28 : vector<16x128xf32>
    %c0_16 = arith.constant 0 : index
    %c0_17 = arith.constant 0 : index
    %30 = vector.load %arg5[%c0_16, %c0_17] : memref<1x128xf32, #tpu.memory_space<vmem>>, vector<1x128xf32>
    %31 = arith.mulf %16, %27 : vector<1x128xf32>
    %32 = arith.subf %30, %31 : vector<1x128xf32>
    %33 = vector.broadcast %32 : vector<1x128xf32> to vector<16x128xf32>
    %34 = arith.addf %29, %33 : vector<16x128xf32>
    %35 = arith.truncf %34 : vector<16x128xf32> to vector<16x128xbf16>
    %c0_18 = arith.constant 0 : index
    %c0_19 = arith.constant 0 : index
    %36 = vector.load %arg7[%c0_18, %c0_19] : memref<16x128xbf16, #tpu.memory_space<vmem>>, vector<16x128xbf16>
    tpu.vector_store %arg7[%c0_18, %c0_19], %35 {strides = array<i32>} : memref<16x128xbf16, #tpu.memory_space<vmem>>, vector<16x128xbf16>,
    return
  }
  func.func @transform_0(%arg0: i32, %arg1: i32) -> (i32, i32) {
    %c0_i32 = arith.constant 0 : i32
    %c0_i32_0 = arith.constant 0 : i32
    return %arg0, %c0_i32 : i32, i32
  }
  func.func @transform_1(%arg0: i32, %arg1: i32) -> (i32, i32) {
    %c0_i32 = arith.constant 0 : i32
    %c0_i32_0 = arith.constant 0 : i32
    return %c0_i32, %arg1 : i32, i32
  }
  func.func @transform_2(%arg0: i32, %arg1: i32) -> (i32, i32) {
    %c0_i32 = arith.constant 0 : i32
    %c0_i32_0 = arith.constant 0 : i32
    return %c0_i32, %arg1 : i32, i32
  }
  func.func @transform_3(%arg0: i32, %arg1: i32) -> (i32, i32) {
    %c0_i32 = arith.constant 0 : i32
    %c0_i32_0 = arith.constant 0 : i32
    return %c0_i32, %arg1 : i32, i32
  }
  func.func @transform_4(%arg0: i32, %arg1: i32) -> (i32, i32) {
    %c0_i32 = arith.constant 0 : i32
    %c0_i32_0 = arith.constant 0 : i32
    %c0_i32_1 = arith.constant 0 : i32
    return %c0_i32, %c0_i32_0 : i32, i32
  }
  func.func @transform_5(%arg0: i32, %arg1: i32) -> (i32, i32) {
    %c0_i32 = arith.constant 0 : i32
    return %arg0, %arg1 : i32, i32
  }
}

module attributes {stable_mosaic.version = 11 : i64} {
  func.func @_conv_mm_kernel(%arg0: i32, %arg1: i32, %arg2: memref<32x576xbf16, #tpu.memory_space<vmem>>, %arg3: memref<576x128xbf16, #tpu.memory_space<vmem>>, %arg4: memref<1x128xf32, #tpu.memory_space<vmem>>, %arg5: memref<1x128xf32, #tpu.memory_space<vmem>>, %arg6: memref<128x128xf32, #tpu.memory_space<vmem>>, %arg7: memref<32x128xbf16, #tpu.memory_space<vmem>>) attributes {dimension_semantics = [#tpu.dimension_semantics<parallel>, #tpu.dimension_semantics<parallel>], iteration_bounds = array<i64: 1, 1>, scalar_prefetch = 0 : i64, scratch_operands = 0 : i64, tpu.core_type = #tpu.core_type<tc>, window_params = [{transform_indices = @transform_0, window_bounds = array<i64: 32, 576>}, {transform_indices = @transform_1, window_bounds = array<i64: 576, 128>}, {transform_indices = @transform_2, window_bounds = array<i64: 1, 128>}, {transform_indices = @transform_3, window_bounds = array<i64: 1, 128>}, {pipeline_mode = #tpu.pipeline_mode<synchronous>, transform_indices = @transform_4, window_bounds = array<i64: 128, 128>}, {transform_indices = @transform_5, window_bounds = array<i64: 32, 128>}]} {
    %c0 = arith.constant 0 : index
    %c0_0 = arith.constant 0 : index
    %0 = vector.load %arg2[%c0, %c0_0] : memref<32x576xbf16, #tpu.memory_space<vmem>>, vector<32x576xbf16>
    %1 = arith.extf %0 : vector<32x576xbf16> to vector<32x576xf32>
    %cst = arith.constant 0.000000e+00 : f32
    %2 = vector.broadcast %cst : f32 to vector<32x576xf32>
    %3 = arith.maximumf %1, %2 : vector<32x576xf32>
    %4 = arith.truncf %3 : vector<32x576xf32> to vector<32x576xbf16>
    %c0_1 = arith.constant 0 : index
    %c0_2 = arith.constant 0 : index
    %5 = vector.load %arg3[%c0_1, %c0_2] : memref<576x128xbf16, #tpu.memory_space<vmem>>, vector<576x128xbf16>
    %cst_3 = arith.constant dense<0.000000e+00> : vector<32x128xf32>
    %6 = tpu.matmul %4, %5, %cst_3 {dimension_numbers = #tpu.dot_dimension_numbers<[1], [0], [0], [1], [0, 0, 1, 1], [], []>} : vector<32x576xbf16>, vector<576x128xbf16>, vector<32x128xf32> -> vector<32x128xf32>
    %cst_4 = arith.constant dense<0.000000e+00> : vector<128xf32>
    %7 = vector.multi_reduction <add>, %6, %cst_4 [0] : vector<32x128xf32> to vector<128xf32>
    %8 = vector.shape_cast %7 : vector<128xf32> to vector<1x128xf32>
    %9 = arith.mulf %6, %6 : vector<32x128xf32>
    %cst_5 = arith.constant dense<0.000000e+00> : vector<128xf32>
    %10 = vector.multi_reduction <add>, %9, %cst_5 [0] : vector<32x128xf32> to vector<128xf32>
    %11 = vector.shape_cast %10 : vector<128xf32> to vector<1x128xf32>
    %c0_6 = arith.constant 0 : index
    %c0_7 = arith.constant 0 : index
    %12 = vector.load %arg6[%c0_6, %c0_7] : memref<128x128xf32, #tpu.memory_space<vmem>>, vector<128x128xf32>
    %cst_8 = arith.constant dense<0.000000e+00> : vector<1x128xf32>
    %13 = tpu.matmul %8, %12, %cst_8 {dimension_numbers = #tpu.dot_dimension_numbers<[1], [0], [0], [1], [0, 0, 1, 1], [], []>} : vector<1x128xf32>, vector<128x128xf32>, vector<1x128xf32> -> vector<1x128xf32>
    %cst_9 = arith.constant dense<0.000000e+00> : vector<1x128xf32>
    %14 = tpu.matmul %11, %12, %cst_9 {dimension_numbers = #tpu.dot_dimension_numbers<[1], [0], [0], [1], [0, 0, 1, 1], [], []>} : vector<1x128xf32>, vector<128x128xf32>, vector<1x128xf32> -> vector<1x128xf32>
    %cst_10 = arith.constant 7.812500e-03 : f32
    %15 = vector.broadcast %cst_10 : f32 to vector<1x128xf32>
    %16 = arith.mulf %13, %15 : vector<1x128xf32>
    %cst_11 = arith.constant 7.812500e-03 : f32
    %17 = vector.broadcast %cst_11 : f32 to vector<1x128xf32>
    %18 = arith.mulf %14, %17 : vector<1x128xf32>
    %19 = arith.mulf %16, %16 : vector<1x128xf32>
    %20 = arith.subf %18, %19 : vector<1x128xf32>
    %cst_12 = arith.constant 0.000000e+00 : f32
    %21 = vector.broadcast %cst_12 : f32 to vector<1x128xf32>
    %22 = arith.maximumf %20, %21 : vector<1x128xf32>
    %c0_13 = arith.constant 0 : index
    %c0_14 = arith.constant 0 : index
    %23 = vector.load %arg4[%c0_13, %c0_14] : memref<1x128xf32, #tpu.memory_space<vmem>>, vector<1x128xf32>
    %cst_15 = arith.constant 9.99999974E-6 : f32
    %24 = vector.broadcast %cst_15 : f32 to vector<1x128xf32>
    %25 = arith.addf %22, %24 : vector<1x128xf32>
    %26 = math.rsqrt %25 : vector<1x128xf32>
    %27 = arith.mulf %23, %26 : vector<1x128xf32>
    %28 = vector.broadcast %27 : vector<1x128xf32> to vector<32x128xf32>
    %29 = arith.mulf %6, %28 : vector<32x128xf32>
    %c0_16 = arith.constant 0 : index
    %c0_17 = arith.constant 0 : index
    %30 = vector.load %arg5[%c0_16, %c0_17] : memref<1x128xf32, #tpu.memory_space<vmem>>, vector<1x128xf32>
    %31 = arith.mulf %16, %27 : vector<1x128xf32>
    %32 = arith.subf %30, %31 : vector<1x128xf32>
    %33 = vector.broadcast %32 : vector<1x128xf32> to vector<32x128xf32>
    %34 = arith.addf %29, %33 : vector<32x128xf32>
    %35 = arith.truncf %34 : vector<32x128xf32> to vector<32x128xbf16>
    %c0_18 = arith.constant 0 : index
    %c0_19 = arith.constant 0 : index
    %36 = vector.load %arg7[%c0_18, %c0_19] : memref<32x128xbf16, #tpu.memory_space<vmem>>, vector<32x128xbf16>
    tpu.vector_store %arg7[%c0_18, %c0_19], %35 {strides = array<i32>} : memref<32x128xbf16, #tpu.memory_space<vmem>>, vector<32x128xbf16>,
    return
  }
  func.func @transform_0(%arg0: i32, %arg1: i32) -> (i32, i32) {
    %c0_i32 = arith.constant 0 : i32
    %c0_i32_0 = arith.constant 0 : i32
    return %arg0, %c0_i32 : i32, i32
  }
  func.func @transform_1(%arg0: i32, %arg1: i32) -> (i32, i32) {
    %c0_i32 = arith.constant 0 : i32
    %c0_i32_0 = arith.constant 0 : i32
    return %c0_i32, %arg1 : i32, i32
  }
  func.func @transform_2(%arg0: i32, %arg1: i32) -> (i32, i32) {
    %c0_i32 = arith.constant 0 : i32
    %c0_i32_0 = arith.constant 0 : i32
    return %c0_i32, %arg1 : i32, i32
  }
  func.func @transform_3(%arg0: i32, %arg1: i32) -> (i32, i32) {
    %c0_i32 = arith.constant 0 : i32
    %c0_i32_0 = arith.constant 0 : i32
    return %c0_i32, %arg1 : i32, i32
  }
  func.func @transform_4(%arg0: i32, %arg1: i32) -> (i32, i32) {
    %c0_i32 = arith.constant 0 : i32
    %c0_i32_0 = arith.constant 0 : i32
    %c0_i32_1 = arith.constant 0 : i32
    return %c0_i32, %c0_i32_0 : i32, i32
  }
  func.func @transform_5(%arg0: i32, %arg1: i32) -> (i32, i32) {
    %c0_i32 = arith.constant 0 : i32
    return %arg0, %arg1 : i32, i32
  }
}

module attributes {stable_mosaic.version = 11 : i64} {
  func.func @_conv_mm_kernel(%arg0: i32, %arg1: i32, %arg2: memref<128x288xbf16, #tpu.memory_space<vmem>>, %arg3: memref<288x128xbf16, #tpu.memory_space<vmem>>, %arg4: memref<1x128xf32, #tpu.memory_space<vmem>>, %arg5: memref<1x128xf32, #tpu.memory_space<vmem>>, %arg6: memref<128x128xf32, #tpu.memory_space<vmem>>, %arg7: memref<128x128xbf16, #tpu.memory_space<vmem>>) attributes {dimension_semantics = [#tpu.dimension_semantics<parallel>, #tpu.dimension_semantics<parallel>], iteration_bounds = array<i64: 1, 1>, scalar_prefetch = 0 : i64, scratch_operands = 0 : i64, tpu.core_type = #tpu.core_type<tc>, window_params = [{transform_indices = @transform_0, window_bounds = array<i64: 128, 288>}, {transform_indices = @transform_1, window_bounds = array<i64: 288, 128>}, {transform_indices = @transform_2, window_bounds = array<i64: 1, 128>}, {transform_indices = @transform_3, window_bounds = array<i64: 1, 128>}, {pipeline_mode = #tpu.pipeline_mode<synchronous>, transform_indices = @transform_4, window_bounds = array<i64: 128, 128>}, {transform_indices = @transform_5, window_bounds = array<i64: 128, 128>}]} {
    %c0 = arith.constant 0 : index
    %c0_0 = arith.constant 0 : index
    %0 = vector.load %arg2[%c0, %c0_0] : memref<128x288xbf16, #tpu.memory_space<vmem>>, vector<128x288xbf16>
    %1 = arith.extf %0 : vector<128x288xbf16> to vector<128x288xf32>
    %cst = arith.constant 0.000000e+00 : f32
    %2 = vector.broadcast %cst : f32 to vector<128x288xf32>
    %3 = arith.maximumf %1, %2 : vector<128x288xf32>
    %4 = arith.truncf %3 : vector<128x288xf32> to vector<128x288xbf16>
    %c0_1 = arith.constant 0 : index
    %c0_2 = arith.constant 0 : index
    %5 = vector.load %arg3[%c0_1, %c0_2] : memref<288x128xbf16, #tpu.memory_space<vmem>>, vector<288x128xbf16>
    %cst_3 = arith.constant dense<0.000000e+00> : vector<128x128xf32>
    %6 = tpu.matmul %4, %5, %cst_3 {dimension_numbers = #tpu.dot_dimension_numbers<[1], [0], [0], [1], [0, 0, 1, 1], [], []>} : vector<128x288xbf16>, vector<288x128xbf16>, vector<128x128xf32> -> vector<128x128xf32>
    %cst_4 = arith.constant dense<0.000000e+00> : vector<128xf32>
    %7 = vector.multi_reduction <add>, %6, %cst_4 [0] : vector<128x128xf32> to vector<128xf32>
    %8 = vector.shape_cast %7 : vector<128xf32> to vector<1x128xf32>
    %9 = arith.mulf %6, %6 : vector<128x128xf32>
    %cst_5 = arith.constant dense<0.000000e+00> : vector<128xf32>
    %10 = vector.multi_reduction <add>, %9, %cst_5 [0] : vector<128x128xf32> to vector<128xf32>
    %11 = vector.shape_cast %10 : vector<128xf32> to vector<1x128xf32>
    %c0_6 = arith.constant 0 : index
    %c0_7 = arith.constant 0 : index
    %12 = vector.load %arg6[%c0_6, %c0_7] : memref<128x128xf32, #tpu.memory_space<vmem>>, vector<128x128xf32>
    %cst_8 = arith.constant dense<0.000000e+00> : vector<1x128xf32>
    %13 = tpu.matmul %8, %12, %cst_8 {dimension_numbers = #tpu.dot_dimension_numbers<[1], [0], [0], [1], [0, 0, 1, 1], [], []>} : vector<1x128xf32>, vector<128x128xf32>, vector<1x128xf32> -> vector<1x128xf32>
    %cst_9 = arith.constant dense<0.000000e+00> : vector<1x128xf32>
    %14 = tpu.matmul %11, %12, %cst_9 {dimension_numbers = #tpu.dot_dimension_numbers<[1], [0], [0], [1], [0, 0, 1, 1], [], []>} : vector<1x128xf32>, vector<128x128xf32>, vector<1x128xf32> -> vector<1x128xf32>
    %cst_10 = arith.constant 0.001953125 : f32
    %15 = vector.broadcast %cst_10 : f32 to vector<1x128xf32>
    %16 = arith.mulf %13, %15 : vector<1x128xf32>
    %cst_11 = arith.constant 0.001953125 : f32
    %17 = vector.broadcast %cst_11 : f32 to vector<1x128xf32>
    %18 = arith.mulf %14, %17 : vector<1x128xf32>
    %19 = arith.mulf %16, %16 : vector<1x128xf32>
    %20 = arith.subf %18, %19 : vector<1x128xf32>
    %cst_12 = arith.constant 0.000000e+00 : f32
    %21 = vector.broadcast %cst_12 : f32 to vector<1x128xf32>
    %22 = arith.maximumf %20, %21 : vector<1x128xf32>
    %c0_13 = arith.constant 0 : index
    %c0_14 = arith.constant 0 : index
    %23 = vector.load %arg4[%c0_13, %c0_14] : memref<1x128xf32, #tpu.memory_space<vmem>>, vector<1x128xf32>
    %cst_15 = arith.constant 9.99999974E-6 : f32
    %24 = vector.broadcast %cst_15 : f32 to vector<1x128xf32>
    %25 = arith.addf %22, %24 : vector<1x128xf32>
    %26 = math.rsqrt %25 : vector<1x128xf32>
    %27 = arith.mulf %23, %26 : vector<1x128xf32>
    %28 = vector.broadcast %27 : vector<1x128xf32> to vector<128x128xf32>
    %29 = arith.mulf %6, %28 : vector<128x128xf32>
    %c0_16 = arith.constant 0 : index
    %c0_17 = arith.constant 0 : index
    %30 = vector.load %arg5[%c0_16, %c0_17] : memref<1x128xf32, #tpu.memory_space<vmem>>, vector<1x128xf32>
    %31 = arith.mulf %16, %27 : vector<1x128xf32>
    %32 = arith.subf %30, %31 : vector<1x128xf32>
    %33 = vector.broadcast %32 : vector<1x128xf32> to vector<128x128xf32>
    %34 = arith.addf %29, %33 : vector<128x128xf32>
    %35 = arith.truncf %34 : vector<128x128xf32> to vector<128x128xbf16>
    %c0_18 = arith.constant 0 : index
    %c0_19 = arith.constant 0 : index
    %36 = vector.load %arg7[%c0_18, %c0_19] : memref<128x128xbf16, #tpu.memory_space<vmem>>, vector<128x128xbf16>
    tpu.vector_store %arg7[%c0_18, %c0_19], %35 {strides = array<i32>} : memref<128x128xbf16, #tpu.memory_space<vmem>>, vector<128x128xbf16>,
    return
  }
  func.func @transform_0(%arg0: i32, %arg1: i32) -> (i32, i32) {
    %c0_i32 = arith.constant 0 : i32
    %c0_i32_0 = arith.constant 0 : i32
    return %arg0, %c0_i32 : i32, i32
  }
  func.func @transform_1(%arg0: i32, %arg1: i32) -> (i32, i32) {
    %c0_i32 = arith.constant 0 : i32
    %c0_i32_0 = arith.constant 0 : i32
    return %c0_i32, %arg1 : i32, i32
  }
  func.func @transform_2(%arg0: i32, %arg1: i32) -> (i32, i32) {
    %c0_i32 = arith.constant 0 : i32
    %c0_i32_0 = arith.constant 0 : i32
    return %c0_i32, %arg1 : i32, i32
  }
  func.func @transform_3(%arg0: i32, %arg1: i32) -> (i32, i32) {
    %c0_i32 = arith.constant 0 : i32
    %c0_i32_0 = arith.constant 0 : i32
    return %c0_i32, %arg1 : i32, i32
  }
  func.func @transform_4(%arg0: i32, %arg1: i32) -> (i32, i32) {
    %c0_i32 = arith.constant 0 : i32
    %c0_i32_0 = arith.constant 0 : i32
    %c0_i32_1 = arith.constant 0 : i32
    return %c0_i32, %c0_i32_0 : i32, i32
  }
  func.func @transform_5(%arg0: i32, %arg1: i32) -> (i32, i32) {
    %c0_i32 = arith.constant 0 : i32
    return %arg0, %arg1 : i32, i32
  }
}

module attributes {stable_mosaic.version = 11 : i64} {
  func.func @_conv_mm_kernel(%arg0: i32, %arg1: i32, %arg2: memref<256x144xbf16, #tpu.memory_space<vmem>>, %arg3: memref<144x128xbf16, #tpu.memory_space<vmem>>, %arg4: memref<1x128xf32, #tpu.memory_space<vmem>>, %arg5: memref<256x128xf32, #tpu.memory_space<vmem>>) attributes {dimension_semantics = [#tpu.dimension_semantics<parallel>, #tpu.dimension_semantics<parallel>], iteration_bounds = array<i64: 2, 1>, scalar_prefetch = 0 : i64, scratch_operands = 0 : i64, tpu.core_type = #tpu.core_type<tc>, window_params = [{transform_indices = @transform_0, window_bounds = array<i64: 256, 144>}, {transform_indices = @transform_1, window_bounds = array<i64: 144, 128>}, {transform_indices = @transform_2, window_bounds = array<i64: 1, 128>}, {transform_indices = @transform_3, window_bounds = array<i64: 256, 128>}]} {
    %c0 = arith.constant 0 : index
    %c0_0 = arith.constant 0 : index
    %0 = vector.load %arg2[%c0, %c0_0] : memref<256x144xbf16, #tpu.memory_space<vmem>>, vector<256x144xbf16>
    %1 = arith.extf %0 : vector<256x144xbf16> to vector<256x144xf32>
    %cst = arith.constant 0.000000e+00 : f32
    %2 = vector.broadcast %cst : f32 to vector<256x144xf32>
    %3 = arith.maximumf %1, %2 : vector<256x144xf32>
    %4 = arith.truncf %3 : vector<256x144xf32> to vector<256x144xbf16>
    %c0_1 = arith.constant 0 : index
    %c0_2 = arith.constant 0 : index
    %5 = vector.load %arg3[%c0_1, %c0_2] : memref<144x128xbf16, #tpu.memory_space<vmem>>, vector<144x128xbf16>
    %cst_3 = arith.constant dense<0.000000e+00> : vector<256x128xf32>
    %6 = tpu.matmul %4, %5, %cst_3 {dimension_numbers = #tpu.dot_dimension_numbers<[1], [0], [0], [1], [0, 0, 1, 1], [], []>} : vector<256x144xbf16>, vector<144x128xbf16>, vector<256x128xf32> -> vector<256x128xf32>
    %c0_4 = arith.constant 0 : index
    %c0_5 = arith.constant 0 : index
    %7 = vector.load %arg4[%c0_4, %c0_5] : memref<1x128xf32, #tpu.memory_space<vmem>>, vector<1x128xf32>
    %8 = vector.broadcast %7 : vector<1x128xf32> to vector<256x128xf32>
    %9 = arith.addf %6, %8 : vector<256x128xf32>
    %10 = math.tanh %9 : vector<256x128xf32>
    %c0_6 = arith.constant 0 : index
    %c0_7 = arith.constant 0 : index
    %11 = vector.load %arg5[%c0_6, %c0_7] : memref<256x128xf32, #tpu.memory_space<vmem>>, vector<256x128xf32>
    tpu.vector_store %arg5[%c0_6, %c0_7], %10 {strides = array<i32>} : memref<256x128xf32, #tpu.memory_space<vmem>>, vector<256x128xf32>,
    return
  }
  func.func @transform_0(%arg0: i32, %arg1: i32) -> (i32, i32) {
    %c0_i32 = arith.constant 0 : i32
    %c0_i32_0 = arith.constant 0 : i32
    return %arg0, %c0_i32 : i32, i32
  }
  func.func @transform_1(%arg0: i32, %arg1: i32) -> (i32, i32) {
    %c0_i32 = arith.constant 0 : i32
    %c0_i32_0 = arith.constant 0 : i32
    return %c0_i32, %arg1 : i32, i32
  }
  func.func @transform_2(%arg0: i32, %arg1: i32) -> (i32, i32) {
    %c0_i32 = arith.constant 0 : i32
    %c0_i32_0 = arith.constant 0 : i32
    return %c0_i32, %arg1 : i32, i32
  }
  func.func @transform_3(%arg0: i32, %arg1: i32) -> (i32, i32) {
    %c0_i32 = arith.constant 0 : i32
    return %arg0, %arg1 : i32, i32
  }
}

</mosaic_0001>

<bundles_post_ra>
// kernel: unet_forward.10
= control target key start
LH: loop header
LB: loop body
LE: loop exit
PB: predicated region body
PF: predicated region fallthrough
CT: control target
= control target key end

     0   :  { %s1132_s9 = smov 0   ;;  %s1134_s10 = smov 0   ;;  %s1233_s0 = inlined_call_operand.vmem [shape: bf16[512,48], index: 0, kind: input, shape index: {}]   ;;  %s1234_s1 = inlined_call_operand.vmem [shape: bf16[48,128], index: 1, kind: input, shape index: {}]   ;;  %s1235_s2 = inlined_call_operand.vmem [shape: bf16[512,128], index: 2, kind: output, shape index: {}]  }
   0x1   :  { %s1136_s11 = smov 0  }
   0x2 LB: > { %s24_s12 = sadd.s32 1, %s1111_s10  ;;  %p786_p0 = scmp.ge.s32.totalorder %s1115_s11, 1  ;;  %s1115_s11 = sphi %s1136_s11, %s12_s11   ;;  %s1111_s10 = sphi %s1134_s10, %s1237_s10   ;;  %s1107_s9 = sphi %s1132_s9, %s1236_s9  }
   0x3   : > { %p26_p1 = scmp.ge.s32.totalorder %s24_s12, 2  ;;  %p136_p2 = scmp.lt.s32.totalorder %s1115_s11, 3 }
   0x5   : > { %s1239_s12 = smov (%p26_p1, %s24_s12), 0  ;;  %p137_p3 = pnand %p786_p0, %p136_p2 }
   0x6   : > { %v1074_v0 = vld [vmem:[%s1234_s1] sm:$0xff] (!%p137_p3)   ;;  %s787_s15 = sshll.u32 (!%p137_p3), %s1107_s9, 5  ;;  %v1075_v1 = vld [vmem:[%s1234_s1 + $0x8] sm:$0xff] (!%p137_p3)   ;;  %v1076_v2 = vld [vmem:[%s1234_s1 + $0x10] sm:$0xff] (!%p137_p3)   ;;  %vm321_vm0 = vcmask (!%p137_p3), 392192  }
   0x7   : > { %140 = sbr.rel (%p137_p3) target bundleno = 262 (0x106), region = 28  ;;  %p166_p4 = scmp.lt.s32.totalorder (!%p137_p3), %s787_s15, 63  ;;  %1006 = vmatprep.subr.bf16.mxu0 (!%p137_p3), %v1074_v0  ;;  %1044 = vmatprep.subr.bf16.mxu1 (!%p137_p3), %v1074_v0 }
   0x8   : > { %1007 = vmatpush3.bf16.msra.mxu0 (!%p137_p3), %v1074_v0  ;;  %1047 = vmatpush3.bf16.msra.mxu1 (!%p137_p3), %v1074_v0 }
   0x9   : > { %1008 = vmatprep.subr.bf16.mxu0 (!%p137_p3), %v1075_v1  ;;  %1045 = vmatprep.subr.bf16.mxu1 (!%p137_p3), %v1075_v1 }
   0xc   : > { %1009 = vmatpush3.bf16.msra.mxu0 (!%p137_p3), %v1075_v1  ;;  %1048 = vmatpush3.bf16.msra.mxu1 (!%p137_p3), %v1075_v1 }
   0xd   : > { %1010 = vmatprep.subr.bf16.mxu0 (!%p137_p3), %v1076_v2  ;;  %1046 = vmatprep.subr.bf16.mxu1 (!%p137_p3), %v1076_v2 }
   0xe   : > { %s1241_s15 = smov (!%p166_p4, %s787_s15), 63 }
   0xf   : > { %s788_s20 = sshll.u32 %s1241_s15, 2 }
  0x10   : > { %s1167_s23 = scalar_lea.vmem %s1233_s0, %s788_s20  ;;  %1011 = vmatpush3.bf16.msra.mxu0 %v1076_v2  ;;  %1049 = vmatpush3.bf16.msra.mxu1 %v1076_v2  ;;  %s1206_s26 = scalar_lea.vmem %s1235_s2, %s788_s20 }
  0x11   : > { %v1077_v3 = vld [vmem:[%s1167_s23] sm:$0xff]   ;;  %v1079_v5 = vld [vmem:[%s1167_s23 + $0x8] sm:$0xff]   ;;  %v1081_v7 = vld [vmem:[%s1167_s23 + $0x10] sm:$0xff]  }
  0x12   : > { %v1078_v4 = vld [vmem:[%s1167_s23 + $0x40] sm:$0xff]   ;;  %1012 = vmatprep.mubr.msk.bf16.mxu0 %vm321_vm0, %v1077_v3  ;;  %v1080_v6 = vld [vmem:[%s1167_s23 + $0x48] sm:$0xff]   ;;  %v1082_v8 = vld [vmem:[%s1167_s23 + $0x50] sm:$0xff]  }
  0x13   : > { %1028 = vmatprep.mubr.msk.bf16.mxu1 %vm321_vm0, %v1078_v4  ;;  %1013 = vmatmul.mubr.msk.bf16.vlgmr.msra.gmra.mrb[0].mxu0 %vm321_vm0, %v1079_v5  ;;  %v1083_v9 = vld [vmem:[%s1167_s23 + $0x18] sm:$0xff]   ;;  %v1085_v11 = vld [vmem:[%s1167_s23 + $0x20] sm:$0xff]   ;;  %v1087_v13 = vld [vmem:[%s1167_s23 + $0x28] sm:$0xff]  }
  0x14   : > { %1029 = vmatmul.mubr.msk.bf16.vlgmr.msra.gmra.mrb[0].mxu1 %vm321_vm0, %v1080_v6  ;;  %1016 = vmatprep.mubr.msk.bf16.mxu0 %vm321_vm0, %v1081_v7  ;;  %v1084_v10 = vld [vmem:[%s1167_s23 + $0x58] sm:$0xff]   ;;  %v1086_v12 = vld [vmem:[%s1167_s23 + $0x60] sm:$0xff]   ;;  %v1088_v14 = vld [vmem:[%s1167_s23 + $0x68] sm:$0xff]  }
  0x15   : > { %1032 = vmatprep.mubr.msk.bf16.mxu1 %vm321_vm0, %v1082_v8  ;;  %v1089_v15 = vld [vmem:[%s1167_s23 + $0x30] sm:$0xff]   ;;  %v1091_v17 = vld [vmem:[%s1167_s23 + $0x38] sm:$0xff]  }
  0x16   : > { %v1090_v16 = vld [vmem:[%s1167_s23 + $0x70] sm:$0xff]   ;;  %v1092_v18 = vld [vmem:[%s1167_s23 + $0x78] sm:$0xff]  }
  0x1b   : > { %1017 = vmatmul.mubr.msk.bf16.gmra.mrb[4].mxu0 %vm321_vm0, %v1083_v9 }
  0x1c   : > { %1033 = vmatmul.mubr.msk.bf16.gmra.mrb[4].mxu1 %vm321_vm0, %v1084_v10  ;;  %1020 = vmatprep.mubr.msk.bf16.mxu0 %vm321_vm0, %v1085_v11 }
  0x1d   : > { %1036 = vmatprep.mubr.msk.bf16.mxu1 %vm321_vm0, %v1086_v12 }
  0x23   : > { %1021 = vmatmul.mubr.msk.bf16.gmra.mrb[8].mxu0 %vm321_vm0, %v1087_v13 }
  0x24   : > { %1037 = vmatmul.mubr.msk.bf16.gmra.mrb[8].mxu1 %vm321_vm0, %v1088_v14  ;;  %1024 = vmatprep.mubr.msk.bf16.mxu0 %vm321_vm0, %v1089_v15 }
  0x25   : > { %1040 = vmatprep.mubr.msk.bf16.mxu1 %vm321_vm0, %v1090_v16 }
  0x2b   : > { %1025 = vmatmul.mubr.msk.bf16.gmra.mrb[12].mxu0 %vm321_vm0, %v1091_v17 }
  0x2c   : > { %1041 = vmatmul.mubr.msk.bf16.gmra.mrb[12].mxu1 %vm321_vm0, %v1092_v18 }
  0xe6   : > { %v1014_v19 = vpop.f32.mrb[0].mxu0 }
  0xe7   : > { %v1030_v20 = vpop.f32.mrb[0].mxu1  ;;  %v404_v21 = vpop.f32.mrb[1].mxu0 }
  0xe8   : > { %v468_v22 = vpop.f32.mrb[1].mxu1  ;;  %v1015_v23 = vpop.f32.mrb[2].mxu0 }
  0xe9   : > { %v1031_v24 = vpop.f32.mrb[2].mxu1  ;;  %v900_v25 = vpack.c.bf16 %v1015_v23, %v1014_v19  ;;  %v407_v27 = vpop.f32.mrb[3].mxu0 }
  0xea   : > { %v940_v26 = vpack.c.bf16 %v1031_v24, %v1030_v20  ;;  %v471_v28 = vpop.f32.mrb[3].mxu1  ;;  %v895_v29 = vpack.c.bf16 %v407_v27, %v404_v21 }
  0xeb   : > { %v935_v30 = vpack.c.bf16 %v471_v28, %v468_v22  ;;  %972 = vst [vmem:[%s1206_s26 + $0x8] sm:$0xff] %v900_v25  }
  0xec   : > { %980 = vst [vmem:[%s1206_s26 + $0x48] sm:$0xff] %v940_v26   ;;  %896 = vst [vmem:[%s1206_s26] sm:$0xff] %v895_v29  }
  0xed   : > { %979 = vst [vmem:[%s1206_s26 + $0x40] sm:$0xff] %v935_v30  }
  0xee   : > { %v1018_v31 = vpop.f32.mrb[4].mxu0 }
  0xef   : > { %v1034_v32 = vpop.f32.mrb[4].mxu1  ;;  %v420_v33 = vpop.f32.mrb[5].mxu0 }
  0xf0   : > { %v484_v34 = vpop.f32.mrb[5].mxu1  ;;  %v1019_v35 = vpop.f32.mrb[6].mxu0 }
  0xf1   : > { %v1035_v36 = vpop.f32.mrb[6].mxu1  ;;  %v910_v37 = vpack.c.bf16 %v1019_v35, %v1018_v31  ;;  %v423_v39 = vpop.f32.mrb[7].mxu0 }
  0xf2   : > { %v950_v38 = vpack.c.bf16 %v1035_v36, %v1034_v32  ;;  %v487_v40 = vpop.f32.mrb[7].mxu1  ;;  %v905_v41 = vpack.c.bf16 %v423_v39, %v420_v33 }
  0xf3   : > { %v945_v42 = vpack.c.bf16 %v487_v40, %v484_v34  ;;  %974 = vst [vmem:[%s1206_s26 + $0x18] sm:$0xff] %v910_v37  }
  0xf4   : > { %982 = vst [vmem:[%s1206_s26 + $0x58] sm:$0xff] %v950_v38   ;;  %973 = vst [vmem:[%s1206_s26 + $0x10] sm:$0xff] %v905_v41  }
  0xf5   : > { %981 = vst [vmem:[%s1206_s26 + $0x50] sm:$0xff] %v945_v42  }
  0xf6   : > { %v1022_v43 = vpop.f32.mrb[8].mxu0 }
  0xf7   : > { %v1038_v44 = vpop.f32.mrb[8].mxu1  ;;  %v436_v45 = vpop.f32.mrb[9].mxu0 }
  0xf8   : > { %v500_v46 = vpop.f32.mrb[9].mxu1  ;;  %v1023_v47 = vpop.f32.mrb[10].mxu0 }
  0xf9   : > { %v1039_v48 = vpop.f32.mrb[10].mxu1  ;;  %v920_v49 = vpack.c.bf16 %v1023_v47, %v1022_v43  ;;  %v439_v51 = vpop.f32.mrb[11].mxu0 }
  0xfa   : > { %v960_v50 = vpack.c.bf16 %v1039_v48, %v1038_v44  ;;  %v503_v52 = vpop.f32.mrb[11].mxu1  ;;  %v915_v53 = vpack.c.bf16 %v439_v51, %v436_v45 }
  0xfb   : > { %v955_v54 = vpack.c.bf16 %v503_v52, %v500_v46  ;;  %976 = vst [vmem:[%s1206_s26 + $0x28] sm:$0xff] %v920_v49  }
  0xfc   : > { %984 = vst [vmem:[%s1206_s26 + $0x68] sm:$0xff] %v960_v50   ;;  %975 = vst [vmem:[%s1206_s26 + $0x20] sm:$0xff] %v915_v53  }
  0xfd   : > { %983 = vst [vmem:[%s1206_s26 + $0x60] sm:$0xff] %v955_v54  }
  0xfe   : > { %v1026_v55 = vpop.f32.mrb[12].mxu0 }
  0xff   : > { %v1042_v56 = vpop.f32.mrb[12].mxu1  ;;  %v452_v57 = vpop.f32.mrb[13].mxu0 }
 0x100   : > { %v516_v58 = vpop.f32.mrb[13].mxu1  ;;  %v1027_v59 = vpop.f32.mrb[14].mxu0 }
 0x101   : > { %v1043_v60 = vpop.f32.mrb[14].mxu1  ;;  %v930_v61 = vpack.c.bf16 %v1027_v59, %v1026_v55  ;;  %v455_v63 = vpop.f32.mrb[15].mxu0 }
 0x102   : > { %v970_v62 = vpack.c.bf16 %v1043_v60, %v1042_v56  ;;  %v519_v0 = vpop.f32.mrb[15].mxu1  ;;  %v925_v1 = vpack.c.bf16 %v455_v63, %v452_v57 }
 0x103   : > { %v965_v2 = vpack.c.bf16 %v519_v0, %v516_v58  ;;  %978 = vst [vmem:[%s1206_s26 + $0x38] sm:$0xff] %v930_v61  }
 0x104   : > { %986 = vst [vmem:[%s1206_s26 + $0x78] sm:$0xff] %v970_v62   ;;  %977 = vst [vmem:[%s1206_s26 + $0x30] sm:$0xff] %v925_v1  }
 0x105   : > { %985 = vst [vmem:[%s1206_s26 + $0x70] sm:$0xff] %v965_v2  }
 0x106 PF: > { %s12_s11 = sadd.s32 1, %s1115_s11   ;;  %s1236_s9 = smov %s1111_s10 }
 0x107   : > { %p9_p5 = scmp.ge.s32.totalorder %s12_s11, 4   ;;  %s1237_s10 = smov %s1239_s12 }
 0x109   :  { %11 = sbr.rel (!%p9_p5) target bundleno = 2 (0x2), region = 61 }

// kernel: unet_forward.11
= control target key start
LH: loop header
LB: loop body
LE: loop exit
PB: predicated region body
PF: predicated region fallthrough
CT: control target
= control target key end

     0   :  { %s869_s1 = inlined_call_operand.vmem [shape: bf16[128,128], index: 1, kind: input, shape index: {}]   ;;  %s870_s0 = inlined_call_operand.vmem [shape: bf16[128,128], index: 0, kind: input, shape index: {}]   ;;  %s871_s2 = inlined_call_operand.vmem [shape: f32[1,128], index: 2, kind: input, shape index: {}]   ;;  %s872_s3 = inlined_call_operand.vmem [shape: f32[1,128], index: 3, kind: input, shape index: {}]   ;;  %s873_s4 = inlined_call_operand.vmem [shape: bf16[128,128], index: 4, kind: output, shape index: {}]  }
   0x1   :  { %v655_v0 = vld [vmem:[%s869_s1] sm:$0xff]   ;;  %v656_v1 = vld [vmem:[%s869_s1 + $0x8] sm:$0xff]   ;;  %v657_v2 = vld [vmem:[%s869_s1 + $0x10] sm:$0xff]  }
   0x2   :  { %607 = vmatprep.subr.bf16.mxu0 %v655_v0  ;;  %639 = vmatprep.subr.bf16.mxu1 %v655_v0  ;;  %v658_v3 = vld [vmem:[%s869_s1 + $0x18] sm:$0xff]   ;;  %v506_v4 = vld [vmem:[%s870_s0] sm:$0xff]   ;;  %v577_v12 = vld [vmem:[%s870_s0 + $0x8] sm:$0xff]  }
   0x3   :  { %608 = vmatpush3.bf16.msra.mxu0 %v655_v0  ;;  %647 = vmatpush3.bf16.msra.mxu1 %v655_v0  ;;  %v507_v5 = vunpack.c.l.bf16 %v506_v4  ;;  %v508_v6 = vunpack.c.h.bf16 %v506_v4  ;;  %v659_v9 = vld [vmem:[%s869_s1 + $0x20] sm:$0xff]   ;;  %v578_v15 = vld [vmem:[%s870_s0 + $0x10] sm:$0xff]   ;;  %v581_v16 = vld [vmem:[%s870_s0 + $0x28] sm:$0xff]   ;;  %v511_v18 = vunpack.c.l.bf16 %v577_v12  ;;  %v512_v19 = vunpack.c.h.bf16 %v577_v12 }
   0x4   :  { %609 = vmatprep.subr.bf16.mxu0 %v656_v1  ;;  %640 = vmatprep.subr.bf16.mxu1 %v656_v1  ;;  %v580_v13 = vld [vmem:[%s870_s0 + $0x20] sm:$0xff]   ;;  %v660_v17 = vld [vmem:[%s869_s1 + $0x28] sm:$0xff]   ;;  %v515_v22 = vunpack.c.l.bf16 %v578_v15  ;;  %v516_v23 = vunpack.c.h.bf16 %v578_v15  ;;  %v527_v24 = vunpack.c.l.bf16 %v581_v16  ;;  %v582_v25 = vld [vmem:[%s870_s0 + $0x30] sm:$0xff]   ;;  %v528_v28 = vunpack.c.h.bf16 %v581_v16 }
   0x5   :  { %vm50_vm0 = vcmp.ge.f32.partialorder %v507_v5, 0.0  ;;  %vm51_vm1 = vcmp.ge.f32.partialorder %v508_v6, 0.0  ;;  %v66_v7 = vmul.f32 0.2, %v507_v5  ;;  %v67_v8 = vmul.f32 0.2, %v508_v6 }
   0x6   :  { %v523_v20 = vunpack.c.l.bf16 %v580_v13  ;;  %v524_v21 = vunpack.c.h.bf16 %v580_v13  ;;  %v661_v29 = vld [vmem:[%s869_s1 + $0x30] sm:$0xff]   ;;  %vm52_vm4 = vcmp.ge.f32.partialorder %v511_v18, 0.0  ;;  %vm53_vm5 = vcmp.ge.f32.partialorder %v512_v19, 0.0  ;;  %v579_v31 = vld [vmem:[%s870_s0 + $0x18] sm:$0xff]  }
   0x7   :  { %610 = vmatpush3.bf16.msra.mxu0 %v656_v1  ;;  %648 = vmatpush3.bf16.msra.mxu1 %v656_v1  ;;  %v82_v10 = vsel %vm50_vm0, %v507_v5, %v66_v7  ;;  %v83_v11 = vsel %vm51_vm1, %v508_v6, %v67_v8  ;;  %v68_v30 = vmul.f32 0.2, %v511_v18  ;;  %v531_v34 = vunpack.c.l.bf16 %v582_v25  ;;  %v662_v36 = vld [vmem:[%s869_s1 + $0x38] sm:$0xff]  }
   0x8   :  { %611 = vmatprep.subr.bf16.mxu0 %v657_v2  ;;  %641 = vmatprep.subr.bf16.mxu1 %v657_v2  ;;  %v98_v14 = vpack.c.bf16 %v83_v11, %v82_v10  ;;  %vm58_vm2 = vcmp.ge.f32.partialorder %v523_v20, 0.0  ;;  %vm59_vm3 = vcmp.ge.f32.partialorder %v524_v21, 0.0  ;;  %v74_v26 = vmul.f32 0.2, %v523_v20  ;;  %v583_v40 = vld [vmem:[%s870_s0 + $0x38] sm:$0xff]  }
   0x9   :  { %v75_v27 = vmul.f32 0.2, %v524_v21  ;;  %v532_v35 = vunpack.c.h.bf16 %v582_v25  ;;  %v69_v37 = vmul.f32 0.2, %v512_v19  ;;  %vm54_vm6 = vcmp.ge.f32.partialorder %v515_v22, 0.0 }
   0xa   :  { %623 = vmatprep.mubr.bf16.mxu0 %v98_v14  ;;  %v90_v32 = vsel %vm58_vm2, %v523_v20, %v74_v26  ;;  %v70_v38 = vmul.f32 0.2, %v515_v22  ;;  %v71_v41 = vmul.f32 0.2, %v516_v23  ;;  %v76_v42 = vmul.f32 0.2, %v527_v24 }
   0xb   :  { %612 = vmatpush3.bf16.msra.mxu0 %v657_v2  ;;  %649 = vmatpush3.bf16.msra.mxu1 %v657_v2  ;;  %v91_v33 = vsel %vm59_vm3, %v524_v21, %v75_v27  ;;  %v77_v43 = vmul.f32 0.2, %v528_v28  ;;  %vm60_vm7 = vcmp.ge.f32.partialorder %v527_v24, 0.0  ;;  %vm61_vm8 = vcmp.ge.f32.partialorder %v528_v28, 0.0 }
   0xc   :  { %613 = vmatprep.subr.bf16.mxu0 %v658_v3  ;;  %642 = vmatprep.subr.bf16.mxu1 %v658_v3  ;;  %v102_v39 = vpack.c.bf16 %v91_v33, %v90_v32  ;;  %v78_v44 = vmul.f32 0.2, %v531_v34  ;;  %v79_v45 = vmul.f32 0.2, %v532_v35  ;;  %vm55_vm9 = vcmp.ge.f32.partialorder %v516_v23, 0.0 }
   0xd   :  { %v519_v46 = vunpack.c.l.bf16 %v579_v31  ;;  %vm62_vm10 = vcmp.ge.f32.partialorder %v531_v34, 0.0  ;;  %vm63_vm11 = vcmp.ge.f32.partialorder %v532_v35, 0.0  ;;  %v84_v47 = vsel %vm52_vm4, %v511_v18, %v68_v30 }
   0xe   :  { %631 = vmatprep.mubr.bf16.mxu1 %v102_v39  ;;  %v85_v48 = vsel %vm53_vm5, %v512_v19, %v69_v37  ;;  %v86_v49 = vsel %vm54_vm6, %v515_v22, %v70_v38  ;;  %v520_v50 = vunpack.c.h.bf16 %v579_v31  ;;  %v92_v51 = vsel %vm60_vm7, %v527_v24, %v76_v42 }
   0xf   :  { %614 = vmatpush3.bf16.msra.mxu0 %v658_v3  ;;  %650 = vmatpush3.bf16.msra.mxu1 %v658_v3  ;;  %v93_v52 = vsel %vm61_vm8, %v528_v28, %v77_v43  ;;  %v535_v53 = vunpack.c.l.bf16 %v583_v40  ;;  %v536_v54 = vunpack.c.h.bf16 %v583_v40  ;;  %v87_v55 = vsel %vm55_vm9, %v516_v23, %v71_v41 }
  0x10   :  { %615 = vmatprep.subr.bf16.mxu0 %v659_v9  ;;  %643 = vmatprep.subr.bf16.mxu1 %v659_v9  ;;  %v94_v56 = vsel %vm62_vm10, %v531_v34, %v78_v44  ;;  %v95_v57 = vsel %vm63_vm11, %v532_v35, %v79_v45  ;;  %v99_v58 = vpack.c.bf16 %v85_v48, %v84_v47  ;;  %vm56_vm12 = vcmp.ge.f32.partialorder %v519_v46, 0.0 }
  0x11   :  { %v72_v59 = vmul.f32 0.2, %v519_v46  ;;  %v73_v60 = vmul.f32 0.2, %v520_v50  ;;  %v103_v61 = vpack.c.bf16 %v93_v52, %v92_v51  ;;  %v100_v62 = vpack.c.bf16 %v87_v55, %v86_v49 }
  0x12   :  { %v104_v63 = vpack.c.bf16 %v95_v57, %v94_v56  ;;  %v80_v0 = vmul.f32 0.2, %v535_v53  ;;  %v81_v1 = vmul.f32 0.2, %v536_v54  ;;  %vm57_vm13 = vcmp.ge.f32.partialorder %v520_v50, 0.0 }
  0x13   :  { %616 = vmatpush3.bf16.msra.mxu0 %v659_v9  ;;  %651 = vmatpush3.bf16.msra.mxu1 %v659_v9  ;;  %vm64_vm14 = vcmp.ge.f32.partialorder %v535_v53, 0.0  ;;  %vm65_vm15 = vcmp.ge.f32.partialorder %v536_v54, 0.0  ;;  %v88_v2 = vsel %vm56_vm12, %v519_v46, %v72_v59  ;;  %v89_v3 = vsel %vm57_vm13, %v520_v50, %v73_v60 }
  0x14   :  { %617 = vmatprep.subr.bf16.mxu0 %v660_v17  ;;  %644 = vmatprep.subr.bf16.mxu1 %v660_v17  ;;  %v96_v4 = vsel %vm64_vm14, %v535_v53, %v80_v0  ;;  %v97_v5 = vsel %vm65_vm15, %v536_v54, %v81_v1  ;;  %v101_v6 = vpack.c.bf16 %v89_v3, %v88_v2 }
  0x15   :  { %v105_v7 = vpack.c.bf16 %v97_v5, %v96_v4 }
  0x17   :  { %618 = vmatpush3.bf16.msra.mxu0 %v660_v17  ;;  %652 = vmatpush3.bf16.msra.mxu1 %v660_v17 }
  0x18   :  { %619 = vmatprep.subr.bf16.mxu0 %v661_v29  ;;  %645 = vmatprep.subr.bf16.mxu1 %v661_v29 }
  0x1b   :  { %620 = vmatpush3.bf16.msra.mxu0 %v661_v29  ;;  %653 = vmatpush3.bf16.msra.mxu1 %v661_v29 }
  0x1c   :  { %621 = vmatprep.subr.bf16.mxu0 %v662_v36  ;;  %646 = vmatprep.subr.bf16.mxu1 %v662_v36 }
  0x1f   :  { %622 = vmatpush3.bf16.msra.mxu0 %v662_v36  ;;  %654 = vmatpush3.bf16.msra.mxu1 %v662_v36 }
  0x22   :  { %624 = vmatmul.mubr.bf16.vlgmr.msra.gmra.mrb[0].mxu0 %v99_v58  ;;  %632 = vmatmul.mubr.bf16.vlgmr.msra.gmra.mrb[0].mxu1 %v103_v61 }
  0x23   :  { %627 = vmatprep.mubr.bf16.mxu0 %v100_v62  ;;  %635 = vmatprep.mubr.bf16.mxu1 %v104_v63 }
  0x2a   :  { %628 = vmatmul.mubr.bf16.gmra.mrb[4].mxu0 %v101_v6  ;;  %636 = vmatmul.mubr.bf16.gmra.mrb[4].mxu1 %v105_v7 }
  0xf5   :  { %v743_v8 = vpop.f32.mrb[0].mxu0  ;;  %v745_v9 = vpop.f32.mrb[0].mxu1 }
  0xf6   :  { %v747_v10 = vpop.f32.mrb[1].mxu0  ;;  %v749_v11 = vpop.f32.mrb[1].mxu1  ;;  %v290_v19 = vmul.f32 %v743_v8, %v743_v8  ;;  %v298_v51 = vmul.f32 %v745_v9, %v745_v9 }
  0xf7   :  { %v751_v12 = vpop.f32.mrb[2].mxu0  ;;  %v753_v13 = vpop.f32.mrb[2].mxu1  ;;  %v288_v16 = vmul.f32 %v747_v10, %v747_v10  ;;  %v296_v45 = vmul.f32 %v749_v11, %v749_v11 }
  0xf8   :  { %v755_v14 = vpop.f32.mrb[3].mxu0  ;;  %v757_v15 = vpop.f32.mrb[3].mxu1  ;;  %v291_v22 = vmul.f32 %v751_v12, %v751_v12  ;;  %v299_v54 = vmul.f32 %v753_v13, %v753_v13 }
  0xf9   :  { %v267_v17 = vadd.f32 %v755_v14, %v747_v10  ;;  %v289_v18 = vmul.f32 %v755_v14, %v755_v14  ;;  %v297_v50 = vmul.f32 %v757_v15, %v757_v15 }
  0xfb   :  { %v268_v20 = vadd.f32 %v743_v8, %v267_v17  ;;  %v304_v21 = vadd.f32 %v289_v18, %v288_v16 }
  0xfd   :  { %v305_v23 = vadd.f32 %v304_v21, %v290_v19  ;;  %v770_v24 = vpop.f32.mrb[4].mxu0  ;;  %v269_v25 = vadd.f32 %v751_v12, %v268_v20  ;;  %v773_v26 = vpop.f32.mrb[4].mxu1 }
  0xfe   :  { %v775_v27 = vpop.f32.mrb[5].mxu0  ;;  %v777_v28 = vpop.f32.mrb[5].mxu1  ;;  %v294_v39 = vmul.f32 %v770_v24, %v770_v24  ;;  %v302_v63 = vmul.f32 %v773_v26, %v773_v26 }
  0xff   :  { %v270_v29 = vadd.f32 %v269_v25, %v775_v27  ;;  %v292_v30 = vmul.f32 %v775_v27, %v775_v27  ;;  %v306_v31 = vadd.f32 %v305_v23, %v291_v22  ;;  %v782_v32 = vpop.f32.mrb[6].mxu0  ;;  %v784_v33 = vpop.f32.mrb[6].mxu1  ;;  %v300_v57 = vmul.f32 %v777_v28, %v777_v28 }
 0x100   :  { %v786_v34 = vpop.f32.mrb[7].mxu0  ;;  %v788_v35 = vpop.f32.mrb[7].mxu1  ;;  %v295_v42 = vmul.f32 %v782_v32, %v782_v32  ;;  %v303_v2 = vmul.f32 %v784_v33, %v784_v33 }
 0x101   :  { %v307_v36 = vadd.f32 %v306_v31, %v292_v30  ;;  %v271_v37 = vadd.f32 %v270_v29, %v786_v34  ;;  %v293_v38 = vmul.f32 %v786_v34, %v786_v34  ;;  %v301_v62 = vmul.f32 %v788_v35, %v788_v35 }
 0x103   :  { %v272_v40 = vadd.f32 %v770_v24, %v271_v37  ;;  %v308_v41 = vadd.f32 %v307_v36, %v293_v38 }
 0x105   :  { %v309_v43 = vadd.f32 %v308_v41, %v294_v39  ;;  %v273_v44 = vadd.f32 %v782_v32, %v272_v40  ;;  %v335_v40 = vlaneseq }
 0x107   :  { %v274_v46 = vadd.f32 %v273_v44, %v749_v11  ;;  %v310_v47 = vadd.f32 %v309_v43, %v295_v42  ;;  %v336_v41 = vshrl.u32 %v335_v40, 7  ;;  %v330_v42 = vld [vmem:[%s871_s2] sm:$0x1] }
 0x109   :  { %v311_v48 = vadd.f32 %v310_v47, %v296_v45  ;;  %v275_v49 = vadd.f32 %v274_v46, %v757_v15  ;;  %v337_v43 = vsub.s32 0, %v336_v41 }
 0x10b   :  { %v276_v52 = vadd.f32 %v745_v9, %v275_v49  ;;  %v312_v53 = vadd.f32 %v311_v48, %v297_v50 }
 0x10d   :  { %v313_v55 = vadd.f32 %v312_v53, %v298_v51  ;;  %v277_v56 = vadd.f32 %v753_v13, %v276_v52 }
 0x10f   :  { %v278_v58 = vadd.f32 %v277_v56, %v777_v28  ;;  %v314_v59 = vadd.f32 %v313_v55, %v299_v54  ;;  %v356_v56 = vld [vmem:[%s872_s3] sm:$0x1] }
 0x111   :  { %v315_v60 = vadd.f32 %v314_v59, %v300_v57  ;;  %v279_v61 = vadd.f32 %v278_v58, %v788_v35 }
 0x113   :  { %v280_v0 = vadd.f32 %v773_v26, %v279_v61  ;;  %v316_v1 = vadd.f32 %v315_v60, %v301_v62 }
 0x115   :  { %v281_v3 = vadd.f32 %v784_v33, %v280_v0  ;;  %v317_v4 = vadd.f32 %v316_v1, %v302_v63 }
 0x117   :  { %v282_v5 = vrot.slane %v281_v3, 4  ;;  %v318_v6 = vadd.f32 %v317_v4, %v303_v2 }
 0x119   :  { %v283_v7 = vadd.f32 %v282_v5, %v281_v3  ;;  %v319_v16 = vrot.slane %v318_v6, 4 }
 0x11b   :  { %v284_v17 = vrot.slane %v283_v7, 2  ;;  %v320_v18 = vadd.f32 %v319_v16, %v318_v6 }
 0x11d   :  { %v285_v19 = vadd.f32 %v284_v17, %v283_v7  ;;  %v321_v20 = vrot.slane %v320_v18, 2 }
 0x11f   :  { %v286_v21 = vrot.slane %v285_v19, 1  ;;  %v322_v22 = vadd.f32 %v321_v20, %v320_v18 }
 0x121   :  { %v287_v23 = vadd.f32 %v286_v21, %v285_v19  ;;  %v323_v25 = vrot.slane %v322_v22, 1 }
 0x123   :  { %v324_v29 = vadd.f32 %v323_v25, %v322_v22  ;;  %v325_v30 = vmul.f32 0.0078125, %v287_v23 }
 0x125   :  { %v326_v31 = vmul.f32 0.0078125, %v324_v29  ;;  %v327_v36 = vmul.f32 %v325_v30, %v325_v30 }
 0x127   :  { %v328_v37 = vsub.f32 %v326_v31, %v327_v36 }
 0x129   :  { %v329_v38 = vmax.f32 %v328_v37, 0.0 }
 0x12b   :  { %v331_v39 = vadd.f32 1e-05, %v329_v38 }
 0x12d   :  { %663 = vrsqrt.f32 %v331_v39 }
 0x137   :  { %v664_v44 = vpop.eup %663 }
 0x138   :  { %v333_v45 = vmul.f32 %v664_v44, %v330_v42 }
 0x13a   :  { %v338_v46 = vrot.slane %v333_v45, %v337_v43  ;;  %v357_v47 = vmul.f32 %v333_v45, %v325_v30 }
 0x13c   :  { %v340_v48 = vmul.f32 %v338_v46, %v747_v10  ;;  %v341_v49 = vmul.f32 %v338_v46, %v755_v14  ;;  %v342_v50 = vmul.f32 %v743_v8, %v338_v46  ;;  %v343_v51 = vmul.f32 %v751_v12, %v338_v46 }
 0x13d   :  { %v344_v52 = vmul.f32 %v338_v46, %v775_v27  ;;  %v345_v53 = vmul.f32 %v338_v46, %v786_v34  ;;  %v346_v54 = vmul.f32 %v770_v24, %v338_v46  ;;  %v347_v55 = vmul.f32 %v782_v32, %v338_v46 }
 0x13e   :  { %v348_v10 = vmul.f32 %v338_v46, %v749_v11  ;;  %v349_v14 = vmul.f32 %v338_v46, %v757_v15  ;;  %v350_v8 = vmul.f32 %v745_v9, %v338_v46  ;;  %v351_v12 = vmul.f32 %v753_v13, %v338_v46 }
 0x13f   :  { %v352_v27 = vmul.f32 %v338_v46, %v777_v28  ;;  %v353_v34 = vmul.f32 %v338_v46, %v788_v35  ;;  %v354_v24 = vmul.f32 %v773_v26, %v338_v46  ;;  %v355_v32 = vmul.f32 %v784_v33, %v338_v46 }
 0x140   :  { %v358_v57 = vsub.f32 %v356_v56, %v357_v47 }
 0x142   :  { %v363_v58 = vrot.slane %v358_v57, %v337_v43 }
 0x144   :  { %v365_v59 = vadd.f32 %v363_v58, %v340_v48  ;;  %v366_v60 = vadd.f32 %v363_v58, %v341_v49  ;;  %v367_v61 = vadd.f32 %v363_v58, %v342_v50  ;;  %v368_v11 = vadd.f32 %v363_v58, %v343_v51 }
 0x145   :  { %v369_v62 = vadd.f32 %v363_v58, %v344_v52  ;;  %v370_v15 = vadd.f32 %v363_v58, %v345_v53  ;;  %v371_v63 = vadd.f32 %v363_v58, %v346_v54  ;;  %v372_v9 = vadd.f32 %v363_v58, %v347_v55 }
 0x146   :  { %v373_v0 = vadd.f32 %v363_v58, %v348_v10  ;;  %v374_v13 = vadd.f32 %v363_v58, %v349_v14  ;;  %v375_v1 = vadd.f32 %v363_v58, %v350_v8  ;;  %v376_v28 = vadd.f32 %v363_v58, %v351_v12 }
 0x147   :  { %v377_v2 = vadd.f32 %v363_v58, %v352_v27  ;;  %v378_v35 = vadd.f32 %v363_v58, %v353_v34  ;;  %v379_v3 = vadd.f32 %v363_v58, %v354_v24  ;;  %v380_v26 = vadd.f32 %v363_v58, %v355_v32 }
 0x148   :  { %v540_v4 = vpack.c.bf16 %v366_v60, %v365_v59  ;;  %v545_v33 = vpack.c.bf16 %v368_v11, %v367_v61  ;;  %v550_v5 = vpack.c.bf16 %v370_v15, %v369_v62  ;;  %v555_v6 = vpack.c.bf16 %v372_v9, %v371_v63 }
 0x149   :  { %v560_v7 = vpack.c.bf16 %v374_v13, %v373_v0  ;;  %v565_v16 = vpack.c.bf16 %v376_v28, %v375_v1  ;;  %v570_v17 = vpack.c.bf16 %v378_v35, %v377_v2  ;;  %v575_v18 = vpack.c.bf16 %v380_v26, %v379_v3 }
 0x14a   :  { %541 = vst [vmem:[%s873_s4] sm:$0xff] %v540_v4   ;;  %584 = vst [vmem:[%s873_s4 + $0x8] sm:$0xff] %v545_v33  }
 0x14b   :  { %585 = vst [vmem:[%s873_s4 + $0x10] sm:$0xff] %v550_v5   ;;  %586 = vst [vmem:[%s873_s4 + $0x18] sm:$0xff] %v555_v6  }
 0x14c   :  { %587 = vst [vmem:[%s873_s4 + $0x20] sm:$0xff] %v560_v7   ;;  %588 = vst [vmem:[%s873_s4 + $0x28] sm:$0xff] %v565_v16  }
 0x14d   :  { %589 = vst [vmem:[%s873_s4 + $0x30] sm:$0xff] %v570_v17   ;;  %590 = vst [vmem:[%s873_s4 + $0x38] sm:$0xff] %v575_v18  }

// kernel: unet_forward.12
= control target key start
LH: loop header
LB: loop body
LE: loop exit
PB: predicated region body
PF: predicated region fallthrough
CT: control target
= control target key end

     0   :  { %s511_s1 = inlined_call_operand.vmem [shape: bf16[256,128], index: 1, kind: input, shape index: {}]   ;;  %s512_s0 = inlined_call_operand.vmem [shape: bf16[32,256], index: 0, kind: input, shape index: {}]   ;;  %s513_s2 = inlined_call_operand.vmem [shape: f32[1,128], index: 2, kind: input, shape index: {}]   ;;  %s514_s3 = inlined_call_operand.vmem [shape: f32[1,128], index: 3, kind: input, shape index: {}]   ;;  %s515_s4 = inlined_call_operand.vmem [shape: bf16[32,128], index: 4, kind: output, shape index: {}]  }
   0x1   :  { %v392_v0 = vld [vmem:[%s511_s1 + $0x40] sm:$0xff]   ;;  %v394_v2 = vld [vmem:[%s511_s1 + $0x48] sm:$0xff]   ;;  %v396_v4 = vld [vmem:[%s511_s1 + $0x50] sm:$0xff]  }
   0x2   :  { %v393_v1 = vld [vmem:[%s511_s1] sm:$0xff]   ;;  %348 = vmatprep.subr.bf16.mxu0 %v392_v0  ;;  %376 = vmatprep.subr.bf16.mxu1 %v392_v0  ;;  %v395_v3 = vld [vmem:[%s511_s1 + $0x8] sm:$0xff]   ;;  %v397_v5 = vld [vmem:[%s511_s1 + $0x10] sm:$0xff]  }
   0x3   :  { %349 = vmatpush3.bf16.msra.mxu0 %v393_v1  ;;  %384 = vmatpush3.bf16.msra.mxu1 %v393_v1  ;;  %v398_v6 = vld [vmem:[%s511_s1 + $0x58] sm:$0xff]   ;;  %v400_v8 = vld [vmem:[%s511_s1 + $0x60] sm:$0xff]   ;;  %v402_v10 = vld [vmem:[%s511_s1 + $0x68] sm:$0xff]  }
   0x4   :  { %350 = vmatprep.subr.bf16.mxu0 %v394_v2  ;;  %377 = vmatprep.subr.bf16.mxu1 %v394_v2  ;;  %v399_v7 = vld [vmem:[%s511_s1 + $0x18] sm:$0xff]   ;;  %v401_v9 = vld [vmem:[%s511_s1 + $0x20] sm:$0xff]   ;;  %v19_v12 = vld [vmem:[%s512_s0 + $0x8] sm:$0xff] }
   0x5   :  { %v18_v11 = vld [vmem:[%s512_s0] sm:$0xff]  ;;  %v20_v13 = vld [vmem:[%s512_s0 + $0x10] sm:$0xff]  ;;  %v25_v16 = vunpack.c.h.bf16 %v19_v12  ;;  %v21_v17 = vld [vmem:[%s512_s0 + $0x18] sm:$0xff]  ;;  %v24_v19 = vunpack.c.l.bf16 %v19_v12 }
   0x6   :  { %v22_v14 = vunpack.c.l.bf16 %v18_v11  ;;  %v23_v15 = vunpack.c.h.bf16 %v18_v11  ;;  %v403_v18 = vld [vmem:[%s511_s1 + $0x28] sm:$0xff]   ;;  %v26_v20 = vunpack.c.l.bf16 %v20_v13  ;;  %v27_v21 = vunpack.c.h.bf16 %v20_v13  ;;  %v404_v25 = vld [vmem:[%s511_s1 + $0x70] sm:$0xff]   ;;  %v406_v35 = vld [vmem:[%s511_s1 + $0x78] sm:$0xff]  }
   0x7   :  { %351 = vmatpush3.bf16.msra.mxu0 %v395_v3  ;;  %385 = vmatpush3.bf16.msra.mxu1 %v395_v3  ;;  %v29_v22 = vunpack.c.h.bf16 %v21_v17  ;;  %vm33_vm1 = vcmp.ge.f32.partialorder %v25_v16, 0.0  ;;  %v41_v24 = vmul.f32 0.2, %v25_v16  ;;  %v28_v26 = vunpack.c.l.bf16 %v21_v17  ;;  %v405_v29 = vld [vmem:[%s511_s1 + $0x30] sm:$0xff]   ;;  %v407_v42 = vld [vmem:[%s511_s1 + $0x38] sm:$0xff]  }
   0x8   :  { %352 = vmatprep.subr.bf16.mxu0 %v396_v4  ;;  %378 = vmatprep.subr.bf16.mxu1 %v396_v4  ;;  %vm31_vm0 = vcmp.ge.f32.partialorder %v23_v15, 0.0  ;;  %v39_v23 = vmul.f32 0.2, %v23_v15  ;;  %vm30_vm2 = vcmp.ge.f32.partialorder %v22_v14, 0.0  ;;  %vm35_vm3 = vcmp.ge.f32.partialorder %v27_v21, 0.0 }
   0x9   :  { %v49_v28 = vsel %vm33_vm1, %v25_v16, %v41_v24  ;;  %v38_v31 = vmul.f32 0.2, %v22_v14  ;;  %vm37_vm4 = vcmp.ge.f32.partialorder %v29_v22, 0.0  ;;  %v43_v32 = vmul.f32 0.2, %v27_v21 }
   0xa   :  { %v47_v27 = vsel %vm31_vm0, %v23_v15, %v39_v23  ;;  %vm32_vm5 = vcmp.ge.f32.partialorder %v24_v19, 0.0  ;;  %v40_v33 = vmul.f32 0.2, %v24_v19  ;;  %v45_v34 = vmul.f32 0.2, %v29_v22 }
   0xb   :  { %353 = vmatpush3.bf16.msra.mxu0 %v397_v5  ;;  %386 = vmatpush3.bf16.msra.mxu1 %v397_v5  ;;  %v55_v30 = vpack.c.bf16 %v49_v28, %v47_v27  ;;  %vm34_vm6 = vcmp.ge.f32.partialorder %v26_v20, 0.0  ;;  %v51_v36 = vsel %vm35_vm3, %v27_v21, %v43_v32  ;;  %vm36_vm7 = vcmp.ge.f32.partialorder %v28_v26, 0.0 }
   0xc   :  { %354 = vmatprep.subr.bf16.mxu0 %v398_v6  ;;  %379 = vmatprep.subr.bf16.mxu1 %v398_v6  ;;  %v42_v37 = vmul.f32 0.2, %v26_v20  ;;  %v44_v38 = vmul.f32 0.2, %v28_v26  ;;  %v53_v39 = vsel %vm37_vm4, %v29_v22, %v45_v34  ;;  %v46_v40 = vsel %vm30_vm2, %v22_v14, %v38_v31  ;;  %v276_v31 = vld [vmem:[%s514_s3] sm:$0x1] }
   0xd   :  { %218 = vmatprep.mubr.bf16.mxu0 %v55_v30  ;;  %v57_v41 = vpack.c.bf16 %v53_v39, %v51_v36  ;;  %v48_v43 = vsel %vm32_vm5, %v24_v19, %v40_v33  ;;  %v267_v24 = vlaneseq }
   0xe   :  { %v50_v44 = vsel %vm34_vm6, %v26_v20, %v42_v37  ;;  %v52_v45 = vsel %vm36_vm7, %v28_v26, %v44_v38  ;;  %v54_v46 = vpack.c.bf16 %v48_v43, %v46_v40  ;;  %v262_v26 = vld [vmem:[%s513_s2] sm:$0x1] }
   0xf   :  { %355 = vmatpush3.bf16.msra.mxu0 %v399_v7  ;;  %387 = vmatpush3.bf16.msra.mxu1 %v399_v7  ;;  %v56_v47 = vpack.c.bf16 %v52_v45, %v50_v44 }
  0x10   :  { %356 = vmatprep.subr.bf16.mxu0 %v400_v8  ;;  %380 = vmatprep.subr.bf16.mxu1 %v400_v8 }
  0x11   :  { %226 = vmatprep.mubr.bf16.mxu1 %v57_v41 }
  0x13   :  { %357 = vmatpush3.bf16.msra.mxu0 %v401_v9  ;;  %388 = vmatpush3.bf16.msra.mxu1 %v401_v9 }
  0x14   :  { %358 = vmatprep.subr.bf16.mxu0 %v402_v10  ;;  %381 = vmatprep.subr.bf16.mxu1 %v402_v10 }
  0x17   :  { %359 = vmatpush3.bf16.msra.mxu0 %v403_v18  ;;  %389 = vmatpush3.bf16.msra.mxu1 %v403_v18 }
  0x18   :  { %360 = vmatprep.subr.bf16.mxu0 %v404_v25  ;;  %382 = vmatprep.subr.bf16.mxu1 %v404_v25  ;;  %v268_v25 = vshrl.u32 %v267_v24, 7 }
  0x1a   :  { %v269_v27 = vsub.s32 0, %v268_v25 }
  0x1b   :  { %361 = vmatpush3.bf16.msra.mxu0 %v405_v29  ;;  %390 = vmatpush3.bf16.msra.mxu1 %v405_v29 }
  0x1c   :  { %362 = vmatprep.subr.bf16.mxu0 %v406_v35  ;;  %383 = vmatprep.subr.bf16.mxu1 %v406_v35 }
  0x1f   :  { %363 = vmatpush3.bf16.msra.mxu0 %v407_v42  ;;  %391 = vmatpush3.bf16.msra.mxu1 %v407_v42 }
  0x22   :  { %219 = vmatmul.mubr.bf16.vlgmr.msra.gmra.mrb[0].mxu0 %v54_v46  ;;  %227 = vmatmul.mubr.bf16.vlgmr.msra.gmra.mrb[0].mxu1 %v56_v47 }
  0xf5   :  { %v364_v48 = vpop.f32.mrb[0].mxu0  ;;  %v370_v49 = vpop.f32.mrb[0].mxu1 }
  0xf6   :  { %v365_v50 = vpop.f32.mrb[1].mxu0  ;;  %v371_v51 = vpop.f32.mrb[1].mxu1 }
  0xf7   :  { %v366_v52 = vadd.f32 %v365_v50, %v364_v48  ;;  %v367_v53 = vpop.f32.mrb[2].mxu0  ;;  %v372_v54 = vadd.f32 %v371_v51, %v370_v49  ;;  %v373_v55 = vpop.f32.mrb[2].mxu1 }
  0xf8   :  { %v368_v56 = vpop.f32.mrb[3].mxu0  ;;  %v374_v57 = vpop.f32.mrb[3].mxu1 }
  0xf9   :  { %v369_v58 = vadd.f32 %v368_v56, %v367_v53  ;;  %v375_v59 = vadd.f32 %v374_v57, %v373_v55  ;;  %v244_v60 = vmul.f32 %v366_v52, %v366_v52  ;;  %v246_v61 = vmul.f32 %v372_v54, %v372_v54 }
  0xfb   :  { %v235_v62 = vadd.f32 %v369_v58, %v366_v52  ;;  %v245_v63 = vmul.f32 %v369_v58, %v369_v58  ;;  %v247_v3 = vmul.f32 %v375_v59, %v375_v59 }
  0xfd   :  { %v248_v0 = vadd.f32 %v245_v63, %v244_v60  ;;  %v236_v1 = vadd.f32 %v372_v54, %v235_v62 }
  0xff   :  { %v237_v2 = vadd.f32 %v375_v59, %v236_v1  ;;  %v249_v4 = vadd.f32 %v248_v0, %v246_v61 }
 0x101   :  { %v238_v5 = vrot.slane %v237_v2, 4  ;;  %v250_v6 = vadd.f32 %v249_v4, %v247_v3 }
 0x103   :  { %v239_v7 = vadd.f32 %v238_v5, %v237_v2  ;;  %v251_v8 = vrot.slane %v250_v6, 4 }
 0x105   :  { %v240_v9 = vrot.slane %v239_v7, 2  ;;  %v252_v10 = vadd.f32 %v251_v8, %v250_v6 }
 0x107   :  { %v241_v11 = vadd.f32 %v240_v9, %v239_v7  ;;  %v253_v12 = vrot.slane %v252_v10, 2 }
 0x109   :  { %v242_v13 = vrot.slane %v241_v11, 1  ;;  %v254_v14 = vadd.f32 %v253_v12, %v252_v10 }
 0x10b   :  { %v243_v15 = vadd.f32 %v242_v13, %v241_v11  ;;  %v255_v16 = vrot.slane %v254_v14, 1 }
 0x10d   :  { %v256_v17 = vadd.f32 %v255_v16, %v254_v14  ;;  %v257_v18 = vmul.f32 0.03125, %v243_v15 }
 0x10f   :  { %v258_v19 = vmul.f32 0.03125, %v256_v17  ;;  %v259_v20 = vmul.f32 %v257_v18, %v257_v18 }
 0x111   :  { %v260_v21 = vsub.f32 %v258_v19, %v259_v20 }
 0x113   :  { %v261_v22 = vmax.f32 %v260_v21, 0.0 }
 0x115   :  { %v263_v23 = vadd.f32 1e-05, %v261_v22 }
 0x117   :  { %408 = vrsqrt.f32 %v263_v23 }
 0x121   :  { %v409_v28 = vpop.eup %408 }
 0x122   :  { %v265_v29 = vmul.f32 %v409_v28, %v262_v26 }
 0x124   :  { %v270_v30 = vrot.slane %v265_v29, %v269_v27  ;;  %v277_v32 = vmul.f32 %v265_v29, %v257_v18 }
 0x126   :  { %v272_v33 = vmul.f32 %v366_v52, %v270_v30  ;;  %v273_v34 = vmul.f32 %v369_v58, %v270_v30  ;;  %v274_v35 = vmul.f32 %v372_v54, %v270_v30  ;;  %v275_v36 = vmul.f32 %v375_v59, %v270_v30 }
 0x127   :  { %v278_v37 = vsub.f32 %v276_v31, %v277_v32 }
 0x129   :  { %v283_v38 = vrot.slane %v278_v37, %v269_v27 }
 0x12b   :  { %v285_v39 = vadd.f32 %v283_v38, %v272_v33  ;;  %v286_v40 = vadd.f32 %v283_v38, %v273_v34  ;;  %v287_v41 = vadd.f32 %v283_v38, %v274_v35  ;;  %v288_v42 = vadd.f32 %v283_v38, %v275_v36 }
 0x12d   :  { %v340_v43 = vpack.c.bf16 %v286_v40, %v285_v39  ;;  %v345_v44 = vpack.c.bf16 %v288_v42, %v287_v41 }
 0x12f   :  { %341 = vst [vmem:[%s515_s4] sm:$0xff] %v340_v43   ;;  %347 = vst [vmem:[%s515_s4 + $0x8] sm:$0xff] %v345_v44  }

// kernel: unet_forward.13
= control target key start
LH: loop header
LB: loop body
LE: loop exit
PB: predicated region body
PF: predicated region fallthrough
CT: control target
= control target key end

     0   :  { %s715_s1 = inlined_call_operand.vmem [shape: bf16[512,128], index: 1, kind: input, shape index: {}]   ;;  %s716_s0 = inlined_call_operand.vmem [shape: bf16[16,512], index: 0, kind: input, shape index: {}]   ;;  %s717_s2 = inlined_call_operand.vmem [shape: f32[1,128], index: 2, kind: input, shape index: {}]   ;;  %s718_s3 = inlined_call_operand.vmem [shape: f32[1,128], index: 3, kind: input, shape index: {}]   ;;  %s719_s4 = inlined_call_operand.vmem [shape: bf16[16,128], index: 4, kind: output, shape index: {}]  }
   0x1   :  { %v539_v0 = vld [vmem:[%s715_s1 + $0x40] sm:$0xff]   ;;  %v543_v4 = vld [vmem:[%s715_s1 + $0x48] sm:$0xff]   ;;  %v547_v8 = vld [vmem:[%s715_s1 + $0x50] sm:$0xff]  }
   0x2   :  { %v540_v1 = vld [vmem:[%s715_s1 + $0xc0] sm:$0xff]   ;;  %495 = vmatprep.subr.bf16.mxu0 %v539_v0  ;;  %v544_v5 = vld [vmem:[%s715_s1 + $0xc8] sm:$0xff]   ;;  %v548_v9 = vld [vmem:[%s715_s1 + $0xd0] sm:$0xff]  }
   0x3   :  { %v541_v2 = vld [vmem:[%s715_s1] sm:$0xff]   ;;  %517 = vmatprep.subr.bf16.mxu1 %v540_v1  ;;  %v545_v6 = vld [vmem:[%s715_s1 + $0x8] sm:$0xff]   ;;  %v549_v10 = vld [vmem:[%s715_s1 + $0x10] sm:$0xff]  }
   0x4   :  { %v542_v3 = vld [vmem:[%s715_s1 + $0x80] sm:$0xff]   ;;  %496 = vmatpush3.bf16.msra.mxu0 %v541_v2  ;;  %v546_v7 = vld [vmem:[%s715_s1 + $0x88] sm:$0xff]   ;;  %v550_v11 = vld [vmem:[%s715_s1 + $0x90] sm:$0xff]  }
   0x5   :  { %518 = vmatpush3.bf16.msra.mxu1 %v542_v3  ;;  %497 = vmatprep.subr.bf16.mxu0 %v543_v4  ;;  %v551_v12 = vld [vmem:[%s715_s1 + $0x58] sm:$0xff]   ;;  %v555_v16 = vld [vmem:[%s715_s1 + $0x60] sm:$0xff]   ;;  %v559_v20 = vld [vmem:[%s715_s1 + $0x68] sm:$0xff]  }
   0x6   :  { %519 = vmatprep.subr.bf16.mxu1 %v544_v5  ;;  %v552_v13 = vld [vmem:[%s715_s1 + $0xd8] sm:$0xff]   ;;  %v556_v17 = vld [vmem:[%s715_s1 + $0xe0] sm:$0xff]   ;;  %v560_v21 = vld [vmem:[%s715_s1 + $0xe8] sm:$0xff]  }
   0x7   :  { %v553_v14 = vld [vmem:[%s715_s1 + $0x18] sm:$0xff]   ;;  %v557_v18 = vld [vmem:[%s715_s1 + $0x20] sm:$0xff]   ;;  %v561_v22 = vld [vmem:[%s715_s1 + $0x28] sm:$0xff]  }
   0x8   :  { %498 = vmatpush3.bf16.msra.mxu0 %v545_v6  ;;  %v554_v15 = vld [vmem:[%s715_s1 + $0x98] sm:$0xff]   ;;  %v558_v19 = vld [vmem:[%s715_s1 + $0xa0] sm:$0xff]   ;;  %v562_v23 = vld [vmem:[%s715_s1 + $0xa8] sm:$0xff]  }
   0x9   :  { %520 = vmatpush3.bf16.msra.mxu1 %v546_v7  ;;  %499 = vmatprep.subr.bf16.mxu0 %v547_v8  ;;  %v563_v24 = vld [vmem:[%s715_s1 + $0x70] sm:$0xff]   ;;  %v567_v28 = vld [vmem:[%s715_s1 + $0x78] sm:$0xff]   ;;  %v18_v32 = vld [vmem:[%s716_s0] sm:$0xff] }
   0xa   :  { %521 = vmatprep.subr.bf16.mxu1 %v548_v9  ;;  %v564_v25 = vld [vmem:[%s715_s1 + $0xf0] sm:$0xff]   ;;  %v568_v29 = vld [vmem:[%s715_s1 + $0xf8] sm:$0xff]   ;;  %v19_v34 = vld [vmem:[%s716_s0 + $0x8] sm:$0xff]  ;;  %v22_v35 = vunpack.c.l.bf16 %v18_v32  ;;  %v23_v36 = vunpack.c.h.bf16 %v18_v32 }
   0xb   :  { %v565_v26 = vld [vmem:[%s715_s1 + $0x30] sm:$0xff]   ;;  %v569_v30 = vld [vmem:[%s715_s1 + $0x38] sm:$0xff]   ;;  %v24_v40 = vunpack.c.l.bf16 %v19_v34  ;;  %v25_v41 = vunpack.c.h.bf16 %v19_v34 }
   0xc   :  { %500 = vmatpush3.bf16.msra.mxu0 %v549_v10  ;;  %v566_v27 = vld [vmem:[%s715_s1 + $0xb0] sm:$0xff]   ;;  %v570_v31 = vld [vmem:[%s715_s1 + $0xb8] sm:$0xff]   ;;  %vm31_vm0 = vcmp.ge.f32.partialorder %v23_v36, 0.0  ;;  %v39_v44 = vmul.f32 0.2, %v23_v36  ;;  %vm30_vm4 = vcmp.ge.f32.partialorder %v22_v35, 0.0 }
   0xd   :  { %522 = vmatpush3.bf16.msra.mxu1 %v550_v11  ;;  %501 = vmatprep.subr.bf16.mxu0 %v551_v12  ;;  %v20_v33 = vld [vmem:[%s716_s0 + $0x10] sm:$0xff]  ;;  %v21_v39 = vld [vmem:[%s716_s0 + $0x18] sm:$0xff]  ;;  %vm33_vm2 = vcmp.ge.f32.partialorder %v25_v41, 0.0  ;;  %v41_v46 = vmul.f32 0.2, %v25_v41  ;;  %vm32_vm6 = vcmp.ge.f32.partialorder %v24_v40, 0.0 }
   0xe   :  { %523 = vmatprep.subr.bf16.mxu1 %v552_v13  ;;  %v26_v37 = vunpack.c.l.bf16 %v20_v33  ;;  %v27_v38 = vunpack.c.h.bf16 %v20_v33  ;;  %v28_v42 = vunpack.c.l.bf16 %v21_v39  ;;  %v29_v43 = vunpack.c.h.bf16 %v21_v39 }
   0xf   :  { %v47_v48 = vsel %vm31_vm0, %v23_v36, %v39_v44  ;;  %v49_v51 = vsel %vm33_vm2, %v25_v41, %v41_v46  ;;  %v38_v53 = vmul.f32 0.2, %v22_v35  ;;  %v40_v57 = vmul.f32 0.2, %v24_v40 }
  0x10   :  { %502 = vmatpush3.bf16.msra.mxu0 %v553_v14  ;;  %vm35_vm1 = vcmp.ge.f32.partialorder %v27_v38, 0.0  ;;  %v43_v45 = vmul.f32 0.2, %v27_v38  ;;  %vm37_vm3 = vcmp.ge.f32.partialorder %v29_v43, 0.0  ;;  %v45_v47 = vmul.f32 0.2, %v29_v43 }
  0x11   :  { %524 = vmatpush3.bf16.msra.mxu1 %v554_v15  ;;  %503 = vmatprep.subr.bf16.mxu0 %v555_v16  ;;  %vm34_vm5 = vcmp.ge.f32.partialorder %v26_v37, 0.0  ;;  %v42_v55 = vmul.f32 0.2, %v26_v37  ;;  %vm36_vm7 = vcmp.ge.f32.partialorder %v28_v42, 0.0  ;;  %v46_v56 = vsel %vm30_vm4, %v22_v35, %v38_v53 }
  0x12   :  { %525 = vmatprep.subr.bf16.mxu1 %v556_v17  ;;  %v51_v49 = vsel %vm35_vm1, %v27_v38, %v43_v45  ;;  %v53_v52 = vsel %vm37_vm3, %v29_v43, %v45_v47  ;;  %v44_v58 = vmul.f32 0.2, %v28_v42  ;;  %v48_v61 = vsel %vm32_vm6, %v24_v40, %v40_v57  ;;  %v417_v38 = vld [vmem:[%s717_s2] sm:$0x1] }
  0x13   :  { %v55_v50 = vpack.c.bf16 %v51_v49, %v47_v48  ;;  %v57_v54 = vpack.c.bf16 %v53_v52, %v49_v51  ;;  %v50_v59 = vsel %vm34_vm5, %v26_v37, %v42_v55  ;;  %v422_v36 = vlaneseq }
  0x14   :  { %504 = vmatpush3.bf16.msra.mxu0 %v557_v18  ;;  %v54_v60 = vpack.c.bf16 %v50_v59, %v46_v56  ;;  %v52_v62 = vsel %vm36_vm7, %v28_v42, %v44_v58  ;;  %v429_v42 = vld [vmem:[%s718_s3] sm:$0x1] }
  0x15   :  { %526 = vmatpush3.bf16.msra.mxu1 %v558_v19  ;;  %505 = vmatprep.subr.bf16.mxu0 %v559_v20  ;;  %v56_v63 = vpack.c.bf16 %v52_v62, %v48_v61  ;;  %v423_v37 = vshrl.u32 %v422_v36, 7 }
  0x16   :  { %527 = vmatprep.subr.bf16.mxu1 %v560_v21  ;;  %346 = vmatprep.mubr.bf16.mxu0 %v55_v50 }
  0x17   :  { %387 = vmatprep.mubr.bf16.mxu1 %v57_v54  ;;  %v424_v39 = vsub.s32 0, %v423_v37 }
  0x18   :  { %506 = vmatpush3.bf16.msra.mxu0 %v561_v22 }
  0x19   :  { %528 = vmatpush3.bf16.msra.mxu1 %v562_v23  ;;  %507 = vmatprep.subr.bf16.mxu0 %v563_v24 }
  0x1a   :  { %529 = vmatprep.subr.bf16.mxu1 %v564_v25 }
  0x1c   :  { %508 = vmatpush3.bf16.msra.mxu0 %v565_v26 }
  0x1d   :  { %530 = vmatpush3.bf16.msra.mxu1 %v566_v27  ;;  %509 = vmatprep.subr.bf16.mxu0 %v567_v28 }
  0x1e   :  { %531 = vmatprep.subr.bf16.mxu1 %v568_v29 }
  0x20   :  { %510 = vmatpush3.bf16.msra.mxu0 %v569_v30 }
  0x21   :  { %532 = vmatpush3.bf16.msra.mxu1 %v570_v31 }
  0x23   :  { %347 = vmatmul.mubr.bf16.vlgmr.msra.gmra.mrb[0].mxu0 %v54_v60 }
  0x24   :  { %388 = vmatmul.mubr.bf16.vlgmr.msra.gmra.mrb[0].mxu1 %v56_v63 }
  0xf6   :  { %v511_v0 = vpop.f32.mrb[0].mxu0 }
  0xf7   :  { %v533_v1 = vpop.f32.mrb[0].mxu1  ;;  %v512_v2 = vpop.f32.mrb[1].mxu0 }
  0xf8   :  { %v513_v3 = vadd.f32 %v512_v2, %v511_v0  ;;  %v534_v4 = vpop.f32.mrb[1].mxu1  ;;  %v514_v5 = vpop.f32.mrb[2].mxu0 }
  0xf9   :  { %v535_v6 = vadd.f32 %v534_v4, %v533_v1  ;;  %v536_v7 = vpop.f32.mrb[2].mxu1  ;;  %v515_v8 = vpop.f32.mrb[3].mxu0 }
  0xfa   :  { %v516_v9 = vadd.f32 %v515_v8, %v514_v5  ;;  %v537_v10 = vpop.f32.mrb[3].mxu1 }
  0xfb   :  { %v390_v11 = vadd.f32 %v535_v6, %v513_v3  ;;  %v538_v12 = vadd.f32 %v537_v10, %v536_v7 }
  0xfd   :  { %v393_v13 = vadd.f32 %v538_v12, %v516_v9  ;;  %v403_v14 = vmul.f32 %v390_v11, %v390_v11 }
  0xff   :  { %v396_v15 = vadd.f32 %v393_v13, %v390_v11  ;;  %v404_v16 = vmul.f32 %v393_v13, %v393_v13 }
 0x101   :  { %v397_v17 = vrot.slane %v396_v15, 4  ;;  %v405_v18 = vadd.f32 %v404_v16, %v403_v14 }
 0x103   :  { %v398_v19 = vadd.f32 %v397_v17, %v396_v15  ;;  %v406_v20 = vrot.slane %v405_v18, 4 }
 0x105   :  { %v399_v21 = vrot.slane %v398_v19, 2  ;;  %v407_v22 = vadd.f32 %v406_v20, %v405_v18 }
 0x107   :  { %v400_v23 = vadd.f32 %v399_v21, %v398_v19  ;;  %v408_v24 = vrot.slane %v407_v22, 2 }
 0x109   :  { %v401_v25 = vrot.slane %v400_v23, 1  ;;  %v409_v26 = vadd.f32 %v408_v24, %v407_v22 }
 0x10b   :  { %v402_v27 = vadd.f32 %v401_v25, %v400_v23  ;;  %v410_v28 = vrot.slane %v409_v26, 1 }
 0x10d   :  { %v411_v29 = vadd.f32 %v410_v28, %v409_v26  ;;  %v412_v30 = vmul.f32 0.125, %v402_v27 }
 0x10f   :  { %v413_v31 = vmul.f32 0.125, %v411_v29  ;;  %v414_v32 = vmul.f32 %v412_v30, %v412_v30 }
 0x111   :  { %v415_v33 = vsub.f32 %v413_v31, %v414_v32 }
 0x113   :  { %v416_v34 = vmax.f32 %v415_v33, 0.0 }
 0x115   :  { %v418_v35 = vadd.f32 1e-05, %v416_v34 }
 0x117   :  { %571 = vrsqrt.f32 %v418_v35 }
 0x121   :  { %v572_v40 = vpop.eup %571 }
 0x122   :  { %v420_v41 = vmul.f32 %v572_v40, %v417_v38 }
 0x124   :  { %v425_v43 = vrot.slane %v420_v41, %v424_v39  ;;  %v430_v44 = vmul.f32 %v420_v41, %v412_v30 }
 0x126   :  { %v427_v45 = vmul.f32 %v425_v43, %v390_v11  ;;  %v428_v46 = vmul.f32 %v425_v43, %v393_v13  ;;  %v431_v47 = vsub.f32 %v429_v42, %v430_v44 }
 0x128   :  { %v436_v48 = vrot.slane %v431_v47, %v424_v39 }
 0x12a   :  { %v438_v49 = vadd.f32 %v436_v48, %v427_v45  ;;  %v439_v50 = vadd.f32 %v436_v48, %v428_v46 }
 0x12c   :  { %v493_v51 = vpack.c.bf16 %v439_v50, %v438_v49 }
 0x12e   :  { %494 = vst [vmem:[%s719_s4] sm:$0xff] %v493_v51  }

// kernel: unet_forward.14
= control target key start
LH: loop header
LB: loop body
LE: loop exit
PB: predicated region body
PF: predicated region fallthrough
CT: control target
= control target key end

     0   :  { %s1242_s1 = inlined_call_operand.vmem [shape: bf16[1024,128], index: 1, kind: input, shape index: {}]   ;;  %s1243_s0 = inlined_call_operand.vmem [shape: bf16[16,1024], index: 0, kind: input, shape index: {}]   ;;  %s1244_s2 = inlined_call_operand.vmem [shape: bf16[16,128], index: 2, kind: output, shape index: {}]  }
   0x1   :  { %v943_v0 = vld [vmem:[%s1242_s1 + $0x40] sm:$0xff]   ;;  %v947_v4 = vld [vmem:[%s1242_s1 + $0x48] sm:$0xff]   ;;  %v951_v8 = vld [vmem:[%s1242_s1 + $0x50] sm:$0xff]  }
   0x2   :  { %v944_v1 = vld [vmem:[%s1242_s1 + $0xc0] sm:$0xff]   ;;  %855 = vmatprep.subr.bf16.mxu0 %v943_v0  ;;  %v948_v5 = vld [vmem:[%s1242_s1 + $0xc8] sm:$0xff]   ;;  %v952_v9 = vld [vmem:[%s1242_s1 + $0xd0] sm:$0xff]  }
   0x3   :  { %v945_v2 = vld [vmem:[%s1242_s1] sm:$0xff]   ;;  %877 = vmatprep.subr.bf16.mxu1 %v944_v1  ;;  %v949_v6 = vld [vmem:[%s1242_s1 + $0x8] sm:$0xff]   ;;  %v953_v10 = vld [vmem:[%s1242_s1 + $0x10] sm:$0xff]  }
   0x4   :  { %v946_v3 = vld [vmem:[%s1242_s1 + $0x80] sm:$0xff]   ;;  %856 = vmatpush3.bf16.msra.mxu0 %v945_v2  ;;  %v950_v7 = vld [vmem:[%s1242_s1 + $0x88] sm:$0xff]   ;;  %v954_v11 = vld [vmem:[%s1242_s1 + $0x90] sm:$0xff]  }
   0x5   :  { %878 = vmatpush3.bf16.msra.mxu1 %v946_v3  ;;  %857 = vmatprep.subr.bf16.mxu0 %v947_v4  ;;  %v955_v12 = vld [vmem:[%s1242_s1 + $0x58] sm:$0xff]   ;;  %v959_v16 = vld [vmem:[%s1242_s1 + $0x60] sm:$0xff]   ;;  %v963_v20 = vld [vmem:[%s1242_s1 + $0x68] sm:$0xff]  }
   0x6   :  { %879 = vmatprep.subr.bf16.mxu1 %v948_v5  ;;  %v956_v13 = vld [vmem:[%s1242_s1 + $0xd8] sm:$0xff]   ;;  %v960_v17 = vld [vmem:[%s1242_s1 + $0xe0] sm:$0xff]   ;;  %v964_v21 = vld [vmem:[%s1242_s1 + $0xe8] sm:$0xff]  }
   0x7   :  { %v957_v14 = vld [vmem:[%s1242_s1 + $0x18] sm:$0xff]   ;;  %v961_v18 = vld [vmem:[%s1242_s1 + $0x20] sm:$0xff]   ;;  %v965_v22 = vld [vmem:[%s1242_s1 + $0x28] sm:$0xff]  }
   0x8   :  { %858 = vmatpush3.bf16.msra.mxu0 %v949_v6  ;;  %v958_v15 = vld [vmem:[%s1242_s1 + $0x98] sm:$0xff]   ;;  %v962_v19 = vld [vmem:[%s1242_s1 + $0xa0] sm:$0xff]   ;;  %v966_v23 = vld [vmem:[%s1242_s1 + $0xa8] sm:$0xff]  }
   0x9   :  { %880 = vmatpush3.bf16.msra.mxu1 %v950_v7  ;;  %859 = vmatprep.subr.bf16.mxu0 %v951_v8  ;;  %v967_v24 = vld [vmem:[%s1242_s1 + $0x70] sm:$0xff]   ;;  %v971_v28 = vld [vmem:[%s1242_s1 + $0x78] sm:$0xff]   ;;  %v12_v32 = vld [vmem:[%s1243_s0] sm:$0xff] }
   0xa   :  { %881 = vmatprep.subr.bf16.mxu1 %v952_v9  ;;  %v968_v25 = vld [vmem:[%s1242_s1 + $0xf0] sm:$0xff]   ;;  %v972_v29 = vld [vmem:[%s1242_s1 + $0xf8] sm:$0xff]   ;;  %v16_v33 = vld [vmem:[%s1243_s0 + $0x20] sm:$0xff]  ;;  %v20_v35 = vunpack.c.l.bf16 %v12_v32  ;;  %v21_v36 = vunpack.c.h.bf16 %v12_v32 }
   0xb   :  { %v969_v26 = vld [vmem:[%s1242_s1 + $0x30] sm:$0xff]   ;;  %v973_v30 = vld [vmem:[%s1242_s1 + $0x38] sm:$0xff]   ;;  %v13_v34 = vld [vmem:[%s1243_s0 + $0x8] sm:$0xff]  ;;  %v28_v37 = vunpack.c.l.bf16 %v16_v33  ;;  %v29_v38 = vunpack.c.h.bf16 %v16_v33 }
   0xc   :  { %860 = vmatpush3.bf16.msra.mxu0 %v953_v10  ;;  %v970_v27 = vld [vmem:[%s1242_s1 + $0xb0] sm:$0xff]   ;;  %v974_v31 = vld [vmem:[%s1242_s1 + $0xb8] sm:$0xff]   ;;  %v17_v39 = vld [vmem:[%s1243_s0 + $0x28] sm:$0xff]  ;;  %v22_v40 = vunpack.c.l.bf16 %v13_v34  ;;  %v23_v41 = vunpack.c.h.bf16 %v13_v34  ;;  %vm37_vm0 = vcmp.ge.f32.partialorder %v21_v36, 0.0  ;;  %v53_v45 = vmul.f32 0.2, %v21_v36 }
   0xd   :  { %882 = vmatpush3.bf16.msra.mxu1 %v954_v11  ;;  %861 = vmatprep.subr.bf16.mxu0 %v955_v12  ;;  %v30_v42 = vunpack.c.l.bf16 %v17_v39  ;;  %v31_v43 = vunpack.c.h.bf16 %v17_v39  ;;  %v975_v44 = vld [vmem:[%s1242_s1 + $0x140] sm:$0xff]   ;;  %vm45_vm1 = vcmp.ge.f32.partialorder %v29_v38, 0.0  ;;  %v61_v46 = vmul.f32 0.2, %v29_v38  ;;  %v979_v3 = vld [vmem:[%s1242_s1 + $0x148] sm:$0xff]   ;;  %v983_v8 = vld [vmem:[%s1242_s1 + $0x150] sm:$0xff]  }
   0xe   :  { %883 = vmatprep.subr.bf16.mxu1 %v956_v13  ;;  %vm39_vm2 = vcmp.ge.f32.partialorder %v23_v41, 0.0  ;;  %v55_v47 = vmul.f32 0.2, %v23_v41  ;;  %v69_v49 = vsel %vm37_vm0, %v21_v36, %v53_v45  ;;  %vm36_vm4 = vcmp.ge.f32.partialorder %v20_v35, 0.0  ;;  %v976_v51 = vld [vmem:[%s1242_s1 + $0x1c0] sm:$0xff]   ;;  %v980_v5 = vld [vmem:[%s1242_s1 + $0x1c8] sm:$0xff]  }
   0xf   :  { %vm47_vm3 = vcmp.ge.f32.partialorder %v31_v43, 0.0  ;;  %v63_v48 = vmul.f32 0.2, %v31_v43  ;;  %v77_v50 = vsel %vm45_vm1, %v29_v38, %v61_v46  ;;  %vm44_vm5 = vcmp.ge.f32.partialorder %v28_v37, 0.0  ;;  %v977_v61 = vld [vmem:[%s1242_s1 + $0x100] sm:$0xff]   ;;  %v981_v6 = vld [vmem:[%s1242_s1 + $0x108] sm:$0xff]  }
  0x10   :  { %862 = vmatpush3.bf16.msra.mxu0 %v957_v14  ;;  %v85_v52 = vpack.c.bf16 %v77_v50, %v69_v49  ;;  %v71_v53 = vsel %vm39_vm2, %v23_v41, %v55_v47  ;;  %v52_v55 = vmul.f32 0.2, %v20_v35  ;;  %v60_v57 = vmul.f32 0.2, %v28_v37  ;;  %v978_v62 = vld [vmem:[%s1242_s1 + $0x180] sm:$0xff]   ;;  %v982_v7 = vld [vmem:[%s1242_s1 + $0x188] sm:$0xff]  }
  0x11   :  { %884 = vmatpush3.bf16.msra.mxu1 %v958_v15  ;;  %863 = vmatprep.subr.bf16.mxu0 %v959_v16  ;;  %v79_v54 = vsel %vm47_vm3, %v31_v43, %v63_v48  ;;  %vm38_vm6 = vcmp.ge.f32.partialorder %v22_v40, 0.0  ;;  %vm46_vm7 = vcmp.ge.f32.partialorder %v30_v42, 0.0  ;;  %v54_v59 = vmul.f32 0.2, %v22_v40  ;;  %v984_v9 = vld [vmem:[%s1242_s1 + $0x1d0] sm:$0xff]   ;;  %v987_v12 = vld [vmem:[%s1242_s1 + $0x158] sm:$0xff]  }
  0x12   :  { %885 = vmatprep.subr.bf16.mxu1 %v960_v17  ;;  %v87_v56 = vpack.c.bf16 %v79_v54, %v71_v53  ;;  %636 = vmatprep.mubr.bf16.mxu0 %v85_v52  ;;  %v68_v58 = vsel %vm36_vm4, %v20_v35, %v52_v55  ;;  %v62_v60 = vmul.f32 0.2, %v30_v42  ;;  %v76_v63 = vsel %vm44_vm5, %v28_v37, %v60_v57  ;;  %v985_v10 = vld [vmem:[%s1242_s1 + $0x110] sm:$0xff]   ;;  %v988_v13 = vld [vmem:[%s1242_s1 + $0x1d8] sm:$0xff]   ;;  %v991_v16 = vld [vmem:[%s1242_s1 + $0x160] sm:$0xff]  }
  0x13   :  { %v84_v0 = vpack.c.bf16 %v76_v63, %v68_v58  ;;  %v70_v1 = vsel %vm38_vm6, %v22_v40, %v54_v59  ;;  %v986_v11 = vld [vmem:[%s1242_s1 + $0x190] sm:$0xff]   ;;  %v989_v14 = vld [vmem:[%s1242_s1 + $0x118] sm:$0xff]   ;;  %v992_v17 = vld [vmem:[%s1242_s1 + $0x1e0] sm:$0xff]  }
  0x14   :  { %864 = vmatpush3.bf16.msra.mxu0 %v961_v18  ;;  %677 = vmatprep.mubr.bf16.mxu1 %v87_v56  ;;  %v78_v2 = vsel %vm46_vm7, %v30_v42, %v62_v60  ;;  %v990_v15 = vld [vmem:[%s1242_s1 + $0x198] sm:$0xff]   ;;  %v993_v18 = vld [vmem:[%s1242_s1 + $0x120] sm:$0xff]   ;;  %v18_v32 = vld [vmem:[%s1243_s0 + $0x30] sm:$0xff] }
  0x15   :  { %886 = vmatpush3.bf16.msra.mxu1 %v962_v19  ;;  %865 = vmatprep.subr.bf16.mxu0 %v963_v20  ;;  %v86_v4 = vpack.c.bf16 %v78_v2, %v70_v1  ;;  %v994_v19 = vld [vmem:[%s1242_s1 + $0x1a0] sm:$0xff]   ;;  %v995_v20 = vld [vmem:[%s1242_s1 + $0x168] sm:$0xff]   ;;  %v15_v35 = vld [vmem:[%s1243_s0 + $0x18] sm:$0xff]  ;;  %v32_v38 = vunpack.c.l.bf16 %v18_v32  ;;  %v33_v39 = vunpack.c.h.bf16 %v18_v32 }
  0x16   :  { %887 = vmatprep.subr.bf16.mxu1 %v964_v21  ;;  %v996_v21 = vld [vmem:[%s1242_s1 + $0x1e8] sm:$0xff]   ;;  %v19_v36 = vld [vmem:[%s1243_s0 + $0x38] sm:$0xff]  ;;  %v26_v40 = vunpack.c.l.bf16 %v15_v35  ;;  %v27_v41 = vunpack.c.h.bf16 %v15_v35 }
  0x17   :  { %v1006_v37 = vld [vmem:[%s1242_s1 + $0x1b8] sm:$0xff]   ;;  %v34_v43 = vunpack.c.l.bf16 %v19_v36  ;;  %vm49_vm9 = vcmp.ge.f32.partialorder %v33_v39, 0.0  ;;  %v65_v45 = vmul.f32 0.2, %v33_v39  ;;  %vm48_vm13 = vcmp.ge.f32.partialorder %v32_v38, 0.0 }
  0x18   :  { %866 = vmatpush3.bf16.msra.mxu0 %v965_v22  ;;  %v997_v22 = vld [vmem:[%s1242_s1 + $0x128] sm:$0xff]   ;;  %vm43_vm10 = vcmp.ge.f32.partialorder %v27_v41, 0.0  ;;  %v59_v46 = vmul.f32 0.2, %v27_v41  ;;  %v64_v54 = vmul.f32 0.2, %v32_v38 }
  0x19   :  { %888 = vmatpush3.bf16.msra.mxu1 %v966_v23  ;;  %867 = vmatprep.subr.bf16.mxu0 %v967_v24  ;;  %v998_v23 = vld [vmem:[%s1242_s1 + $0x1a8] sm:$0xff]   ;;  %v999_v24 = vld [vmem:[%s1242_s1 + $0x170] sm:$0xff]   ;;  %v81_v49 = vsel %vm49_vm9, %v33_v39, %v65_v45  ;;  %vm42_vm14 = vcmp.ge.f32.partialorder %v26_v40, 0.0  ;;  %vm50_vm15 = vcmp.ge.f32.partialorder %v34_v43, 0.0  ;;  %v58_v57 = vmul.f32 0.2, %v26_v40 }
  0x1a   :  { %889 = vmatprep.subr.bf16.mxu1 %v968_v25  ;;  %v1000_v25 = vld [vmem:[%s1242_s1 + $0x1f0] sm:$0xff]   ;;  %v75_v50 = vsel %vm43_vm10, %v27_v41, %v59_v46  ;;  %v80_v58 = vsel %vm48_vm13, %v32_v38, %v64_v54  ;;  %v66_v59 = vmul.f32 0.2, %v34_v43 }
  0x1c   :  { %868 = vmatpush3.bf16.msra.mxu0 %v969_v26  ;;  %v1001_v26 = vld [vmem:[%s1242_s1 + $0x130] sm:$0xff]  }
  0x1d   :  { %890 = vmatpush3.bf16.msra.mxu1 %v970_v27  ;;  %869 = vmatprep.subr.bf16.mxu0 %v971_v28  ;;  %v1002_v27 = vld [vmem:[%s1242_s1 + $0x1b0] sm:$0xff]   ;;  %v1003_v28 = vld [vmem:[%s1242_s1 + $0x178] sm:$0xff]  }
  0x1e   :  { %891 = vmatprep.subr.bf16.mxu1 %v972_v29  ;;  %v1004_v29 = vld [vmem:[%s1242_s1 + $0x1f8] sm:$0xff]  }
  0x20   :  { %870 = vmatpush3.bf16.msra.mxu0 %v973_v30  ;;  %v1005_v30 = vld [vmem:[%s1242_s1 + $0x138] sm:$0xff]  }
  0x21   :  { %892 = vmatpush3.bf16.msra.mxu1 %v974_v31  ;;  %899 = vmatprep.subr.bf16.mxu0 %v975_v44  ;;  %v14_v31 = vld [vmem:[%s1243_s0 + $0x10] sm:$0xff]  ;;  %v35_v44 = vunpack.c.h.bf16 %v19_v36 }
  0x22   :  { %921 = vmatprep.subr.bf16.mxu1 %v976_v51  ;;  %v24_v33 = vunpack.c.l.bf16 %v14_v31  ;;  %v25_v34 = vunpack.c.h.bf16 %v14_v31 }
  0x23   :  { %637 = vmatmul.mubr.bf16.vlgmr.msra.gmra.mrb[0].mxu0 %v84_v0  ;;  %vm51_vm11 = vcmp.ge.f32.partialorder %v35_v44, 0.0  ;;  %v67_v48 = vmul.f32 0.2, %v35_v44 }
  0x24   :  { %678 = vmatmul.mubr.bf16.vlgmr.msra.gmra.mrb[0].mxu1 %v86_v4  ;;  %900 = vmatpush3.bf16.msra.mxu0 %v977_v61  ;;  %vm41_vm8 = vcmp.ge.f32.partialorder %v25_v34, 0.0  ;;  %v57_v42 = vmul.f32 0.2, %v25_v34  ;;  %vm40_vm12 = vcmp.ge.f32.partialorder %v24_v33, 0.0  ;;  %v56_v51 = vmul.f32 0.2, %v24_v33 }
  0x25   :  { %922 = vmatpush3.bf16.msra.mxu1 %v978_v62  ;;  %901 = vmatprep.subr.bf16.mxu0 %v979_v3  ;;  %v83_v53 = vsel %vm51_vm11, %v35_v44, %v67_v48  ;;  %v74_v61 = vsel %vm42_vm14, %v26_v40, %v58_v57  ;;  %v82_v62 = vsel %vm50_vm15, %v34_v43, %v66_v59 }
  0x26   :  { %923 = vmatprep.subr.bf16.mxu1 %v980_v5  ;;  %v73_v47 = vsel %vm41_vm8, %v25_v34, %v57_v42  ;;  %v91_v55 = vpack.c.bf16 %v83_v53, %v75_v50  ;;  %v72_v56 = vsel %vm40_vm12, %v24_v33, %v56_v51  ;;  %v90_v63 = vpack.c.bf16 %v82_v62, %v74_v61 }
  0x27   :  { %v89_v52 = vpack.c.bf16 %v81_v49, %v73_v47  ;;  %v88_v60 = vpack.c.bf16 %v80_v58, %v72_v56 }
  0x28   :  { %902 = vmatpush3.bf16.msra.mxu0 %v981_v6  ;;  %759 = vmatprep.mubr.bf16.mxu1 %v91_v55 }
  0x29   :  { %924 = vmatpush3.bf16.msra.mxu1 %v982_v7  ;;  %903 = vmatprep.subr.bf16.mxu0 %v983_v8 }
  0x2a   :  { %925 = vmatprep.subr.bf16.mxu1 %v984_v9  ;;  %718 = vmatprep.mubr.bf16.mxu0 %v89_v52 }
  0x2c   :  { %904 = vmatpush3.bf16.msra.mxu0 %v985_v10 }
  0x2d   :  { %926 = vmatpush3.bf16.msra.mxu1 %v986_v11  ;;  %905 = vmatprep.subr.bf16.mxu0 %v987_v12 }
  0x2e   :  { %927 = vmatprep.subr.bf16.mxu1 %v988_v13 }
  0x30   :  { %906 = vmatpush3.bf16.msra.mxu0 %v989_v14 }
  0x31   :  { %928 = vmatpush3.bf16.msra.mxu1 %v990_v15  ;;  %907 = vmatprep.subr.bf16.mxu0 %v991_v16 }
  0x32   :  { %929 = vmatprep.subr.bf16.mxu1 %v992_v17 }
  0x34   :  { %908 = vmatpush3.bf16.msra.mxu0 %v993_v18 }
  0x35   :  { %930 = vmatpush3.bf16.msra.mxu1 %v994_v19  ;;  %909 = vmatprep.subr.bf16.mxu0 %v995_v20 }
  0x36   :  { %931 = vmatprep.subr.bf16.mxu1 %v996_v21 }
  0x38   :  { %910 = vmatpush3.bf16.msra.mxu0 %v997_v22 }
  0x39   :  { %932 = vmatpush3.bf16.msra.mxu1 %v998_v23  ;;  %911 = vmatprep.subr.bf16.mxu0 %v999_v24 }
  0x3a   :  { %933 = vmatprep.subr.bf16.mxu1 %v1000_v25 }
  0x3c   :  { %912 = vmatpush3.bf16.msra.mxu0 %v1001_v26 }
  0x3d   :  { %934 = vmatpush3.bf16.msra.mxu1 %v1002_v27  ;;  %913 = vmatprep.subr.bf16.mxu0 %v1003_v28 }
  0x3e   :  { %935 = vmatprep.subr.bf16.mxu1 %v1004_v29 }
  0x40   :  { %914 = vmatpush3.bf16.msra.mxu0 %v1005_v30 }
  0x41   :  { %936 = vmatpush3.bf16.msra.mxu1 %v1006_v37 }
  0x43   :  { %719 = vmatmul.mubr.bf16.vlgmr.msra.gmra.mrb[4].mxu0 %v88_v60 }
  0x44   :  { %760 = vmatmul.mubr.bf16.vlgmr.msra.gmra.mrb[4].mxu1 %v90_v63 }
  0xf6   :  { %v871_v0 = vpop.f32.mrb[0].mxu0 }
  0xf7   :  { %v893_v1 = vpop.f32.mrb[0].mxu1  ;;  %v872_v2 = vpop.f32.mrb[1].mxu0 }
  0xf8   :  { %v873_v3 = vadd.f32 %v872_v2, %v871_v0  ;;  %v894_v4 = vpop.f32.mrb[1].mxu1  ;;  %v874_v5 = vpop.f32.mrb[2].mxu0 }
  0xf9   :  { %v895_v6 = vadd.f32 %v894_v4, %v893_v1  ;;  %v896_v7 = vpop.f32.mrb[2].mxu1  ;;  %v875_v8 = vpop.f32.mrb[3].mxu0 }
  0xfa   :  { %v876_v9 = vadd.f32 %v875_v8, %v874_v5  ;;  %v897_v10 = vpop.f32.mrb[3].mxu1 }
  0xfb   :  { %v680_v11 = vadd.f32 %v895_v6, %v873_v3  ;;  %v898_v12 = vadd.f32 %v897_v10, %v896_v7 }
  0xfd   :  { %v683_v13 = vadd.f32 %v898_v12, %v876_v9 }
 0x116   :  { %v915_v14 = vpop.f32.mrb[4].mxu0 }
 0x117   :  { %v916_v15 = vpop.f32.mrb[5].mxu0  ;;  %v937_v16 = vpop.f32.mrb[4].mxu1 }
 0x118   :  { %v917_v17 = vadd.f32 %v916_v15, %v915_v14  ;;  %v918_v18 = vpop.f32.mrb[6].mxu0  ;;  %v938_v19 = vpop.f32.mrb[5].mxu1 }
 0x119   :  { %v919_v20 = vpop.f32.mrb[7].mxu0  ;;  %v939_v22 = vadd.f32 %v938_v19, %v937_v16  ;;  %v940_v23 = vpop.f32.mrb[6].mxu1 }
 0x11a   :  { %v721_v21 = vadd.f32 %v917_v17, %v680_v11  ;;  %v920_v24 = vadd.f32 %v919_v20, %v918_v18  ;;  %v941_v25 = vpop.f32.mrb[7].mxu1 }
 0x11b   :  { %v942_v28 = vadd.f32 %v941_v25, %v940_v23 }
 0x11c   :  { %v762_v26 = vadd.f32 %v939_v22, %v721_v21  ;;  %v724_v27 = vadd.f32 %v920_v24, %v683_v13 }
 0x11e   :  { %v765_v29 = vadd.f32 %v942_v28, %v724_v27 }
 0x120   :  { %v853_v30 = vpack.c.bf16 %v765_v29, %v762_v26 }
 0x122   :  { %854 = vst [vmem:[%s1244_s2] sm:$0xff] %v853_v30  }

// kernel: tile.48
= control target key start
LH: loop header
LB: loop body
LE: loop exit
PB: predicated region body
PF: predicated region fallthrough
CT: control target
= control target key end

     0   :  { %s22_s0 = inlined_call_operand.vmem [shape: f32[64], index: 0, kind: input, shape index: {}]   ;;  %s23_s1 = inlined_call_operand.vmem [shape: f32[4,64], index: 1, kind: output, shape index: {}]  }
   0x1   :  { %v4_v0 = vld [vmem:[%s22_s0] ss:$0 sm:$0xff] }
   0x2   :  { %5 = vst [vmem:[%s23_s1] sm:$0xf] %v4_v0 }

// kernel: unet_forward.15
= control target key start
LH: loop header
LB: loop body
LE: loop exit
PB: predicated region body
PF: predicated region fallthrough
CT: control target
= control target key end

     0   :  { %v1286_v1 = vmov 0   ;;  %vm484_vm0 = vcmask 523264   ;;  %s1922_s1 = inlined_call_operand.vmem [shape: bf16[576,256], index: 1, kind: input, shape index: {}]   ;;  %s1923_s0 = inlined_call_operand.vmem [shape: bf16[16,576], index: 0, kind: input, shape index: {}]   ;;  %s1924_s4 = inlined_call_operand.vmem [shape: f32[256,256], index: 4, kind: input, shape index: {}]   ;;  %s1925_s2 = inlined_call_operand.vmem [shape: f32[1,256], index: 2, kind: input, shape index: {}]   ;;  %s1926_s3 = inlined_call_operand.vmem [shape: f32[1,256], index: 3, kind: input, shape index: {}]   ;;  %s1927_s5 = inlined_call_operand.vmem [shape: bf16[16,256], index: 5, kind: output, shape index: {}]  }
   0x1   :  { %v1174_v0 = vld [vmem:[%s1922_s1 + $0x4] ss:$8 sps:$4 sm:$0xff]   ;;  %606 = vmatprep.mubr.bf16.mxu1 %v1286_v1  ;;  %v1176_v2 = vld [vmem:[%s1922_s1] ss:$8 sps:$4 sm:$0xff]   ;;  %v1177_v3 = vld [vmem:[%s1922_s1 + $0x14] ss:$8 sps:$4 sm:$0xff]  }
   0x2   :  { %488 = vmatprep.subr.bf16.mxu0 %v1174_v0  ;;  %v1179_v4 = vld [vmem:[%s1922_s1 + $0x10] ss:$8 sps:$4 sm:$0xff]   ;;  %v1180_v5 = vld [vmem:[%s1922_s1 + $0x24] ss:$8 sps:$4 sm:$0xff]   ;;  %v1182_v6 = vld [vmem:[%s1922_s1 + $0x20] ss:$8 sps:$4 sm:$0xff]  }
   0x3   :  { %489 = vmatpush1.bf16.msra.mxu0 %v1176_v2  ;;  %v1183_v7 = vld [vmem:[%s1922_s1 + $0x34] ss:$8 sps:$4 sm:$0xff]   ;;  %v1185_v8 = vld [vmem:[%s1922_s1 + $0x30] ss:$8 sps:$4 sm:$0xff]   ;;  %v1186_v9 = vld [vmem:[%s1922_s1 + $0x44] ss:$8 sps:$4 sm:$0xff]  }
   0x4   :  { %490 = vmatprep.subr.bf16.mxu0 %v1177_v3  ;;  %v1188_v10 = vld [vmem:[%s1922_s1 + $0x40] ss:$8 sps:$4 sm:$0xff]   ;;  %v1189_v11 = vld [vmem:[%s1922_s1 + $0x54] ss:$8 sps:$4 sm:$0xff]   ;;  %v1191_v12 = vld [vmem:[%s1922_s1 + $0x50] ss:$8 sps:$4 sm:$0xff]  }
   0x5   :  { %v1192_v13 = vld [vmem:[%s1922_s1 + $0x64] ss:$8 sps:$4 sm:$0xff]   ;;  %v1365_v15 = vld [vmem:[%s1923_s0 + $0x14] sm:$0xff]  ;;  %v1194_v18 = vld [vmem:[%s1922_s1 + $0x60] ss:$8 sps:$4 sm:$0xff]  }
   0x6   :  { %v1360_v14 = vld [vmem:[%s1923_s0] sm:$0xff]  ;;  %v33_v17 = vunpack.c.h.bf16 %v1365_v15  ;;  %v1195_v19 = vld [vmem:[%s1922_s1 + $0x74] ss:$8 sps:$4 sm:$0xff]   ;;  %v1197_v23 = vld [vmem:[%s1922_s1 + $0x70] ss:$8 sps:$4 sm:$0xff]   ;;  %v32_v60 = vunpack.c.l.bf16 %v1365_v15 }
   0x7   :  { %491 = vmatpush1.bf16.msra.mxu0 %v1179_v4  ;;  %v28_v16 = vunpack.c.h.bf16 %v1360_v14  ;;  %v1198_v24 = vld [vmem:[%s1922_s1 + $0x84] ss:$8 sps:$4 sm:$0xff]   ;;  %v1200_v25 = vld [vmem:[%s1922_s1 + $0x80] ss:$8 sps:$4 sm:$0xff]   ;;  %v1201_v26 = vld [vmem:[%s1922_s1 + $0x94] ss:$8 sps:$4 sm:$0xff]   ;;  %v27_v59 = vunpack.c.l.bf16 %v1360_v14 }
   0x8   :  { %492 = vmatprep.subr.bf16.mxu0 %v1180_v5  ;;  %v43_v21 = vmax.f32 %v33_v17, 0.0  ;;  %v1203_v27 = vld [vmem:[%s1922_s1 + $0x90] ss:$8 sps:$4 sm:$0xff]   ;;  %v1204_v28 = vld [vmem:[%s1922_s1 + $0xa4] ss:$8 sps:$4 sm:$0xff]   ;;  %v1466_v56 = vld [vmem:[%s1923_s0 + $0x1c] sm:$0xff] }
   0x9   :  { %v38_v20 = vmax.f32 %v28_v16, 0.0  ;;  %v1206_v29 = vld [vmem:[%s1922_s1 + $0xa0] ss:$8 sps:$4 sm:$0xff]   ;;  %v1258_v30 = vld [vmem:[%s1922_s1 + $0x204] ss:$8 sps:$4 sm:$0xff]   ;;  %v652_v49 = vld [vmem:[%s1924_s4 + $0x18] sm:$0xff]  ;;  %v35_v1 = vunpack.c.h.bf16 %v1466_v56 }
   0xa   :  { %v1260_v31 = vld [vmem:[%s1922_s1 + $0x200] ss:$8 sps:$4 sm:$0xff]   ;;  %v1207_v32 = vld [vmem:[%s1922_s1 + $0xb4] ss:$8 sps:$4 sm:$0xff]   ;;  %574 = vmatprep.subr.bf16.mxu1 %v1258_v30  ;;  %v1266_v34 = vld [vmem:[%s1922_s1 + $0x210] ss:$8 sps:$4 sm:$0xff]  }
   0xb   :  { %493 = vmatpush1.bf16.msra.mxu0 %v1182_v6  ;;  %v48_v22 = vpack.c.bf16 %v43_v21, %v38_v20  ;;  %575 = vmatpush1.bf16.msra.mxu1 %v1260_v31  ;;  %v1264_v33 = vld [vmem:[%s1922_s1 + $0x214] ss:$8 sps:$4 sm:$0xff]   ;;  %v1209_v35 = vld [vmem:[%s1922_s1 + $0xb0] ss:$8 sps:$4 sm:$0xff]   ;;  %v1210_v36 = vld [vmem:[%s1922_s1 + $0xc4] ss:$8 sps:$4 sm:$0xff]  }
   0xc   :  { %494 = vmatprep.subr.bf16.mxu0 %v1183_v7  ;;  %576 = vmatprep.subr.bf16.mxu1 %v1264_v33  ;;  %v1270_v37 = vld [vmem:[%s1922_s1 + $0x224] ss:$8 sps:$4 sm:$0xff]   ;;  %v1272_v38 = vld [vmem:[%s1922_s1 + $0x220] ss:$8 sps:$4 sm:$0xff]   ;;  %v1276_v40 = vld [vmem:[%s1922_s1 + $0x234] ss:$8 sps:$4 sm:$0xff]  }
   0xd   :  { %520 = vmatprep.mubr.bf16.mxu0 %v48_v22  ;;  %v1212_v39 = vld [vmem:[%s1922_s1 + $0xc0] ss:$8 sps:$4 sm:$0xff]   ;;  %v1213_v41 = vld [vmem:[%s1922_s1 + $0xd4] ss:$8 sps:$4 sm:$0xff]   ;;  %v1215_v42 = vld [vmem:[%s1922_s1 + $0xd0] ss:$8 sps:$4 sm:$0xff]  }
   0xe   :  { %v23_v43 = vld [vmem:[%s1923_s0 + $0x10] ss:$20 sps:$4 sm:$0xff]   ;;  %v650_v48 = vld [vmem:[%s1924_s4 + $0x8] sm:$0xff]  ;;  %v656_v58 = vld [vmem:[%s1924_s4 + $0x38] sm:$0xff] }
   0xf   :  { %495 = vmatpush1.bf16.msra.mxu0 %v1185_v8  ;;  %577 = vmatpush1.bf16.msra.mxu1 %v1266_v34  ;;  %v1216_v44 = vld [vmem:[%s1922_s1 + $0xe4] ss:$8 sps:$4 sm:$0xff]   ;;  %v1278_v45 = vld [vmem:[%s1922_s1 + $0x230] ss:$8 sps:$4 sm:$0xff]   ;;  %v31_v46 = vunpack.c.l.bf16 %v23_v43  ;;  %v36_v47 = vunpack.c.h.bf16 %v23_v43  ;;  %v1455_v51 = vpack.c.bf16 %v652_v49, %v650_v48  ;;  %v1218_v63 = vld [vmem:[%s1922_s1 + $0xe0] ss:$8 sps:$4 sm:$0xff]  }
  0x10   :  { %496 = vmatprep.subr.bf16.mxu0 %v1186_v9  ;;  %578 = vmatprep.subr.bf16.mxu1 %v1270_v37  ;;  %v1453_v50 = vld [vmem:[%s1923_s0 + $0x8] sm:$0xff]  ;;  %v649_v52 = vld [vmem:[%s1924_s4] sm:$0xff]  ;;  %v651_v53 = vld [vmem:[%s1924_s4 + $0x10] sm:$0xff]  ;;  %v37_v8 = vmax.f32 %v27_v59, 0.0  ;;  %v42_v9 = vmax.f32 %v32_v60, 0.0 }
  0x11   :  { %v41_v54 = vmax.f32 %v31_v46, 0.0  ;;  %v46_v55 = vmax.f32 %v36_v47, 0.0  ;;  %v654_v57 = vld [vmem:[%s1924_s4 + $0x28] sm:$0xff]  ;;  %v1476_v62 = vpack.c.bf16 %v651_v53, %v649_v52  ;;  %v30_v0 = vunpack.c.h.bf16 %v1453_v50  ;;  %v653_v3 = vld [vmem:[%s1924_s4 + $0x20] sm:$0xff]  ;;  %v655_v4 = vld [vmem:[%s1924_s4 + $0x30] sm:$0xff] }
  0x12   :  { %v1484_v2 = vpack.c.bf16 %v656_v58, %v654_v57  ;;  %v1219_v5 = vld [vmem:[%s1922_s1 + $0xf4] ss:$8 sps:$4 sm:$0xff]   ;;  %v658_v6 = vld [vmem:[%s1924_s4 + $0x48] sm:$0xff]  ;;  %v657_v15 = vld [vmem:[%s1924_s4 + $0x40] sm:$0xff]  ;;  %v47_v20 = vpack.c.bf16 %v42_v9, %v37_v8 }
  0x13   :  { %497 = vmatpush1.bf16.msra.mxu0 %v1188_v10  ;;  %579 = vmatpush1.bf16.msra.mxu1 %v1272_v38  ;;  %v51_v61 = vpack.c.bf16 %v46_v55, %v41_v54  ;;  %v660_v7 = vld [vmem:[%s1924_s4 + $0x58] sm:$0xff]  ;;  %v1503_v10 = vpack.c.bf16 %v655_v4, %v653_v3  ;;  %v659_v16 = vld [vmem:[%s1924_s4 + $0x50] sm:$0xff]  ;;  %v1224_v17 = vld [vmem:[%s1922_s1 + $0x104] ss:$8 sps:$4 sm:$0xff]  }
  0x14   :  { %498 = vmatprep.subr.bf16.mxu0 %v1189_v11  ;;  %580 = vmatprep.subr.bf16.mxu1 %v1276_v40  ;;  %v1221_v11 = vld [vmem:[%s1922_s1 + $0xf0] ss:$8 sps:$4 sm:$0xff]   ;;  %v1509_v14 = vpack.c.bf16 %v660_v7, %v658_v6  ;;  %v1527_v21 = vpack.c.bf16 %v659_v16, %v657_v15  ;;  %v1222_v22 = vld [vmem:[%s1922_s1 + $0x100] ss:$8 sps:$4 sm:$0xff]   ;;  %v1233_v43 = vld [vmem:[%s1922_s1 + $0x134] ss:$8 sps:$4 sm:$0xff]  }
  0x15   :  { %v1225_v31 = vld [vmem:[%s1922_s1 + $0x110] ss:$8 sps:$4 sm:$0xff]   ;;  %v665_v33 = vld [vmem:[%s1924_s4 + $0x80] sm:$0xff]  ;;  %v678_v54 = vld [vmem:[%s1924_s4 + $0xe8] sm:$0xff] }
  0x16   :  { %v667_v34 = vld [vmem:[%s1924_s4 + $0x90] sm:$0xff]  ;;  %v672_v37 = vld [vmem:[%s1924_s4 + $0xb8] sm:$0xff]  ;;  %v673_v49 = vld [vmem:[%s1924_s4 + $0xc0] sm:$0xff] }
  0x17   :  { %499 = vmatpush1.bf16.msra.mxu0 %v1191_v12  ;;  %581 = vmatpush1.bf16.msra.mxu1 %v1278_v45  ;;  %v40_v12 = vmax.f32 %v30_v0, 0.0  ;;  %v1575_v38 = vpack.c.bf16 %v667_v34, %v665_v33  ;;  %v676_v45 = vld [vmem:[%s1924_s4 + $0xd8] sm:$0xff]  ;;  %v675_v52 = vld [vmem:[%s1924_s4 + $0xd0] sm:$0xff]  ;;  %v1236_v53 = vld [vmem:[%s1922_s1 + $0x144] ss:$8 sps:$4 sm:$0xff]  }
  0x18   :  { %500 = vmatprep.subr.bf16.mxu0 %v1192_v13  ;;  %1037 = vmatprep.subr.bf16.mxu1 %v1455_v51  ;;  %v45_v13 = vmax.f32 %v35_v1, 0.0  ;;  %v1231_v47 = vld [vmem:[%s1922_s1 + $0x130] ss:$8 sps:$4 sm:$0xff]   ;;  %v1623_v57 = vpack.c.bf16 %v675_v52, %v673_v49  ;;  %v1234_v58 = vld [vmem:[%s1922_s1 + $0x140] ss:$8 sps:$4 sm:$0xff]  }
  0x19   :  { %v680_v55 = vld [vmem:[%s1924_s4 + $0xf8] sm:$0xff]  ;;  %v677_v60 = vld [vmem:[%s1924_s4 + $0xe0] sm:$0xff]  ;;  %v682_v0 = vld [vmem:[%s1924_s4 + $0x108] sm:$0xff] }
  0x1a   :  { %1031 = vmatmul.mubr.msk.bf16.vlgmr.msra.gmra.mrb[0].mxu1 %vm484_vm0, %v51_v61  ;;  %v1629_v59 = vpack.c.bf16 %v680_v55, %v678_v54  ;;  %v679_v61 = vld [vmem:[%s1924_s4 + $0xf0] sm:$0xff]  ;;  %v684_v1 = vld [vmem:[%s1924_s4 + $0x118] sm:$0xff]  ;;  %v681_v6 = vld [vmem:[%s1924_s4 + $0x100] sm:$0xff] }
  0x1b   :  { %501 = vmatpush1.bf16.msra.mxu0 %v1194_v18  ;;  %1039 = vmatpush1.bf16.msra.mxu1 %v1476_v62  ;;  %v662_v18 = vld [vmem:[%s1924_s4 + $0x68] sm:$0xff]  ;;  %v1647_v3 = vpack.c.bf16 %v679_v61, %v677_v60  ;;  %v1237_v4 = vld [vmem:[%s1922_s1 + $0x150] ss:$8 sps:$4 sm:$0xff]   ;;  %v685_v16 = vld [vmem:[%s1924_s4 + $0x120] sm:$0xff] }
  0x1c   :  { %502 = vmatprep.subr.bf16.mxu0 %v1195_v19  ;;  %1041 = vmatprep.subr.bf16.mxu1 %v1484_v2  ;;  %v664_v19 = vld [vmem:[%s1924_s4 + $0x78] sm:$0xff]  ;;  %v683_v7 = vld [vmem:[%s1924_s4 + $0x110] sm:$0xff]  ;;  %v1242_v8 = vld [vmem:[%s1922_s1 + $0x164] ss:$8 sps:$4 sm:$0xff]  }
  0x1d   :  { %v686_v9 = vld [vmem:[%s1924_s4 + $0x128] sm:$0xff]  ;;  %v1257_v34 = vld [vmem:[%s1922_s1 + $0x1b4] ss:$8 sps:$4 sm:$0xff]  }
  0x1e   :  { %v1252_v33 = vld [vmem:[%s1922_s1 + $0x1a0] ss:$8 sps:$4 sm:$0xff]   ;;  %v691_v54 = vld [vmem:[%s1924_s4 + $0x150] sm:$0xff]  ;;  %v696_v60 = vld [vmem:[%s1924_s4 + $0x178] sm:$0xff] }
  0x1f   :  { %503 = vmatpush1.bf16.msra.mxu0 %v1197_v23  ;;  %1043 = vmatpush1.bf16.msra.mxu1 %v1503_v10  ;;  %v50_v23 = vpack.c.bf16 %v45_v13, %v40_v12  ;;  %v1671_v12 = vpack.c.bf16 %v683_v7, %v681_v6  ;;  %v1240_v13 = vld [vmem:[%s1922_s1 + $0x160] ss:$8 sps:$4 sm:$0xff]   ;;  %v700_v6 = vld [vmem:[%s1924_s4 + $0x198] sm:$0xff] }
  0x20   :  { %504 = vmatprep.subr.bf16.mxu0 %v1198_v24  ;;  %1045 = vmatprep.subr.bf16.mxu1 %v1509_v14  ;;  %v661_v24 = vld [vmem:[%s1924_s4 + $0x60] sm:$0xff] }
  0x23   :  { %505 = vmatpush1.bf16.msra.mxu0 %v1200_v25  ;;  %v663_v25 = vld [vmem:[%s1924_s4 + $0x70] sm:$0xff]  ;;  %1047 = vmatpush1.bf16.msra.mxu1 %v1527_v21 }
  0x24   :  { %506 = vmatprep.subr.bf16.mxu0 %v1201_v26  ;;  %v1227_v26 = vld [vmem:[%s1922_s1 + $0x114] ss:$8 sps:$4 sm:$0xff]   ;;  %v1551_v30 = vpack.c.bf16 %v663_v25, %v661_v24  ;;  %v1248_v25 = vld [vmem:[%s1922_s1 + $0x184] ss:$8 sps:$4 sm:$0xff]  }
  0x27   :  { %507 = vmatpush1.bf16.msra.mxu0 %v1203_v27  ;;  %v1542_v27 = vpack.c.bf16 %v664_v19, %v662_v18  ;;  %v1245_v18 = vld [vmem:[%s1922_s1 + $0x174] ss:$8 sps:$4 sm:$0xff]   ;;  %v690_v19 = vld [vmem:[%s1924_s4 + $0x148] sm:$0xff] }
  0x28   :  { %508 = vmatprep.subr.bf16.mxu0 %v1204_v28  ;;  %v666_v28 = vld [vmem:[%s1924_s4 + $0x88] sm:$0xff] }
  0x29   :  { %1049 = vmatprep.subr.bf16.mxu1 %v1542_v27 }
  0x2a   :  { %1051 = vmatpush1.bf16.msra.mxu1 %v1551_v30 }
  0x2b   :  { %509 = vmatpush1.bf16.msra.mxu0 %v1206_v29  ;;  %v668_v29 = vld [vmem:[%s1924_s4 + $0x98] sm:$0xff] }
  0x2c   :  { %510 = vmatprep.subr.bf16.mxu0 %v1207_v32  ;;  %v1556_v32 = vpack.c.bf16 %v668_v29, %v666_v28  ;;  %v1251_v28 = vld [vmem:[%s1922_s1 + $0x194] ss:$8 sps:$4 sm:$0xff]   ;;  %v1249_v29 = vld [vmem:[%s1922_s1 + $0x190] ss:$8 sps:$4 sm:$0xff]  }
  0x2e   :  { %1053 = vmatprep.subr.bf16.mxu1 %v1556_v32 }
  0x2f   :  { %511 = vmatpush1.bf16.msra.mxu0 %v1209_v35  ;;  %v1230_v35 = vld [vmem:[%s1922_s1 + $0x124] ss:$8 sps:$4 sm:$0xff]   ;;  %1055 = vmatpush1.bf16.msra.mxu1 %v1575_v38 }
  0x30   :  { %512 = vmatprep.subr.bf16.mxu0 %v1210_v36  ;;  %v670_v36 = vld [vmem:[%s1924_s4 + $0xa8] sm:$0xff] }
  0x31   :  { %v1581_v40 = vpack.c.bf16 %v672_v37, %v670_v36  ;;  %v1263_v36 = vld [vmem:[%s1922_s1 + $0x1c4] ss:$8 sps:$4 sm:$0xff]   ;;  %v1261_v37 = vld [vmem:[%s1922_s1 + $0x1c0] ss:$8 sps:$4 sm:$0xff]  }
  0x33   :  { %513 = vmatpush1.bf16.msra.mxu0 %v1212_v39  ;;  %v1228_v39 = vld [vmem:[%s1922_s1 + $0x120] ss:$8 sps:$4 sm:$0xff]   ;;  %1057 = vmatprep.subr.bf16.mxu1 %v1581_v40 }
  0x34   :  { %514 = vmatprep.subr.bf16.mxu0 %v1213_v41  ;;  %v669_v41 = vld [vmem:[%s1924_s4 + $0xa0] sm:$0xff] }
  0x37   :  { %515 = vmatpush1.bf16.msra.mxu0 %v1215_v42  ;;  %v671_v42 = vld [vmem:[%s1924_s4 + $0xb0] sm:$0xff] }
  0x38   :  { %516 = vmatprep.subr.bf16.mxu0 %v1216_v44  ;;  %v674_v44 = vld [vmem:[%s1924_s4 + $0xc8] sm:$0xff]  ;;  %v1599_v46 = vpack.c.bf16 %v671_v42, %v669_v41  ;;  %v1267_v41 = vld [vmem:[%s1922_s1 + $0x1d0] ss:$8 sps:$4 sm:$0xff]  }
  0x39   :  { %v1605_v48 = vpack.c.bf16 %v676_v45, %v674_v44  ;;  %v1275_v42 = vld [vmem:[%s1922_s1 + $0x1e4] ss:$8 sps:$4 sm:$0xff]   ;;  %v34_v44 = vunpack.c.l.bf16 %v1466_v56  ;;  %v1273_v45 = vld [vmem:[%s1922_s1 + $0x1e0] ss:$8 sps:$4 sm:$0xff]  }
  0x3a   :  { %1059 = vmatpush1.bf16.msra.mxu1 %v1599_v46  ;;  %v689_v56 = vld [vmem:[%s1924_s4 + $0x140] sm:$0xff] }
  0x3b   :  { %517 = vmatpush1.bf16.msra.mxu0 %v1218_v63  ;;  %1061 = vmatprep.subr.bf16.mxu1 %v1605_v48  ;;  %v1239_v63 = vld [vmem:[%s1922_s1 + $0x154] ss:$8 sps:$4 sm:$0xff]   ;;  %v44_v52 = vmax.f32 %v34_v44, 0.0  ;;  %v1761_v55 = vpack.c.bf16 %v691_v54, %v689_v56 }
  0x3c   :  { %518 = vmatprep.subr.bf16.mxu0 %v1219_v5  ;;  %v1653_v5 = vpack.c.bf16 %v684_v1, %v682_v0  ;;  %v695_v0 = vld [vmem:[%s1924_s4 + $0x170] sm:$0xff] }
  0x3e   :  { %1063 = vmatpush1.bf16.msra.mxu1 %v1623_v57 }
  0x3f   :  { %519 = vmatpush1.bf16.msra.mxu0 %v1221_v11  ;;  %1065 = vmatprep.subr.bf16.mxu1 %v1629_v59  ;;  %v688_v11 = vld [vmem:[%s1924_s4 + $0x138] sm:$0xff] }
  0x40   :  { %531 = vmatprep.subr.bf16.mxu0 %v1224_v17  ;;  %v1677_v15 = vpack.c.bf16 %v688_v11, %v686_v9  ;;  %v687_v17 = vld [vmem:[%s1924_s4 + $0x130] sm:$0xff] }
  0x41   :  { %v699_v9 = vld [vmem:[%s1924_s4 + $0x190] sm:$0xff] }
  0x42   :  { %521 = vmatmul.mubr.bf16.vlgmr.msra.gmra.mrb[0].mxu0 %v47_v20  ;;  %1067 = vmatpush1.bf16.msra.mxu1 %v1647_v3  ;;  %v692_v20 = vld [vmem:[%s1924_s4 + $0x158] sm:$0xff] }
  0x43   :  { %532 = vmatpush1.bf16.msra.mxu0 %v1222_v22  ;;  %563 = vmatprep.mubr.bf16.mxu0 %v50_v23  ;;  %v1695_v22 = vpack.c.bf16 %v687_v17, %v685_v16  ;;  %v1243_v23 = vld [vmem:[%s1922_s1 + $0x170] ss:$8 sps:$4 sm:$0xff]   ;;  %v1701_v24 = vpack.c.bf16 %v692_v20, %v690_v19 }
  0x44   :  { %533 = vmatprep.subr.bf16.mxu0 %v1227_v26  ;;  %1069 = vmatprep.subr.bf16.mxu1 %v1653_v5  ;;  %v1246_v26 = vld [vmem:[%s1922_s1 + $0x180] ss:$8 sps:$4 sm:$0xff]   ;;  %v704_v16 = vld [vmem:[%s1924_s4 + $0x1b8] sm:$0xff]  ;;  %v703_v19 = vld [vmem:[%s1924_s4 + $0x1b0] sm:$0xff] }
  0x46   :  { %1071 = vmatpush1.bf16.msra.mxu1 %v1671_v12 }
  0x47   :  { %534 = vmatpush1.bf16.msra.mxu0 %v1225_v31  ;;  %1073 = vmatprep.subr.bf16.mxu1 %v1677_v15  ;;  %v1254_v31 = vld [vmem:[%s1922_s1 + $0x1a4] ss:$8 sps:$4 sm:$0xff]  }
  0x48   :  { %535 = vmatprep.subr.bf16.mxu0 %v1230_v35  ;;  %v1255_v35 = vld [vmem:[%s1922_s1 + $0x1b0] ss:$8 sps:$4 sm:$0xff]  }
  0x4a   :  { %1075 = vmatpush1.bf16.msra.mxu1 %v1695_v22 }
  0x4b   :  { %536 = vmatpush1.bf16.msra.mxu0 %v1228_v39  ;;  %1077 = vmatprep.subr.bf16.mxu1 %v1701_v24  ;;  %v1269_v39 = vld [vmem:[%s1922_s1 + $0x1d4] ss:$8 sps:$4 sm:$0xff]  }
  0x4c   :  { %537 = vmatprep.subr.bf16.mxu0 %v1233_v43  ;;  %v29_v43 = vunpack.c.l.bf16 %v1453_v50 }
  0x4e   :  { %v39_v49 = vmax.f32 %v29_v43, 0.0  ;;  %1079 = vmatpush1.bf16.msra.mxu1 %v1761_v55 }
  0x4f   :  { %538 = vmatpush1.bf16.msra.mxu0 %v1231_v47  ;;  %v1281_v47 = vld [vmem:[%s1922_s1 + $0x1f4] ss:$8 sps:$4 sm:$0xff]  }
  0x50   :  { %539 = vmatprep.subr.bf16.mxu0 %v1236_v53  ;;  %v1279_v53 = vld [vmem:[%s1922_s1 + $0x1f0] ss:$8 sps:$4 sm:$0xff]   ;;  %v49_v50 = vpack.c.bf16 %v44_v52, %v39_v49 }
  0x53   :  { %540 = vmatpush1.bf16.msra.mxu0 %v1234_v58  ;;  %v694_v58 = vld [vmem:[%s1924_s4 + $0x168] sm:$0xff] }
  0x54   :  { %541 = vmatprep.subr.bf16.mxu0 %v1239_v63  ;;  %v1770_v61 = vpack.c.bf16 %v696_v60, %v694_v58  ;;  %v693_v63 = vld [vmem:[%s1924_s4 + $0x160] sm:$0xff] }
  0x55   :  { %v1778_v1 = vpack.c.bf16 %v695_v0, %v693_v63 }
  0x56   :  { %1081 = vmatprep.subr.bf16.mxu1 %v1770_v61 }
  0x57   :  { %542 = vmatpush1.bf16.msra.mxu0 %v1237_v4  ;;  %1083 = vmatpush1.bf16.msra.mxu1 %v1778_v1  ;;  %v698_v4 = vld [vmem:[%s1924_s4 + $0x188] sm:$0xff] }
  0x58   :  { %543 = vmatprep.subr.bf16.mxu0 %v1242_v8  ;;  %v1788_v7 = vpack.c.bf16 %v700_v6, %v698_v4  ;;  %v697_v8 = vld [vmem:[%s1924_s4 + $0x180] sm:$0xff] }
  0x59   :  { %v1796_v11 = vpack.c.bf16 %v699_v9, %v697_v8 }
  0x5a   :  { %1085 = vmatprep.subr.bf16.mxu1 %v1788_v7 }
  0x5b   :  { %544 = vmatpush1.bf16.msra.mxu0 %v1240_v13  ;;  %1087 = vmatpush1.bf16.msra.mxu1 %v1796_v11  ;;  %v702_v13 = vld [vmem:[%s1924_s4 + $0x1a8] sm:$0xff] }
  0x5c   :  { %545 = vmatprep.subr.bf16.mxu0 %v1245_v18  ;;  %v1806_v17 = vpack.c.bf16 %v704_v16, %v702_v13  ;;  %v701_v18 = vld [vmem:[%s1924_s4 + $0x1a0] sm:$0xff] }
  0x5d   :  { %v1814_v20 = vpack.c.bf16 %v703_v19, %v701_v18 }
  0x5e   :  { %1089 = vmatprep.subr.bf16.mxu1 %v1806_v17 }
  0x5f   :  { %546 = vmatpush1.bf16.msra.mxu0 %v1243_v23  ;;  %1091 = vmatpush1.bf16.msra.mxu1 %v1814_v20  ;;  %v706_v23 = vld [vmem:[%s1924_s4 + $0x1c8] sm:$0xff] }
  0x60   :  { %547 = vmatprep.subr.bf16.mxu0 %v1248_v25  ;;  %v708_v25 = vld [vmem:[%s1924_s4 + $0x1d8] sm:$0xff] }
  0x63   :  { %548 = vmatpush1.bf16.msra.mxu0 %v1246_v26  ;;  %v1824_v26 = vpack.c.bf16 %v708_v25, %v706_v23 }
  0x64   :  { %549 = vmatprep.subr.bf16.mxu0 %v1251_v28  ;;  %v705_v28 = vld [vmem:[%s1924_s4 + $0x1c0] sm:$0xff] }
  0x65   :  { %1093 = vmatprep.subr.bf16.mxu1 %v1824_v26 }
  0x67   :  { %550 = vmatpush1.bf16.msra.mxu0 %v1249_v29  ;;  %v707_v29 = vld [vmem:[%s1924_s4 + $0x1d0] sm:$0xff] }
  0x68   :  { %551 = vmatprep.subr.bf16.mxu0 %v1254_v31  ;;  %v1832_v31 = vpack.c.bf16 %v707_v29, %v705_v28 }
  0x6a   :  { %1095 = vmatpush1.bf16.msra.mxu1 %v1832_v31 }
  0x6b   :  { %552 = vmatpush1.bf16.msra.mxu0 %v1252_v33  ;;  %v710_v33 = vld [vmem:[%s1924_s4 + $0x1e8] sm:$0xff] }
  0x6c   :  { %553 = vmatprep.subr.bf16.mxu0 %v1257_v34  ;;  %v712_v34 = vld [vmem:[%s1924_s4 + $0x1f8] sm:$0xff] }
  0x6f   :  { %554 = vmatpush1.bf16.msra.mxu0 %v1255_v35  ;;  %v709_v35 = vld [vmem:[%s1924_s4 + $0x1e0] sm:$0xff] }
  0x70   :  { %555 = vmatprep.subr.bf16.mxu0 %v1263_v36  ;;  %v1845_v36 = vpack.c.bf16 %v712_v34, %v710_v33 }
  0x72   :  { %1097 = vmatprep.subr.bf16.mxu1 %v1845_v36 }
  0x73   :  { %556 = vmatpush1.bf16.msra.mxu0 %v1261_v37  ;;  %v711_v37 = vld [vmem:[%s1924_s4 + $0x1f0] sm:$0xff] }
  0x74   :  { %557 = vmatprep.subr.bf16.mxu0 %v1269_v39  ;;  %v1850_v39 = vpack.c.bf16 %v711_v37, %v709_v35 }
  0x76   :  { %1099 = vmatpush1.bf16.msra.mxu1 %v1850_v39 }
  0x77   :  { %558 = vmatpush1.bf16.msra.mxu0 %v1267_v41  ;;  %1101 = vmatprep.subr.bf16.mxu1 %v1455_v51 }
  0x78   :  { %559 = vmatprep.subr.bf16.mxu0 %v1275_v42 }
  0x7b   :  { %560 = vmatpush1.bf16.msra.mxu0 %v1273_v45 }
  0x7c   :  { %561 = vmatprep.subr.bf16.mxu0 %v1281_v47 }
  0x7f   :  { %562 = vmatpush1.bf16.msra.mxu0 %v1279_v53 }
  0x82   :  { %564 = vmatmul.mubr.bf16.vlgmr.msra.gmra.mrb[0].mxu0 %v49_v50 }
  0xed   :  { %v608_v41 = vpop.f32.mrb[0].mxu1 }
  0xee   :  { %v610_v42 = vpop.f32.mrb[1].mxu1 }
  0xef   :  { %v612_v43 = vpop.f32.mrb[2].mxu1 }
  0xf0   :  { %v614_v44 = vpop.f32.mrb[3].mxu1 }
 0x155   :  { %v565_v45 = vpop.f32.mrb[0].mxu0 }
 0x156   :  { %v1855_v47 = vadd.f32 %v608_v41, %v565_v45  ;;  %v567_v49 = vpop.f32.mrb[1].mxu0 }
 0x157   :  { %v1857_v52 = vadd.f32 %v610_v42, %v567_v49  ;;  %v569_v53 = vpop.f32.mrb[2].mxu0 }
 0x158   :  { %v1859_v50 = vadd.f32 %v612_v43, %v569_v53  ;;  %v571_v56 = vpop.f32.mrb[3].mxu0  ;;  %v865_v53 = vld [vmem:[%s1925_s2] sm:$0x3] }
 0x159   :  { %v1861_v54 = vadd.f32 %v614_v44, %v571_v56  ;;  %v632_v51 = vmul.f32 %v1857_v52, %v1857_v52 }
 0x15a   :  { %v617_v58 = vadd.f32 %v1859_v50, %v1855_v47 }
 0x15b   :  { %v624_v60 = vadd.f32 %v1861_v54, %v1857_v52  ;;  %v634_v63 = vmul.f32 %v1861_v54, %v1861_v54 }
 0x15c   :  { %v618_v0 = vrot.slane %v617_v58, 4 }
 0x15d   :  { %v625_v4 = vrot.slane %v624_v60, 4  ;;  %v642_v6 = vadd.f32 %v634_v63, %v632_v51 }
 0x15e   :  { %v619_v8 = vadd.f32 %v618_v0, %v617_v58 }
 0x15f   :  { %v626_v9 = vadd.f32 %v625_v4, %v624_v60  ;;  %v643_v13 = vrot.slane %v642_v6, 4 }
 0x160   :  { %v620_v16 = vrot.slane %v619_v8, 2 }
 0x161   :  { %v627_v18 = vrot.slane %v626_v9, 2  ;;  %v644_v19 = vadd.f32 %v643_v13, %v642_v6  ;;  %v904_v13 = vld [vmem:[%s1926_s3] sm:$0x3] }
 0x162   :  { %v621_v23 = vadd.f32 %v620_v16, %v619_v8 }
 0x163   :  { %v628_v25 = vadd.f32 %v627_v18, %v626_v9  ;;  %v645_v28 = vrot.slane %v644_v19, 2 }
 0x164   :  { %v622_v29 = vrot.slane %v621_v23, 1 }
 0x165   :  { %v629_v33 = vrot.slane %v628_v25, 1  ;;  %v646_v34 = vadd.f32 %v645_v28, %v644_v19 }
 0x166   :  { %v623_v41 = vadd.f32 %v622_v29, %v621_v23 }
 0x167   :  { %v630_v35 = vadd.f32 %v629_v33, %v628_v25  ;;  %v647_v37 = vrot.slane %v646_v34, 1 }
 0x169   :  { %777 = vmatprep.mubr.f32.mxu1 %v630_v35  ;;  %v648_v42 = vadd.f32 %v647_v37, %v646_v34 }
 0x16a   :  { %778 = vmatmul.mubr.f32.vlgmr.msra.gmra.mrb[4].mxu1 %v623_v41 }
 0x16b   :  { %1103 = vmatpush1.bf16.msra.mxu1 %v1476_v62  ;;  %848 = vmatprep.mubr.f32.mxu1 %v648_v42  ;;  %v633_v62 = vmul.f32 %v1859_v50, %v1859_v50 }
 0x16c   :  { %1105 = vmatprep.subr.bf16.mxu1 %v1484_v2  ;;  %v631_v2 = vmul.f32 %v1855_v47, %v1855_v47 }
 0x16f   :  { %1107 = vmatpush1.bf16.msra.mxu1 %v1503_v10  ;;  %v635_v10 = vadd.f32 %v633_v62, %v631_v2 }
 0x170   :  { %1109 = vmatprep.subr.bf16.mxu1 %v1509_v14 }
 0x171   :  { %v636_v14 = vrot.slane %v635_v10, 4 }
 0x173   :  { %1111 = vmatpush1.bf16.msra.mxu1 %v1527_v21  ;;  %v637_v21 = vadd.f32 %v636_v14, %v635_v10 }
 0x174   :  { %1113 = vmatprep.subr.bf16.mxu1 %v1542_v27 }
 0x175   :  { %v638_v27 = vrot.slane %v637_v21, 2 }
 0x177   :  { %1115 = vmatpush1.bf16.msra.mxu1 %v1551_v30  ;;  %v639_v30 = vadd.f32 %v638_v27, %v637_v21 }
 0x178   :  { %1117 = vmatprep.subr.bf16.mxu1 %v1556_v32 }
 0x179   :  { %v640_v32 = vrot.slane %v639_v30, 1 }
 0x17b   :  { %1119 = vmatpush1.bf16.msra.mxu1 %v1575_v38  ;;  %v641_v38 = vadd.f32 %v640_v32, %v639_v30 }
 0x17c   :  { %1121 = vmatprep.subr.bf16.mxu1 %v1581_v40 }
 0x17f   :  { %1123 = vmatpush1.bf16.msra.mxu1 %v1599_v46 }
 0x180   :  { %1125 = vmatprep.subr.bf16.mxu1 %v1605_v48 }
 0x183   :  { %1127 = vmatpush1.bf16.msra.mxu1 %v1623_v57 }
 0x184   :  { %1129 = vmatprep.subr.bf16.mxu1 %v1629_v59 }
 0x187   :  { %1131 = vmatpush1.bf16.msra.mxu1 %v1647_v3 }
 0x188   :  { %1133 = vmatprep.subr.bf16.mxu1 %v1653_v5 }
 0x18b   :  { %1135 = vmatpush1.bf16.msra.mxu1 %v1671_v12 }
 0x18c   :  { %1137 = vmatprep.subr.bf16.mxu1 %v1677_v15 }
 0x18f   :  { %1139 = vmatpush1.bf16.msra.mxu1 %v1695_v22 }
 0x190   :  { %1141 = vmatprep.subr.bf16.mxu1 %v1701_v24 }
 0x193   :  { %1143 = vmatpush1.bf16.msra.mxu1 %v1761_v55 }
 0x194   :  { %1145 = vmatprep.subr.bf16.mxu1 %v1770_v61 }
 0x197   :  { %1147 = vmatpush1.bf16.msra.mxu1 %v1778_v1 }
 0x198   :  { %1149 = vmatprep.subr.bf16.mxu1 %v1788_v7 }
 0x19b   :  { %1151 = vmatpush1.bf16.msra.mxu1 %v1796_v11 }
 0x19c   :  { %1153 = vmatprep.subr.bf16.mxu1 %v1806_v17  ;;  %v1287_v17 = vmov 1966171168  }
 0x19f   :  { %1155 = vmatpush1.bf16.msra.mxu1 %v1814_v20  ;;  %v874_v20 = vunpack.c.l.s4 %v1287_v17 }
 0x1a0   :  { %1157 = vmatprep.subr.bf16.mxu1 %v1824_v26  ;;  %v876_v26 = vlaneseq }
 0x1a3   :  { %1159 = vmatpush1.bf16.msra.mxu1 %v1832_v31  ;;  %v875_v31 = vunpack.c.0.s8 %v874_v20 }
 0x1a4   :  { %1161 = vmatprep.subr.bf16.mxu1 %v1845_v36  ;;  %v877_v36 = vshrl.u32 %v876_v26, 7 }
 0x1a6   :  { %v878_v43 = vsub.s32 %v875_v31, %v877_v36  ;;  %v892_v58 = vsub.s32 0, %v877_v36  ;;  %v896_v51 = vsub.s32 1, %v877_v36 }
 0x1a7   :  { %1163 = vmatpush1.bf16.msra.mxu1 %v1850_v39 }
 0x1aa   :  { %849 = vmatmul.mubr.f32.vlgmr.msra.gmra.mrb[6].mxu1 %v641_v38 }
 0x23d   :  { %v779_v40 = vpop.f32.mrb[4].mxu1 }
 0x23e   :  { %v781_v46 = vpop.f32.mrb[5].mxu1  ;;  %v855_v48 = vmul.f32 0.125, %v779_v40 }
 0x23f   :  { %v856_v57 = vmul.f32 0.125, %v781_v46 }
 0x240   :  { %v859_v3 = vmul.f32 %v855_v48, %v855_v48 }
 0x241   :  { %v860_v15 = vmul.f32 %v856_v57, %v856_v57 }
 0x27d   :  { %v850_v59 = vpop.f32.mrb[6].mxu1 }
 0x27e   :  { %v857_v5 = vmul.f32 0.125, %v850_v59  ;;  %v852_v12 = vpop.f32.mrb[7].mxu1 }
 0x27f   :  { %v858_v22 = vmul.f32 0.125, %v852_v12 }
 0x280   :  { %v861_v24 = vsub.f32 %v857_v5, %v859_v3 }
 0x281   :  { %v862_v55 = vsub.f32 %v858_v22, %v860_v15 }
 0x282   :  { %v863_v61 = vmax.f32 %v861_v24, 0.0 }
 0x283   :  { %v864_v1 = vmax.f32 %v862_v55, 0.0 }
 0x284   :  { %v866_v7 = vadd.f32 1e-05, %v863_v61 }
 0x285   :  { %v867_v11 = vadd.f32 1e-05, %v864_v1 }
 0x286   :  { %1282 = vrsqrt.f32 %v866_v7 }
 0x287   :  { %1284 = vrsqrt.f32 %v867_v11 }
 0x290   :  { %v1283_v39 = vpop.eup %1282 }
 0x291   :  { %v1285_v44 = vpop.eup %1284 }
 0x292   :  { %v872_v45 = vcombine.low %v1283_v39, %v1285_v44 }
 0x294   :  { %v879_v49 = vrot.slane %v872_v45, %v878_v43 }
 0x296   :  { %v886_v56 = vrot.slane %v879_v49, %v878_v43 }
 0x298   :  { %v888_v60 = vmul.f32 %v886_v56, %v865_v53 }
 0x29a   :  { %v893_v63 = vrot.slane %v888_v60, %v892_v58  ;;  %v897_v0 = vrot.slane %v888_v60, %v896_v51 }
 0x29c   :  { %v905_v4 = vmul.f32 %v893_v63, %v855_v48  ;;  %v906_v6 = vmul.f32 %v897_v0, %v856_v57  ;;  %v900_v19 = vmul.f32 %v1855_v47, %v893_v63  ;;  %v901_v23 = vmul.f32 %v1857_v52, %v897_v0 }
 0x29d   :  { %v902_v25 = vmul.f32 %v1859_v50, %v893_v63  ;;  %v903_v28 = vmul.f32 %v1861_v54, %v897_v0 }
 0x29e   :  { %v909_v8 = vcombine.low %v905_v4, %v906_v6 }
 0x2a0   :  { %v916_v9 = vrot.slane %v909_v8, %v878_v43 }
 0x2a2   :  { %v923_v16 = vrot.slane %v916_v9, %v878_v43 }
 0x2a4   :  { %v925_v18 = vsub.f32 %v904_v13, %v923_v16 }
 0x2a6   :  { %v930_v29 = vrot.slane %v925_v18, %v892_v58  ;;  %v934_v33 = vrot.slane %v925_v18, %v896_v51 }
 0x2a8   :  { %v937_v34 = vadd.f32 %v930_v29, %v900_v19  ;;  %v938_v35 = vadd.f32 %v934_v33, %v901_v23  ;;  %v939_v37 = vadd.f32 %v930_v29, %v902_v25  ;;  %v940_v41 = vadd.f32 %v934_v33, %v903_v28 }
 0x2aa   :  { %v1034_v42 = vpack.c.bf16 %v938_v35, %v937_v34  ;;  %v1035_v62 = vpack.c.bf16 %v940_v41, %v939_v37 }
 0x2ac   :  { %953 = vst [vmem:[%s1927_s5] sm:$0xff] %v1034_v42  ;;  %954 = vst [vmem:[%s1927_s5 + $0x8] sm:$0xff] %v1035_v62 }

// kernel: tile.58
= control target key start
LH: loop header
LB: loop body
LE: loop exit
PB: predicated region body
PF: predicated region fallthrough
CT: control target
= control target key end

     0   :  { %s22_s0 = inlined_call_operand.vmem [shape: f32[32], index: 0, kind: input, shape index: {}]   ;;  %s23_s1 = inlined_call_operand.vmem [shape: f32[4,32], index: 1, kind: output, shape index: {}]  }
   0x1   :  { %v4_v0 = vld [vmem:[%s22_s0] ss:$0 sm:$0xff] }
   0x2   :  { %5 = vst [vmem:[%s23_s1] sm:$0xf] %v4_v0 }

// kernel: unet_forward.16
= control target key start
LH: loop header
LB: loop body
LE: loop exit
PB: predicated region body
PF: predicated region fallthrough
CT: control target
= control target key end

     0   :  { %vm1499_vm0 = vmmov 0   ;;  %s1834_s1 = inlined_call_operand.vmem [shape: bf16[1152,128], index: 1, kind: input, shape index: {}]   ;;  %s1835_s0 = inlined_call_operand.vmem [shape: bf16[16,1152], index: 0, kind: input, shape index: {}]   ;;  %s1836_s4 = inlined_call_operand.vmem [shape: f32[128,128], index: 4, kind: input, shape index: {}]   ;;  %s1837_s2 = inlined_call_operand.vmem [shape: f32[1,128], index: 2, kind: input, shape index: {}]   ;;  %s1838_s3 = inlined_call_operand.vmem [shape: f32[1,128], index: 3, kind: input, shape index: {}]   ;;  %s1839_s5 = inlined_call_operand.vmem [shape: bf16[16,128], index: 5, kind: output, shape index: {}]  }
   0x1   :  { %v1424_v0 = vld [vmem:[%s1834_s1 + $0x40] sm:$0xff]   ;;  %v1428_v4 = vld [vmem:[%s1834_s1 + $0x48] sm:$0xff]   ;;  %v1432_v8 = vld [vmem:[%s1834_s1 + $0x50] sm:$0xff]  }
   0x2   :  { %v1425_v1 = vld [vmem:[%s1834_s1 + $0xc0] sm:$0xff]   ;;  %1152 = vmatprep.subr.bf16.mxu0 %v1424_v0  ;;  %v1429_v5 = vld [vmem:[%s1834_s1 + $0xc8] sm:$0xff]   ;;  %v1433_v9 = vld [vmem:[%s1834_s1 + $0xd0] sm:$0xff]  }
   0x3   :  { %v1426_v2 = vld [vmem:[%s1834_s1] sm:$0xff]   ;;  %1174 = vmatprep.subr.bf16.mxu1 %v1425_v1  ;;  %v1430_v6 = vld [vmem:[%s1834_s1 + $0x8] sm:$0xff]   ;;  %v1434_v10 = vld [vmem:[%s1834_s1 + $0x10] sm:$0xff]  }
   0x4   :  { %v1427_v3 = vld [vmem:[%s1834_s1 + $0x80] sm:$0xff]   ;;  %1153 = vmatpush3.bf16.msra.mxu0 %v1426_v2  ;;  %v1431_v7 = vld [vmem:[%s1834_s1 + $0x88] sm:$0xff]   ;;  %v1435_v11 = vld [vmem:[%s1834_s1 + $0x90] sm:$0xff]  }
   0x5   :  { %1175 = vmatpush3.bf16.msra.mxu1 %v1427_v3  ;;  %1154 = vmatprep.subr.bf16.mxu0 %v1428_v4  ;;  %v1436_v12 = vld [vmem:[%s1834_s1 + $0x58] sm:$0xff]   ;;  %v1440_v16 = vld [vmem:[%s1834_s1 + $0x60] sm:$0xff]   ;;  %v1444_v20 = vld [vmem:[%s1834_s1 + $0x68] sm:$0xff]  }
   0x6   :  { %1176 = vmatprep.subr.bf16.mxu1 %v1429_v5  ;;  %v1437_v13 = vld [vmem:[%s1834_s1 + $0xd8] sm:$0xff]   ;;  %v1441_v17 = vld [vmem:[%s1834_s1 + $0xe0] sm:$0xff]   ;;  %v1445_v21 = vld [vmem:[%s1834_s1 + $0xe8] sm:$0xff]  }
   0x7   :  { %v1438_v14 = vld [vmem:[%s1834_s1 + $0x18] sm:$0xff]   ;;  %v1442_v18 = vld [vmem:[%s1834_s1 + $0x20] sm:$0xff]   ;;  %v1446_v22 = vld [vmem:[%s1834_s1 + $0x28] sm:$0xff]  }
   0x8   :  { %1155 = vmatpush3.bf16.msra.mxu0 %v1430_v6  ;;  %v1439_v15 = vld [vmem:[%s1834_s1 + $0x98] sm:$0xff]   ;;  %v1443_v19 = vld [vmem:[%s1834_s1 + $0xa0] sm:$0xff]   ;;  %v1447_v23 = vld [vmem:[%s1834_s1 + $0xa8] sm:$0xff]  }
   0x9   :  { %1177 = vmatpush3.bf16.msra.mxu1 %v1431_v7  ;;  %1156 = vmatprep.subr.bf16.mxu0 %v1432_v8  ;;  %v1448_v24 = vld [vmem:[%s1834_s1 + $0x70] sm:$0xff]   ;;  %v1452_v28 = vld [vmem:[%s1834_s1 + $0x78] sm:$0xff]   ;;  %v21_v32 = vld [vmem:[%s1835_s0] sm:$0xff] }
   0xa   :  { %1178 = vmatprep.subr.bf16.mxu1 %v1433_v9  ;;  %v1449_v25 = vld [vmem:[%s1834_s1 + $0xf0] sm:$0xff]   ;;  %v1453_v29 = vld [vmem:[%s1834_s1 + $0xf8] sm:$0xff]   ;;  %v26_v33 = vld [vmem:[%s1835_s0 + $0x24] sm:$0xff]  ;;  %v31_v35 = vunpack.c.l.bf16 %v21_v32  ;;  %v32_v36 = vunpack.c.h.bf16 %v21_v32 }
   0xb   :  { %v1450_v26 = vld [vmem:[%s1834_s1 + $0x30] sm:$0xff]   ;;  %v1454_v30 = vld [vmem:[%s1834_s1 + $0x38] sm:$0xff]   ;;  %v22_v34 = vld [vmem:[%s1835_s0 + $0x8] sm:$0xff]  ;;  %v40_v37 = vunpack.c.l.bf16 %v26_v33  ;;  %v41_v38 = vunpack.c.h.bf16 %v26_v33 }
   0xc   :  { %1157 = vmatpush3.bf16.msra.mxu0 %v1434_v10  ;;  %v1451_v27 = vld [vmem:[%s1834_s1 + $0xb0] sm:$0xff]   ;;  %v1455_v31 = vld [vmem:[%s1834_s1 + $0xb8] sm:$0xff]   ;;  %v33_v40 = vunpack.c.l.bf16 %v22_v34  ;;  %v34_v41 = vunpack.c.h.bf16 %v22_v34  ;;  %v1456_v44 = vld [vmem:[%s1834_s1 + $0x140] sm:$0xff]   ;;  %v49_v45 = vmax.f32 %v31_v35, 0.0  ;;  %v50_v46 = vmax.f32 %v32_v36, 0.0 }
   0xd   :  { %1179 = vmatpush3.bf16.msra.mxu1 %v1435_v11  ;;  %1158 = vmatprep.subr.bf16.mxu0 %v1436_v12  ;;  %v27_v39 = vld [vmem:[%s1835_s0 + $0x2c] sm:$0xff]  ;;  %v58_v47 = vmax.f32 %v40_v37, 0.0  ;;  %v59_v48 = vmax.f32 %v41_v38, 0.0  ;;  %v1457_v49 = vld [vmem:[%s1834_s1 + $0x100] sm:$0xff]   ;;  %v1468_v4 = vld [vmem:[%s1834_s1 + $0x158] sm:$0xff]  }
   0xe   :  { %1180 = vmatprep.subr.bf16.mxu1 %v1437_v13  ;;  %v42_v42 = vunpack.c.l.bf16 %v27_v39  ;;  %v43_v43 = vunpack.c.h.bf16 %v27_v39  ;;  %v1458_v50 = vld [vmem:[%s1834_s1 + $0x1c0] sm:$0xff]   ;;  %v51_v51 = vmax.f32 %v33_v40, 0.0  ;;  %v52_v52 = vmax.f32 %v34_v41, 0.0  ;;  %v1460_v60 = vld [vmem:[%s1834_s1 + $0x148] sm:$0xff]   ;;  %v1464_v0 = vld [vmem:[%s1834_s1 + $0x150] sm:$0xff]  }
   0xf   :  { %v68_v55 = vpack.c.bf16 %v59_v48, %v50_v46  ;;  %v67_v56 = vpack.c.bf16 %v58_v47, %v49_v45  ;;  %v1459_v59 = vld [vmem:[%s1834_s1 + $0x180] sm:$0xff]   ;;  %v1461_v61 = vld [vmem:[%s1834_s1 + $0x108] sm:$0xff]   ;;  %v1465_v1 = vld [vmem:[%s1834_s1 + $0x110] sm:$0xff]  }
  0x10   :  { %1159 = vmatpush3.bf16.msra.mxu0 %v1438_v14  ;;  %v60_v53 = vmax.f32 %v42_v42, 0.0  ;;  %v61_v54 = vmax.f32 %v43_v43, 0.0  ;;  %v1462_v62 = vld [vmem:[%s1834_s1 + $0x1c8] sm:$0xff]   ;;  %v1466_v2 = vld [vmem:[%s1834_s1 + $0x1d0] sm:$0xff]   ;;  %v1469_v5 = vld [vmem:[%s1834_s1 + $0x118] sm:$0xff]   ;;  %v1498_v42 = vmov 0.0  }
  0x11   :  { %1181 = vmatpush3.bf16.msra.mxu1 %v1439_v15  ;;  %1160 = vmatprep.subr.bf16.mxu0 %v1440_v16  ;;  %v1463_v63 = vld [vmem:[%s1834_s1 + $0x188] sm:$0xff]   ;;  %v1467_v3 = vld [vmem:[%s1834_s1 + $0x190] sm:$0xff]   ;;  %v1470_v6 = vld [vmem:[%s1834_s1 + $0x1d8] sm:$0xff]  }
  0x12   :  { %1182 = vmatprep.subr.bf16.mxu1 %v1441_v17  ;;  %v70_v57 = vpack.c.bf16 %v61_v54, %v52_v52  ;;  %v69_v58 = vpack.c.bf16 %v60_v53, %v51_v51  ;;  %684 = vmatprep.mubr.bf16.mxu0 %v68_v55  ;;  %v1471_v7 = vld [vmem:[%s1834_s1 + $0x198] sm:$0xff]   ;;  %v1472_v8 = vld [vmem:[%s1834_s1 + $0x160] sm:$0xff]   ;;  %v1476_v12 = vld [vmem:[%s1834_s1 + $0x168] sm:$0xff]  }
  0x13   :  { %v1473_v9 = vld [vmem:[%s1834_s1 + $0x120] sm:$0xff]   ;;  %v1477_v13 = vld [vmem:[%s1834_s1 + $0x128] sm:$0xff]   ;;  %v1480_v16 = vld [vmem:[%s1834_s1 + $0x170] sm:$0xff]  }
  0x14   :  { %1161 = vmatpush3.bf16.msra.mxu0 %v1442_v18  ;;  %725 = vmatprep.mubr.bf16.mxu1 %v70_v57  ;;  %v1474_v10 = vld [vmem:[%s1834_s1 + $0x1e0] sm:$0xff]   ;;  %v1478_v14 = vld [vmem:[%s1834_s1 + $0x1e8] sm:$0xff]   ;;  %v1481_v17 = vld [vmem:[%s1834_s1 + $0x130] sm:$0xff]  }
  0x15   :  { %1183 = vmatpush3.bf16.msra.mxu1 %v1443_v19  ;;  %1162 = vmatprep.subr.bf16.mxu0 %v1444_v20  ;;  %v1475_v11 = vld [vmem:[%s1834_s1 + $0x1a0] sm:$0xff]   ;;  %v1479_v15 = vld [vmem:[%s1834_s1 + $0x1a8] sm:$0xff]   ;;  %v1482_v18 = vld [vmem:[%s1834_s1 + $0x1f0] sm:$0xff]  }
  0x16   :  { %1184 = vmatprep.subr.bf16.mxu1 %v1445_v21  ;;  %v1483_v19 = vld [vmem:[%s1834_s1 + $0x1b0] sm:$0xff]   ;;  %v1484_v20 = vld [vmem:[%s1834_s1 + $0x178] sm:$0xff]   ;;  %v1488_v43 = vld [vmem:[%s1834_s1 + $0x200] sm:$0xff]  }
  0x17   :  { %v1485_v21 = vld [vmem:[%s1834_s1 + $0x138] sm:$0xff]   ;;  %v1490_v51 = vld [vmem:[%s1834_s1 + $0x210] sm:$0xff]   ;;  %v1492_v53 = vld [vmem:[%s1834_s1 + $0x220] sm:$0xff]  }
  0x18   :  { %1163 = vmatpush3.bf16.msra.mxu0 %v1446_v22  ;;  %v1486_v22 = vld [vmem:[%s1834_s1 + $0x1f8] sm:$0xff]   ;;  %v1493_v54 = vld [vmem:[%s1834_s1 + $0x228] sm:$0xff]   ;;  %v25_v55 = vld [vmem:[%s1835_s0 + $0x20] ss:$36 sps:$4 sm:$0xff]  }
  0x19   :  { %1185 = vmatpush3.bf16.msra.mxu1 %v1447_v23  ;;  %1164 = vmatprep.subr.bf16.mxu0 %v1448_v24  ;;  %v23_v23 = vld [vmem:[%s1835_s0 + $0x10] sm:$0xff]  ;;  %v1491_v52 = vld [vmem:[%s1834_s1 + $0x218] sm:$0xff]   ;;  %v48_v57 = vunpack.c.h.bf16 %v25_v55 }
  0x1a   :  { %1186 = vmatprep.subr.bf16.mxu1 %v1449_v25  ;;  %v28_v24 = vld [vmem:[%s1835_s0 + $0x34] sm:$0xff]  ;;  %v35_v25 = vunpack.c.l.bf16 %v23_v23 }
  0x1c   :  { %1165 = vmatpush3.bf16.msra.mxu0 %v1450_v26  ;;  %v36_v26 = vunpack.c.h.bf16 %v23_v23  ;;  %v53_v32 = vmax.f32 %v35_v25, 0.0 }
  0x1d   :  { %1187 = vmatpush3.bf16.msra.mxu1 %v1451_v27  ;;  %1166 = vmatprep.subr.bf16.mxu0 %v1452_v28  ;;  %v44_v27 = vunpack.c.l.bf16 %v28_v24  ;;  %v45_v28 = vunpack.c.h.bf16 %v28_v24 }
  0x1e   :  { %1188 = vmatprep.subr.bf16.mxu1 %v1453_v29  ;;  %v1487_v29 = vld [vmem:[%s1834_s1 + $0x1b8] sm:$0xff]   ;;  %v54_v33 = vmax.f32 %v36_v26, 0.0 }
  0x1f   :  { %v62_v34 = vmax.f32 %v44_v27, 0.0  ;;  %v63_v35 = vmax.f32 %v45_v28, 0.0 }
  0x20   :  { %1167 = vmatpush3.bf16.msra.mxu0 %v1454_v30  ;;  %v24_v30 = vld [vmem:[%s1835_s0 + $0x18] sm:$0xff] }
  0x21   :  { %1189 = vmatpush3.bf16.msra.mxu1 %v1455_v31  ;;  %1196 = vmatprep.subr.bf16.mxu0 %v1456_v44  ;;  %v29_v31 = vld [vmem:[%s1835_s0 + $0x3c] sm:$0xff]  ;;  %v37_v36 = vunpack.c.l.bf16 %v24_v30  ;;  %v38_v37 = vunpack.c.h.bf16 %v24_v30  ;;  %v72_v40 = vpack.c.bf16 %v63_v35, %v54_v33  ;;  %v71_v41 = vpack.c.bf16 %v62_v34, %v53_v32 }
  0x22   :  { %1218 = vmatprep.subr.bf16.mxu1 %v1458_v50  ;;  %v46_v38 = vunpack.c.l.bf16 %v29_v31  ;;  %v47_v39 = vunpack.c.h.bf16 %v29_v31  ;;  %v1489_v50 = vld [vmem:[%s1834_s1 + $0x208] sm:$0xff]  }
  0x23   :  { %685 = vmatmul.mubr.bf16.vlgmr.msra.gmra.mrb[0].mxu0 %v67_v56  ;;  %v55_v44 = vmax.f32 %v37_v36, 0.0  ;;  %v56_v45 = vmax.f32 %v38_v37, 0.0  ;;  %v39_v56 = vunpack.c.l.bf16 %v25_v55 }
  0x24   :  { %726 = vmatmul.mubr.bf16.vlgmr.msra.gmra.mrb[0].mxu1 %v69_v58  ;;  %1197 = vmatpush3.bf16.msra.mxu0 %v1457_v49  ;;  %v64_v46 = vmax.f32 %v46_v38, 0.0  ;;  %v65_v47 = vmax.f32 %v47_v39, 0.0  ;;  %v1494_v58 = vld [vmem:[%s1834_s1 + $0x230] sm:$0xff]  }
  0x25   :  { %1219 = vmatpush3.bf16.msra.mxu1 %v1459_v59  ;;  %1198 = vmatprep.subr.bf16.mxu0 %v1460_v60  ;;  %v57_v59 = vmax.f32 %v39_v56, 0.0  ;;  %v66_v60 = vmax.f32 %v48_v57, 0.0 }
  0x26   :  { %1220 = vmatprep.subr.bf16.mxu1 %v1462_v62  ;;  %766 = vmatprep.mubr.bf16.mxu0 %v72_v40  ;;  %v74_v48 = vpack.c.bf16 %v65_v47, %v56_v45  ;;  %v73_v49 = vpack.c.bf16 %v64_v46, %v55_v44 }
  0x27   :  { %v75_v62 = vpack.c.bf16 %v66_v60, %v57_v59 }
  0x28   :  { %1199 = vmatpush3.bf16.msra.mxu0 %v1461_v61  ;;  %807 = vmatprep.mubr.bf16.mxu1 %v74_v48  ;;  %v1495_v61 = vld [vmem:[%s1834_s1 + $0x238] sm:$0xff]  }
  0x29   :  { %1221 = vmatpush3.bf16.msra.mxu1 %v1463_v63  ;;  %1200 = vmatprep.subr.bf16.mxu0 %v1464_v0  ;;  %v1500_v63 = vmov 0.0|0.0   ;;  %v873_v0 = vld [vmem:[%s1836_s4] sm:$0xff] }
  0x2a   :  { %1222 = vmatprep.subr.bf16.mxu1 %v1466_v2  ;;  %v875_v2 = vld [vmem:[%s1836_s4 + $0x10] sm:$0xff] }
  0x2c   :  { %1201 = vmatpush3.bf16.msra.mxu0 %v1465_v1  ;;  %v874_v1 = vld [vmem:[%s1836_s4 + $0x8] sm:$0xff] }
  0x2d   :  { %1223 = vmatpush3.bf16.msra.mxu1 %v1467_v3  ;;  %1202 = vmatprep.subr.bf16.mxu0 %v1468_v4  ;;  %v1374_v3 = vpack.c.bf16 %v874_v1, %v873_v0  ;;  %v876_v4 = vld [vmem:[%s1836_s4 + $0x18] sm:$0xff] }
  0x2e   :  { %1224 = vmatprep.subr.bf16.mxu1 %v1470_v6  ;;  %v877_v6 = vld [vmem:[%s1836_s4 + $0x20] sm:$0xff] }
  0x30   :  { %1203 = vmatpush3.bf16.msra.mxu0 %v1469_v5  ;;  %v1377_v5 = vpack.c.bf16 %v876_v4, %v875_v2 }
  0x31   :  { %1225 = vmatpush3.bf16.msra.mxu1 %v1471_v7  ;;  %1204 = vmatprep.subr.bf16.mxu0 %v1472_v8  ;;  %v878_v7 = vld [vmem:[%s1836_s4 + $0x28] sm:$0xff] }
  0x32   :  { %1226 = vmatprep.subr.bf16.mxu1 %v1474_v10  ;;  %v1380_v8 = vpack.c.bf16 %v878_v7, %v877_v6  ;;  %v880_v10 = vld [vmem:[%s1836_s4 + $0x38] sm:$0xff] }
  0x34   :  { %1205 = vmatpush3.bf16.msra.mxu0 %v1473_v9  ;;  %v879_v9 = vld [vmem:[%s1836_s4 + $0x30] sm:$0xff] }
  0x35   :  { %1227 = vmatpush3.bf16.msra.mxu1 %v1475_v11  ;;  %1206 = vmatprep.subr.bf16.mxu0 %v1476_v12  ;;  %v1383_v11 = vpack.c.bf16 %v880_v10, %v879_v9  ;;  %v881_v12 = vld [vmem:[%s1836_s4 + $0x40] sm:$0xff] }
  0x36   :  { %1228 = vmatprep.subr.bf16.mxu1 %v1478_v14 }
  0x38   :  { %1207 = vmatpush3.bf16.msra.mxu0 %v1477_v13  ;;  %v882_v13 = vld [vmem:[%s1836_s4 + $0x48] sm:$0xff] }
  0x39   :  { %1229 = vmatpush3.bf16.msra.mxu1 %v1479_v15  ;;  %1208 = vmatprep.subr.bf16.mxu0 %v1480_v16  ;;  %v1386_v14 = vpack.c.bf16 %v882_v13, %v881_v12  ;;  %v883_v15 = vld [vmem:[%s1836_s4 + $0x50] sm:$0xff]  ;;  %v884_v16 = vld [vmem:[%s1836_s4 + $0x58] sm:$0xff] }
  0x3a   :  { %1230 = vmatprep.subr.bf16.mxu1 %v1482_v18  ;;  %v885_v18 = vld [vmem:[%s1836_s4 + $0x60] sm:$0xff] }
  0x3c   :  { %1209 = vmatpush3.bf16.msra.mxu0 %v1481_v17  ;;  %v1389_v17 = vpack.c.bf16 %v884_v16, %v883_v15 }
  0x3d   :  { %1231 = vmatpush3.bf16.msra.mxu1 %v1483_v19  ;;  %1210 = vmatprep.subr.bf16.mxu0 %v1484_v20  ;;  %v886_v19 = vld [vmem:[%s1836_s4 + $0x68] sm:$0xff] }
  0x3e   :  { %1232 = vmatprep.subr.bf16.mxu1 %v1486_v22  ;;  %v1392_v20 = vpack.c.bf16 %v886_v19, %v885_v18  ;;  %v888_v22 = vld [vmem:[%s1836_s4 + $0x78] sm:$0xff] }
  0x40   :  { %1211 = vmatpush3.bf16.msra.mxu0 %v1485_v21  ;;  %v887_v21 = vld [vmem:[%s1836_s4 + $0x70] sm:$0xff] }
  0x41   :  { %1233 = vmatpush3.bf16.msra.mxu1 %v1487_v29  ;;  %1283 = vmatprep.subr.bf16.mxu0 %v1498_v42  ;;  %v1395_v23 = vpack.c.bf16 %v888_v22, %v887_v21  ;;  %v1039_v22 = vlaneseq }
  0x42   :  { %1373 = vmatprep.subr.bf16.mxu1 %v1500_v63 }
  0x43   :  { %767 = vmatmul.mubr.bf16.vlgmr.msra.gmra.mrb[4].mxu0 %v71_v41 }
  0x44   :  { %1284 = vmatpush3.bf16.msra.mxu0 %v1488_v43  ;;  %1299 = vmatprep.mubr.msk.bf16.mxu0 %vm1499_vm0, %v1498_v42 }
  0x45   :  { %1285 = vmatprep.subr.bf16.mxu0 %v1498_v42  ;;  %808 = vmatmul.mubr.bf16.vlgmr.msra.gmra.mrb[4].mxu1 %v73_v49 }
  0x46   :  { %1335 = vmatprep.mubr.msk.f32.mxu1 %vm1499_vm0, %v1498_v42  ;;  %1375 = vmatpush3.bf16.msra.mxu1 %v1374_v3 }
  0x47   :  { %1376 = vmatprep.subr.bf16.mxu1 %v1500_v63 }
  0x48   :  { %1286 = vmatpush3.bf16.msra.mxu0 %v1489_v50 }
  0x49   :  { %1287 = vmatprep.subr.bf16.mxu0 %v1498_v42 }
  0x4a   :  { %1378 = vmatpush3.bf16.msra.mxu1 %v1377_v5 }
  0x4b   :  { %1379 = vmatprep.subr.bf16.mxu1 %v1500_v63 }
  0x4c   :  { %1288 = vmatpush3.bf16.msra.mxu0 %v1490_v51 }
  0x4d   :  { %1289 = vmatprep.subr.bf16.mxu0 %v1498_v42 }
  0x4e   :  { %1381 = vmatpush3.bf16.msra.mxu1 %v1380_v8 }
  0x4f   :  { %1382 = vmatprep.subr.bf16.mxu1 %v1500_v63 }
  0x50   :  { %1290 = vmatpush3.bf16.msra.mxu0 %v1491_v52 }
  0x51   :  { %1291 = vmatprep.subr.bf16.mxu0 %v1498_v42 }
  0x52   :  { %1384 = vmatpush3.bf16.msra.mxu1 %v1383_v11 }
  0x53   :  { %1385 = vmatprep.subr.bf16.mxu1 %v1500_v63 }
  0x54   :  { %1292 = vmatpush3.bf16.msra.mxu0 %v1492_v53 }
  0x55   :  { %1293 = vmatprep.subr.bf16.mxu0 %v1498_v42 }
  0x56   :  { %1387 = vmatpush3.bf16.msra.mxu1 %v1386_v14 }
  0x57   :  { %1388 = vmatprep.subr.bf16.mxu1 %v1500_v63 }
  0x58   :  { %1294 = vmatpush3.bf16.msra.mxu0 %v1493_v54 }
  0x59   :  { %1295 = vmatprep.subr.bf16.mxu0 %v1498_v42 }
  0x5a   :  { %1390 = vmatpush3.bf16.msra.mxu1 %v1389_v17 }
  0x5b   :  { %1391 = vmatprep.subr.bf16.mxu1 %v1500_v63 }
  0x5c   :  { %1296 = vmatpush3.bf16.msra.mxu0 %v1494_v58 }
  0x5d   :  { %1297 = vmatprep.subr.bf16.mxu0 %v1498_v42 }
  0x5e   :  { %1393 = vmatpush3.bf16.msra.mxu1 %v1392_v20 }
  0x5f   :  { %1394 = vmatprep.subr.bf16.mxu1 %v1500_v63 }
  0x60   :  { %1298 = vmatpush3.bf16.msra.mxu0 %v1495_v61 }
  0x61   :  { %1397 = vmatprep.subr.bf16.mxu0 %v1500_v63 }
  0x62   :  { %1396 = vmatpush3.bf16.msra.mxu1 %v1395_v23 }
  0x63   :  { %1300 = vmatmul.mubr.bf16.vlgmr.msra.gmra.mrb[8].mxu0 %v75_v62 }
  0x64   :  { %1370 = vmatprep.mubr.msk.f32.mxu0 %vm1499_vm0, %v1498_v42  ;;  %1399 = vmatpush3.bf16.msra.mxu0 %v1374_v3 }
  0x65   :  { %1400 = vmatprep.subr.bf16.mxu0 %v1500_v63 }
  0x68   :  { %1402 = vmatpush3.bf16.msra.mxu0 %v1377_v5 }
  0x69   :  { %1403 = vmatprep.subr.bf16.mxu0 %v1500_v63 }
  0x6c   :  { %1405 = vmatpush3.bf16.msra.mxu0 %v1380_v8 }
  0x6d   :  { %1406 = vmatprep.subr.bf16.mxu0 %v1500_v63 }
  0x70   :  { %1408 = vmatpush3.bf16.msra.mxu0 %v1383_v11 }
  0x71   :  { %1409 = vmatprep.subr.bf16.mxu0 %v1500_v63 }
  0x74   :  { %1411 = vmatpush3.bf16.msra.mxu0 %v1386_v14 }
  0x75   :  { %1412 = vmatprep.subr.bf16.mxu0 %v1500_v63 }
  0x78   :  { %1414 = vmatpush3.bf16.msra.mxu0 %v1389_v17 }
  0x79   :  { %1415 = vmatprep.subr.bf16.mxu0 %v1500_v63 }
  0x7c   :  { %1417 = vmatpush3.bf16.msra.mxu0 %v1392_v20 }
  0x7d   :  { %1418 = vmatprep.subr.bf16.mxu0 %v1500_v63 }
  0x80   :  { %1420 = vmatpush3.bf16.msra.mxu0 %v1395_v23  ;;  %v1040_v23 = vshrl.u32 %v1039_v22, 7 }
  0xf6   :  { %v1168_v24 = vpop.f32.mrb[0].mxu0 }
  0xf7   :  { %v1190_v25 = vpop.f32.mrb[0].mxu1  ;;  %v1169_v26 = vpop.f32.mrb[1].mxu0 }
  0xf8   :  { %v1170_v27 = vadd.f32 %v1169_v26, %v1168_v24  ;;  %v1191_v28 = vpop.f32.mrb[1].mxu1  ;;  %v1171_v29 = vpop.f32.mrb[2].mxu0  ;;  %v1034_v24 = vld [vmem:[%s1837_s2] sm:$0x1] }
  0xf9   :  { %v1192_v30 = vadd.f32 %v1191_v28, %v1190_v25  ;;  %v1193_v31 = vpop.f32.mrb[2].mxu1  ;;  %v1172_v32 = vpop.f32.mrb[3].mxu0  ;;  %v1041_v25 = vsub.s32 0, %v1040_v23  ;;  %v1046_v28 = vld [vmem:[%s1838_s3] sm:$0x1] }
  0xfa   :  { %v1173_v33 = vadd.f32 %v1172_v32, %v1171_v29  ;;  %v1194_v34 = vpop.f32.mrb[3].mxu1 }
  0xfb   :  { %v728_v35 = vadd.f32 %v1192_v30, %v1170_v27  ;;  %v1195_v36 = vadd.f32 %v1194_v34, %v1193_v31 }
  0xfd   :  { %v731_v37 = vadd.f32 %v1195_v36, %v1173_v33 }
 0x116   :  { %v1212_v38 = vpop.f32.mrb[4].mxu0 }
 0x117   :  { %v1213_v39 = vpop.f32.mrb[5].mxu0 }
 0x118   :  { %v1214_v40 = vadd.f32 %v1213_v39, %v1212_v38  ;;  %v1215_v41 = vpop.f32.mrb[6].mxu0  ;;  %v1234_v42 = vpop.f32.mrb[4].mxu1 }
 0x119   :  { %v1216_v43 = vpop.f32.mrb[7].mxu0  ;;  %v1235_v46 = vpop.f32.mrb[5].mxu1 }
 0x11a   :  { %v769_v44 = vadd.f32 %v1214_v40, %v728_v35  ;;  %v1217_v45 = vadd.f32 %v1216_v43, %v1215_v41  ;;  %v1236_v47 = vadd.f32 %v1235_v46, %v1234_v42  ;;  %v1237_v48 = vpop.f32.mrb[6].mxu1 }
 0x11b   :  { %v1238_v50 = vpop.f32.mrb[7].mxu1 }
 0x11c   :  { %v772_v49 = vadd.f32 %v1217_v45, %v731_v37  ;;  %v1239_v51 = vadd.f32 %v1238_v50, %v1237_v48  ;;  %v810_v52 = vadd.f32 %v1236_v47, %v769_v44 }
 0x11e   :  { %v813_v53 = vadd.f32 %v1239_v51, %v772_v49 }
 0x136   :  { %v850_v54 = vpop.f32.mrb[8].mxu0 }
 0x137   :  { %v851_v55 = vadd.f32 %v850_v54, %v810_v52  ;;  %v1301_v56 = vpop.f32.mrb[9].mxu0 }
 0x138   :  { %v853_v57 = vpop.f32.mrb[10].mxu0 }
 0x139   :  { %v854_v58 = vadd.f32 %v853_v57, %v813_v53  ;;  %v1302_v59 = vpop.f32.mrb[11].mxu0  ;;  %v864_v60 = vmul.f32 %v851_v55, %v851_v55 }
 0x13b   :  { %v857_v61 = vadd.f32 %v854_v58, %v851_v55  ;;  %v865_v62 = vmul.f32 %v854_v58, %v854_v58 }
 0x13d   :  { %v858_v63 = vrot.slane %v857_v61, 4  ;;  %v866_v0 = vadd.f32 %v865_v62, %v864_v60 }
 0x13f   :  { %v859_v1 = vadd.f32 %v858_v63, %v857_v61  ;;  %v867_v2 = vrot.slane %v866_v0, 4 }
 0x141   :  { %v860_v3 = vrot.slane %v859_v1, 2  ;;  %v868_v4 = vadd.f32 %v867_v2, %v866_v0 }
 0x143   :  { %v861_v5 = vadd.f32 %v860_v3, %v859_v1  ;;  %v869_v6 = vrot.slane %v868_v4, 2 }
 0x145   :  { %v862_v7 = vrot.slane %v861_v5, 1  ;;  %v870_v8 = vadd.f32 %v869_v6, %v868_v4 }
 0x147   :  { %v863_v9 = vadd.f32 %v862_v7, %v861_v5  ;;  %v871_v10 = vrot.slane %v870_v8, 1 }
 0x149   :  { %1336 = vmatmul.mubr.f32.vlgmr.msra.gmra.mrb[8].mxu1 %v863_v9  ;;  %v872_v11 = vadd.f32 %v871_v10, %v870_v8 }
 0x14b   :  { %1371 = vmatmul.mubr.f32.vlgmr.msra.gmra.mrb[12].mxu0 %v872_v11 }
 0x21c   :  { %v955_v12 = vpop.f32.mrb[8].mxu1 }
 0x21d   :  { %v1029_v13 = vmul.f32 0.03125, %v955_v12  ;;  %v1337_v14 = vpop.f32.mrb[9].mxu1 }
 0x21e   :  { %v1025_v15 = vpop.f32.mrb[12].mxu0 }
 0x21f   :  { %v1031_v16 = vmul.f32 %v1029_v13, %v1029_v13  ;;  %v1030_v17 = vmul.f32 0.03125, %v1025_v15  ;;  %v1372_v18 = vpop.f32.mrb[13].mxu0 }
 0x221   :  { %v1032_v19 = vsub.f32 %v1030_v17, %v1031_v16 }
 0x223   :  { %v1033_v20 = vmax.f32 %v1032_v19, 0.0 }
 0x225   :  { %v1035_v21 = vadd.f32 1e-05, %v1033_v20 }
 0x227   :  { %1496 = vrsqrt.f32 %v1035_v21 }
 0x231   :  { %v1497_v26 = vpop.eup %1496 }
 0x232   :  { %v1037_v27 = vmul.f32 %v1497_v26, %v1034_v24 }
 0x234   :  { %v1042_v29 = vrot.slane %v1037_v27, %v1041_v25  ;;  %v1047_v30 = vmul.f32 %v1037_v27, %v1029_v13 }
 0x236   :  { %v1048_v31 = vsub.f32 %v1046_v28, %v1047_v30  ;;  %v1044_v32 = vmul.f32 %v1042_v29, %v851_v55  ;;  %v1045_v33 = vmul.f32 %v1042_v29, %v854_v58 }
 0x238   :  { %v1053_v34 = vrot.slane %v1048_v31, %v1041_v25 }
 0x23a   :  { %v1055_v35 = vadd.f32 %v1053_v34, %v1044_v32  ;;  %v1056_v36 = vadd.f32 %v1053_v34, %v1045_v33 }
 0x23c   :  { %v1150_v37 = vpack.c.bf16 %v1056_v36, %v1055_v35 }
 0x23e   :  { %1151 = vst [vmem:[%s1839_s5] sm:$0xff] %v1150_v37  }

// kernel: tile.68
= control target key start
LH: loop header
LB: loop body
LE: loop exit
PB: predicated region body
PF: predicated region fallthrough
CT: control target
= control target key end

     0   :  { %s22_s0 = inlined_call_operand.vmem [shape: f32[16], index: 0, kind: input, shape index: {}]   ;;  %s23_s1 = inlined_call_operand.vmem [shape: f32[4,16], index: 1, kind: output, shape index: {}]  }
   0x1   :  { %v4_v0 = vld [vmem:[%s22_s0] ss:$0 sm:$0xff] }
   0x2   :  { %5 = vst [vmem:[%s23_s1] sm:$0xf] %v4_v0 }

// kernel: tile.69
= control target key start
LH: loop header
LB: loop body
LE: loop exit
PB: predicated region body
PF: predicated region fallthrough
CT: control target
= control target key end

     0   :  { %vm7_vm0 = vcmask 130048   ;;  %s37_s8 = smov 16   ;;  %s38_s9 = smov 32   ;;  %vm13_vm1 = vcmask 523648   ;;  %vm19_vm2 = vcmask 392448   ;;  %vm25_vm3 = vcmask 261248   ;;  %s55_s0 = inlined_call_operand.vmem [shape: f32[4,16], index: 0, kind: input, shape index: {}]   ;;  %s56_s1 = inlined_call_operand.vmem [shape: f32[64], index: 1, kind: output, shape index: {}]  }
   0x1   :  { %v4_v0 = vld [vmem:[%s55_s0] sm:$0xf]  ;;  %s36_s0 = smov 48  }
   0x2   :  { %5 = vst [vmem:[#allocation1] sm:$0xf] %v4_v0 }
   0x9   :  { %v10_v1 = vld [vmem:[#allocation1 + $0x3] sm:$0x1]   ;;  %v22_v2 = vld [vmem:[#allocation1 + $0x1] sm:$0x1]   ;;  %v6_v3 = vld [vmem:[#allocation1] sm:$0x1]  }
   0xa   :  { %11 = vrot.lane.b32.xlu0 %v10_v1, %s36_s0  ;;  %23 = vrot.lane.b32.xlu1 %v22_v2, %s37_s8  ;;  %v16_v4 = vld [vmem:[#allocation1 + $0x2] sm:$0x1]   ;;  %8 = vst.msk [vmem:[#allocation0] sm:$0x1] %vm7_vm0, %v6_v3  }
   0xe   :  { %17 = vrot.lane.b32.xlu0 %v16_v4, %s38_s9 }
  0x7c   :  { %v12_v5 = vpop.permute.xlu0 %11   ;;  %v24_v6 = vpop.permute.xlu1 %23  }
  0x7d   :  { %14 = vst.msk [vmem:[#allocation0] sm:$0x1] %vm13_vm1, %v12_v5  }
  0x80   :  { %v18_v7 = vpop.permute.xlu0 %17  }
  0x81   :  { %20 = vst.msk [vmem:[#allocation0] sm:$0x1] %vm19_vm2, %v18_v7  }
  0x82   :  { %26 = vst.msk [vmem:[#allocation0] sm:$0x1] %vm25_vm3, %v24_v6  }
  0x89   :  { %v30_v8 = vld [vmem:[#allocation0] sm:$0x1] }
  0x8a   :  { %32 = vst [vmem:[%s56_s1] sm:$0x1] %v30_v8 }

// kernel: unet_forward.17
= control target key start
LH: loop header
LB: loop body
LE: loop exit
PB: predicated region body
PF: predicated region fallthrough
CT: control target
= control target key end

     0   :  { %vm371_vm0 = vcmask 523264   ;;  %vm1084_vm1 = vmmov 0   ;;  %s1314_s1 = inlined_call_operand.vmem [shape: bf16[576,128], index: 1, kind: input, shape index: {}]   ;;  %s1315_s0 = inlined_call_operand.vmem [shape: bf16[32,576], index: 0, kind: input, shape index: {}]   ;;  %s1316_s4 = inlined_call_operand.vmem [shape: f32[128,128], index: 4, kind: input, shape index: {}]   ;;  %s1317_s2 = inlined_call_operand.vmem [shape: f32[1,128], index: 2, kind: input, shape index: {}]   ;;  %s1318_s3 = inlined_call_operand.vmem [shape: f32[1,128], index: 3, kind: input, shape index: {}]   ;;  %s1319_s5 = inlined_call_operand.vmem [shape: bf16[32,128], index: 5, kind: output, shape index: {}]  }
   0x1   :  { %v1045_v0 = vld [vmem:[%s1314_s1 + $0x40] sm:$0xff]   ;;  %v1049_v4 = vld [vmem:[%s1314_s1 + $0x48] sm:$0xff]   ;;  %v1053_v8 = vld [vmem:[%s1314_s1 + $0x50] sm:$0xff]  }
   0x2   :  { %v1046_v1 = vld [vmem:[%s1314_s1 + $0xc0] sm:$0xff]   ;;  %816 = vmatprep.subr.bf16.mxu0 %v1045_v0  ;;  %v1050_v5 = vld [vmem:[%s1314_s1 + $0xc8] sm:$0xff]   ;;  %v1054_v9 = vld [vmem:[%s1314_s1 + $0xd0] sm:$0xff]  }
   0x3   :  { %v1047_v2 = vld [vmem:[%s1314_s1] sm:$0xff]   ;;  %844 = vmatprep.subr.bf16.mxu1 %v1046_v1  ;;  %v1051_v6 = vld [vmem:[%s1314_s1 + $0x8] sm:$0xff]   ;;  %v1055_v10 = vld [vmem:[%s1314_s1 + $0x10] sm:$0xff]  }
   0x4   :  { %v1048_v3 = vld [vmem:[%s1314_s1 + $0x80] sm:$0xff]   ;;  %817 = vmatpush3.bf16.msra.mxu0 %v1047_v2  ;;  %v1052_v7 = vld [vmem:[%s1314_s1 + $0x88] sm:$0xff]   ;;  %v1056_v11 = vld [vmem:[%s1314_s1 + $0x90] sm:$0xff]  }
   0x5   :  { %845 = vmatpush3.bf16.msra.mxu1 %v1048_v3  ;;  %818 = vmatprep.subr.bf16.mxu0 %v1049_v4  ;;  %v1057_v12 = vld [vmem:[%s1314_s1 + $0x58] sm:$0xff]   ;;  %v1061_v16 = vld [vmem:[%s1314_s1 + $0x60] sm:$0xff]   ;;  %v1065_v20 = vld [vmem:[%s1314_s1 + $0x68] sm:$0xff]  }
   0x6   :  { %846 = vmatprep.subr.bf16.mxu1 %v1050_v5  ;;  %v1058_v13 = vld [vmem:[%s1314_s1 + $0xd8] sm:$0xff]   ;;  %v1062_v17 = vld [vmem:[%s1314_s1 + $0xe0] sm:$0xff]   ;;  %v1066_v21 = vld [vmem:[%s1314_s1 + $0xe8] sm:$0xff]  }
   0x7   :  { %v1059_v14 = vld [vmem:[%s1314_s1 + $0x18] sm:$0xff]   ;;  %v1063_v18 = vld [vmem:[%s1314_s1 + $0x20] sm:$0xff]   ;;  %v1067_v22 = vld [vmem:[%s1314_s1 + $0x28] sm:$0xff]  }
   0x8   :  { %819 = vmatpush3.bf16.msra.mxu0 %v1051_v6  ;;  %v1060_v15 = vld [vmem:[%s1314_s1 + $0x98] sm:$0xff]   ;;  %v1064_v19 = vld [vmem:[%s1314_s1 + $0xa0] sm:$0xff]   ;;  %v1068_v23 = vld [vmem:[%s1314_s1 + $0xa8] sm:$0xff]  }
   0x9   :  { %847 = vmatpush3.bf16.msra.mxu1 %v1052_v7  ;;  %820 = vmatprep.subr.bf16.mxu0 %v1053_v8  ;;  %v1069_v24 = vld [vmem:[%s1314_s1 + $0x70] sm:$0xff]   ;;  %v1073_v28 = vld [vmem:[%s1314_s1 + $0x78] sm:$0xff]   ;;  %v21_v32 = vld [vmem:[%s1315_s0] sm:$0xff] }
   0xa   :  { %848 = vmatprep.subr.bf16.mxu1 %v1054_v9  ;;  %v1070_v25 = vld [vmem:[%s1314_s1 + $0xf0] sm:$0xff]   ;;  %v1074_v29 = vld [vmem:[%s1314_s1 + $0xf8] sm:$0xff]   ;;  %v22_v34 = vld [vmem:[%s1315_s0 + $0x8] sm:$0xff]  ;;  %v33_v35 = vunpack.c.l.bf16 %v21_v32  ;;  %v34_v36 = vunpack.c.h.bf16 %v21_v32 }
   0xb   :  { %v1071_v26 = vld [vmem:[%s1314_s1 + $0x30] sm:$0xff]   ;;  %v1075_v30 = vld [vmem:[%s1314_s1 + $0x38] sm:$0xff]   ;;  %v35_v40 = vunpack.c.l.bf16 %v22_v34  ;;  %v36_v41 = vunpack.c.h.bf16 %v22_v34  ;;  %v1077_v44 = vld [vmem:[%s1314_s1 + $0x100] sm:$0xff]  }
   0xc   :  { %821 = vmatpush3.bf16.msra.mxu0 %v1055_v10  ;;  %v1072_v27 = vld [vmem:[%s1314_s1 + $0xb0] sm:$0xff]   ;;  %v1076_v31 = vld [vmem:[%s1314_s1 + $0xb8] sm:$0xff]   ;;  %v53_v45 = vmax.f32 %v33_v35, 0.0  ;;  %v54_v46 = vmax.f32 %v34_v36, 0.0  ;;  %v27_v49 = vld [vmem:[%s1315_s0 + $0x28] sm:$0xff]  ;;  %v1083_v35 = vmov 0.0|0.0  }
   0xd   :  { %849 = vmatpush3.bf16.msra.mxu1 %v1056_v11  ;;  %822 = vmatprep.subr.bf16.mxu0 %v1057_v12  ;;  %v24_v33 = vld [vmem:[%s1315_s0 + $0x14] sm:$0xff]  ;;  %v25_v39 = vld [vmem:[%s1315_s0 + $0x1c] sm:$0xff]  ;;  %v55_v50 = vmax.f32 %v35_v40, 0.0  ;;  %v56_v51 = vmax.f32 %v36_v41, 0.0  ;;  %v44_v58 = vunpack.c.h.bf16 %v27_v49  ;;  %v31_v60 = vld [vmem:[%s1315_s0 + $0x44] sm:$0xff]  ;;  %v43_v4 = vunpack.c.l.bf16 %v27_v49 }
   0xe   :  { %850 = vmatprep.subr.bf16.mxu1 %v1058_v13  ;;  %v38_v37 = vunpack.c.l.bf16 %v24_v33  ;;  %v39_v38 = vunpack.c.h.bf16 %v24_v33  ;;  %v40_v42 = vunpack.c.l.bf16 %v25_v39  ;;  %v41_v43 = vunpack.c.h.bf16 %v25_v39  ;;  %v30_v54 = vld [vmem:[%s1315_s0 + $0x3c] sm:$0xff]  ;;  %v28_v55 = vld [vmem:[%s1315_s0 + $0x30] sm:$0xff]  ;;  %v1078_v63 = vld [vmem:[%s1314_s1 + $0x108] sm:$0xff]  }
   0xf   :  { %v49_v59 = vunpack.c.h.bf16 %v30_v54  ;;  %v46_v0 = vunpack.c.h.bf16 %v28_v55  ;;  %v51_v1 = vunpack.c.h.bf16 %v31_v60  ;;  %v64_v2 = vmax.f32 %v44_v58, 0.0  ;;  %v23_v6 = vld [vmem:[%s1315_s0 + $0x10] ss:$20 sps:$4 sm:$0xff]   ;;  %v548_v33 = vld [vmem:[%s1316_s4 + $0x8] sm:$0xff]  ;;  %v558_v49 = vld [vmem:[%s1316_s4 + $0x58] sm:$0xff] }
  0x10   :  { %823 = vmatpush3.bf16.msra.mxu0 %v1059_v14  ;;  %v58_v47 = vmax.f32 %v38_v37, 0.0  ;;  %v59_v48 = vmax.f32 %v39_v38, 0.0  ;;  %v60_v52 = vmax.f32 %v40_v42, 0.0  ;;  %v61_v53 = vmax.f32 %v41_v43, 0.0  ;;  %v547_v32 = vld [vmem:[%s1316_s4] sm:$0xff]  ;;  %v549_v36 = vld [vmem:[%s1316_s4 + $0x10] sm:$0xff] }
  0x11   :  { %851 = vmatpush3.bf16.msra.mxu1 %v1060_v15  ;;  %824 = vmatprep.subr.bf16.mxu0 %v1061_v16  ;;  %v69_v3 = vmax.f32 %v49_v59, 0.0  ;;  %v48_v5 = vunpack.c.l.bf16 %v30_v54  ;;  %v66_v7 = vmax.f32 %v46_v0, 0.0  ;;  %v71_v8 = vmax.f32 %v51_v1, 0.0  ;;  %v29_v15 = vld [vmem:[%s1315_s0 + $0x38] ss:$20 sps:$4 sm:$0xff]   ;;  %v551_v39 = vld [vmem:[%s1316_s4 + $0x20] sm:$0xff] }
  0x12   :  { %852 = vmatprep.subr.bf16.mxu1 %v1062_v17  ;;  %v74_v56 = vpack.c.bf16 %v59_v48, %v54_v46  ;;  %v73_v57 = vpack.c.bf16 %v58_v47, %v53_v45  ;;  %v76_v61 = vpack.c.bf16 %v61_v53, %v56_v51  ;;  %v75_v62 = vpack.c.bf16 %v60_v52, %v55_v50  ;;  %v550_v37 = vld [vmem:[%s1316_s4 + $0x18] sm:$0xff]  ;;  %v552_v40 = vld [vmem:[%s1316_s4 + $0x28] sm:$0xff]  ;;  %v553_v42 = vld [vmem:[%s1316_s4 + $0x30] sm:$0xff] }
  0x13   :  { %v45_v9 = vunpack.c.l.bf16 %v28_v55  ;;  %v50_v10 = vunpack.c.l.bf16 %v31_v60  ;;  %v79_v11 = vpack.c.bf16 %v69_v3, %v64_v2  ;;  %v63_v12 = vmax.f32 %v43_v4, 0.0  ;;  %v554_v43 = vld [vmem:[%s1316_s4 + $0x38] sm:$0xff]  ;;  %v555_v45 = vld [vmem:[%s1316_s4 + $0x40] sm:$0xff]  ;;  %v556_v46 = vld [vmem:[%s1316_s4 + $0x48] sm:$0xff] }
  0x14   :  { %825 = vmatpush3.bf16.msra.mxu0 %v1063_v18  ;;  %410 = vmatprep.mubr.bf16.mxu0 %v74_v56  ;;  %v68_v13 = vmax.f32 %v48_v5, 0.0  ;;  %v37_v14 = vunpack.c.l.bf16 %v23_v6  ;;  %v81_v16 = vpack.c.bf16 %v71_v8, %v66_v7  ;;  %v995_v34 = vpack.c.bf16 %v548_v33, %v547_v32  ;;  %v557_v48 = vld [vmem:[%s1316_s4 + $0x50] sm:$0xff]  ;;  %v559_v51 = vld [vmem:[%s1316_s4 + $0x60] sm:$0xff]  ;;  %v560_v52 = vld [vmem:[%s1316_s4 + $0x68] sm:$0xff] }
  0x15   :  { %853 = vmatpush3.bf16.msra.mxu1 %v1064_v19  ;;  %826 = vmatprep.subr.bf16.mxu0 %v1065_v20  ;;  %v65_v17 = vmax.f32 %v45_v9, 0.0  ;;  %v70_v18 = vmax.f32 %v50_v10, 0.0  ;;  %v1079_v19 = vld [vmem:[%s1314_s1 + $0x110] sm:$0xff]   ;;  %v42_v20 = vunpack.c.h.bf16 %v23_v6  ;;  %v998_v38 = vpack.c.bf16 %v550_v37, %v549_v36  ;;  %v562_v55 = vld [vmem:[%s1316_s4 + $0x78] sm:$0xff] }
  0x16   :  { %854 = vmatprep.subr.bf16.mxu1 %v1066_v21  ;;  %459 = vmatprep.mubr.bf16.mxu1 %v76_v61  ;;  %v57_v21 = vmax.f32 %v37_v14, 0.0  ;;  %v1001_v41 = vpack.c.bf16 %v552_v40, %v551_v39  ;;  %v1007_v47 = vpack.c.bf16 %v556_v46, %v555_v45  ;;  %v1010_v50 = vpack.c.bf16 %v558_v49, %v557_v48  ;;  %v561_v54 = vld [vmem:[%s1316_s4 + $0x70] sm:$0xff] }
  0x17   :  { %v1013_v53 = vpack.c.bf16 %v560_v52, %v559_v51  ;;  %v1016_v56 = vpack.c.bf16 %v562_v55, %v561_v54 }
  0x18   :  { %827 = vmatpush3.bf16.msra.mxu0 %v1067_v22  ;;  %v78_v22 = vpack.c.bf16 %v68_v13, %v63_v12 }
  0x19   :  { %855 = vmatpush3.bf16.msra.mxu1 %v1068_v23  ;;  %828 = vmatprep.subr.bf16.mxu0 %v1069_v24  ;;  %v62_v23 = vmax.f32 %v42_v20, 0.0  ;;  %v47_v24 = vunpack.c.l.bf16 %v29_v15 }
  0x1a   :  { %856 = vmatprep.subr.bf16.mxu1 %v1070_v25  ;;  %v52_v25 = vunpack.c.h.bf16 %v29_v15 }
  0x1c   :  { %829 = vmatpush3.bf16.msra.mxu0 %v1071_v26  ;;  %v80_v26 = vpack.c.bf16 %v70_v18, %v65_v17 }
  0x1d   :  { %857 = vmatpush3.bf16.msra.mxu1 %v1072_v27  ;;  %830 = vmatprep.subr.bf16.mxu0 %v1073_v28  ;;  %v1080_v27 = vld [vmem:[%s1314_s1 + $0x118] sm:$0xff]   ;;  %v77_v28 = vpack.c.bf16 %v62_v23, %v57_v21 }
  0x1e   :  { %858 = vmatprep.subr.bf16.mxu1 %v1074_v29  ;;  %v67_v29 = vmax.f32 %v47_v24, 0.0 }
  0x20   :  { %831 = vmatpush3.bf16.msra.mxu0 %v1075_v30  ;;  %v72_v30 = vmax.f32 %v52_v25, 0.0 }
  0x21   :  { %859 = vmatpush3.bf16.msra.mxu1 %v1076_v31  ;;  %912 = vmatprep.subr.bf16.mxu0 %v1077_v44 }
  0x22   :  { %v82_v31 = vpack.c.bf16 %v72_v30, %v67_v29  ;;  %994 = vmatprep.subr.bf16.mxu1 %v1083_v35 }
  0x23   :  { %411 = vmatmul.mubr.bf16.vlgmr.msra.gmra.mrb[0].mxu0 %v73_v57  ;;  %v1085_v57 = vmov 0.0  }
  0x24   :  { %460 = vmatmul.mubr.bf16.vlgmr.msra.gmra.mrb[0].mxu1 %v75_v62  ;;  %913 = vmatpush3.bf16.msra.mxu0 %v1077_v44  ;;  %v1004_v44 = vpack.c.bf16 %v554_v43, %v553_v42 }
  0x25   :  { %914 = vmatprep.subr.bf16.mxu0 %v1078_v63  ;;  %418 = vmatprep.mubr.bf16.mxu0 %v79_v11 }
  0x26   :  { %467 = vmatprep.mubr.bf16.mxu1 %v81_v16  ;;  %996 = vmatpush3.bf16.msra.mxu1 %v995_v34 }
  0x27   :  { %997 = vmatprep.subr.bf16.mxu1 %v1083_v35 }
  0x28   :  { %915 = vmatpush3.bf16.msra.mxu0 %v1078_v63 }
  0x29   :  { %916 = vmatprep.subr.bf16.mxu0 %v1079_v19 }
  0x2a   :  { %999 = vmatpush3.bf16.msra.mxu1 %v998_v38 }
  0x2b   :  { %419 = vmatmul.mubr.bf16.gmra.mrb[4].mxu0 %v78_v22  ;;  %1000 = vmatprep.subr.bf16.mxu1 %v1083_v35 }
  0x2c   :  { %468 = vmatmul.mubr.bf16.gmra.mrb[4].mxu1 %v80_v26  ;;  %917 = vmatpush3.bf16.msra.mxu0 %v1079_v19 }
  0x2d   :  { %918 = vmatprep.subr.bf16.mxu0 %v1080_v27  ;;  %920 = vmatprep.mubr.msk.bf16.mxu0 %vm371_vm0, %v77_v28 }
  0x2e   :  { %1002 = vmatpush3.bf16.msra.mxu1 %v1001_v41  ;;  %956 = vmatprep.mubr.msk.f32.mxu1 %vm1084_vm1, %v1085_v57 }
  0x2f   :  { %1003 = vmatprep.subr.bf16.mxu1 %v1083_v35 }
  0x30   :  { %919 = vmatpush3.bf16.msra.mxu0 %v1080_v27 }
  0x31   :  { %1018 = vmatprep.subr.bf16.mxu0 %v1083_v35 }
  0x32   :  { %1005 = vmatpush3.bf16.msra.mxu1 %v1004_v44 }
  0x33   :  { %921 = vmatmul.mubr.msk.bf16.vlgmr.msra.gmra.mrb[8].mxu0 %vm371_vm0, %v82_v31  ;;  %1006 = vmatprep.subr.bf16.mxu1 %v1083_v35 }
  0x34   :  { %1020 = vmatpush3.bf16.msra.mxu0 %v995_v34  ;;  %991 = vmatprep.mubr.msk.f32.mxu0 %vm1084_vm1, %v1085_v57 }
  0x35   :  { %1021 = vmatprep.subr.bf16.mxu0 %v1083_v35 }
  0x36   :  { %1008 = vmatpush3.bf16.msra.mxu1 %v1007_v47 }
  0x37   :  { %1009 = vmatprep.subr.bf16.mxu1 %v1083_v35 }
  0x38   :  { %1023 = vmatpush3.bf16.msra.mxu0 %v998_v38 }
  0x39   :  { %1024 = vmatprep.subr.bf16.mxu0 %v1083_v35 }
  0x3a   :  { %1011 = vmatpush3.bf16.msra.mxu1 %v1010_v50 }
  0x3b   :  { %1012 = vmatprep.subr.bf16.mxu1 %v1083_v35 }
  0x3c   :  { %1026 = vmatpush3.bf16.msra.mxu0 %v1001_v41 }
  0x3d   :  { %1027 = vmatprep.subr.bf16.mxu0 %v1083_v35 }
  0x3e   :  { %1014 = vmatpush3.bf16.msra.mxu1 %v1013_v53 }
  0x3f   :  { %1015 = vmatprep.subr.bf16.mxu1 %v1083_v35 }
  0x40   :  { %1029 = vmatpush3.bf16.msra.mxu0 %v1004_v44 }
  0x41   :  { %1030 = vmatprep.subr.bf16.mxu0 %v1083_v35 }
  0x42   :  { %1017 = vmatpush3.bf16.msra.mxu1 %v1016_v56 }
  0x44   :  { %1032 = vmatpush3.bf16.msra.mxu0 %v1007_v47 }
  0x45   :  { %1033 = vmatprep.subr.bf16.mxu0 %v1083_v35 }
  0x48   :  { %1035 = vmatpush3.bf16.msra.mxu0 %v1010_v50 }
  0x49   :  { %1036 = vmatprep.subr.bf16.mxu0 %v1083_v35 }
  0x4c   :  { %1038 = vmatpush3.bf16.msra.mxu0 %v1013_v53 }
  0x4d   :  { %1039 = vmatprep.subr.bf16.mxu0 %v1083_v35 }
  0x50   :  { %1041 = vmatpush3.bf16.msra.mxu0 %v1016_v56 }
  0xf6   :  { %v832_v58 = vpop.f32.mrb[0].mxu0 }
  0xf7   :  { %v860_v59 = vpop.f32.mrb[0].mxu1  ;;  %v833_v60 = vpop.f32.mrb[1].mxu0 }
  0xf8   :  { %v834_v61 = vadd.f32 %v833_v60, %v832_v58  ;;  %v861_v62 = vpop.f32.mrb[1].mxu1  ;;  %v835_v63 = vpop.f32.mrb[2].mxu0 }
  0xf9   :  { %v862_v0 = vadd.f32 %v861_v62, %v860_v59  ;;  %v863_v1 = vpop.f32.mrb[2].mxu1  ;;  %v836_v2 = vpop.f32.mrb[3].mxu0  ;;  %v713_v62 = vlaneseq }
  0xfa   :  { %v837_v3 = vadd.f32 %v836_v2, %v835_v63  ;;  %v864_v4 = vpop.f32.mrb[3].mxu1 }
  0xfb   :  { %v865_v5 = vadd.f32 %v864_v4, %v863_v1  ;;  %v462_v6 = vadd.f32 %v862_v0, %v834_v61  ;;  %v714_v63 = vshrl.u32 %v713_v62, 7  ;;  %v708_v0 = vld [vmem:[%s1317_s2] sm:$0x1] }
  0xfd   :  { %v465_v7 = vadd.f32 %v865_v5, %v837_v3  ;;  %v715_v1 = vsub.s32 0, %v714_v63  ;;  %v722_v5 = vld [vmem:[%s1318_s3] sm:$0x1] }
  0xfe   :  { %v838_v8 = vpop.f32.mrb[4].mxu0 }
  0xff   :  { %v866_v9 = vpop.f32.mrb[4].mxu1  ;;  %v839_v10 = vpop.f32.mrb[5].mxu0 }
 0x100   :  { %v840_v11 = vadd.f32 %v839_v10, %v838_v8  ;;  %v867_v12 = vpop.f32.mrb[5].mxu1  ;;  %v841_v13 = vpop.f32.mrb[6].mxu0 }
 0x101   :  { %v868_v14 = vadd.f32 %v867_v12, %v866_v9  ;;  %v869_v15 = vpop.f32.mrb[6].mxu1  ;;  %v842_v16 = vpop.f32.mrb[7].mxu0 }
 0x102   :  { %v843_v17 = vadd.f32 %v842_v16, %v841_v13  ;;  %v870_v18 = vpop.f32.mrb[7].mxu1 }
 0x103   :  { %v871_v19 = vadd.f32 %v870_v18, %v869_v15  ;;  %v470_v20 = vadd.f32 %v868_v14, %v840_v11 }
 0x105   :  { %v473_v21 = vadd.f32 %v871_v19, %v843_v17 }
 0x106   :  { %v922_v22 = vpop.f32.mrb[8].mxu0 }
 0x107   :  { %v519_v23 = vadd.f32 %v922_v22, %v470_v20  ;;  %v510_v24 = vpop.f32.mrb[9].mxu0 }
 0x108   :  { %v511_v25 = vadd.f32 %v510_v24, %v462_v6  ;;  %v923_v26 = vpop.f32.mrb[10].mxu0 }
 0x109   :  { %v522_v27 = vadd.f32 %v923_v26, %v473_v21  ;;  %v513_v28 = vpop.f32.mrb[11].mxu0  ;;  %v536_v33 = vmul.f32 %v519_v23, %v519_v23 }
 0x10a   :  { %v514_v29 = vadd.f32 %v513_v28, %v465_v7  ;;  %v534_v30 = vmul.f32 %v511_v25, %v511_v25 }
 0x10b   :  { %v537_v36 = vmul.f32 %v522_v27, %v522_v27 }
 0x10c   :  { %v525_v31 = vadd.f32 %v514_v29, %v511_v25  ;;  %v535_v32 = vmul.f32 %v514_v29, %v514_v29 }
 0x10e   :  { %v526_v34 = vadd.f32 %v525_v31, %v519_v23  ;;  %v538_v35 = vadd.f32 %v535_v32, %v534_v30 }
 0x110   :  { %v527_v37 = vadd.f32 %v526_v34, %v522_v27  ;;  %v539_v38 = vadd.f32 %v538_v35, %v536_v33 }
 0x112   :  { %v528_v39 = vrot.slane %v527_v37, 4  ;;  %v540_v40 = vadd.f32 %v539_v38, %v537_v36 }
 0x114   :  { %v529_v41 = vadd.f32 %v528_v39, %v527_v37  ;;  %v541_v42 = vrot.slane %v540_v40, 4 }
 0x116   :  { %v530_v43 = vrot.slane %v529_v41, 2  ;;  %v542_v44 = vadd.f32 %v541_v42, %v540_v40 }
 0x118   :  { %v531_v45 = vadd.f32 %v530_v43, %v529_v41  ;;  %v543_v46 = vrot.slane %v542_v44, 2 }
 0x11a   :  { %v532_v47 = vrot.slane %v531_v45, 1  ;;  %v544_v48 = vadd.f32 %v543_v46, %v542_v44 }
 0x11c   :  { %v533_v49 = vadd.f32 %v532_v47, %v531_v45  ;;  %v545_v50 = vrot.slane %v544_v48, 1 }
 0x11e   :  { %957 = vmatmul.mubr.f32.vlgmr.msra.gmra.mrb[8].mxu1 %v533_v49  ;;  %v546_v51 = vadd.f32 %v545_v50, %v544_v48 }
 0x120   :  { %992 = vmatmul.mubr.f32.vlgmr.msra.gmra.mrb[12].mxu0 %v546_v51 }
 0x1f1   :  { %v629_v52 = vpop.f32.mrb[8].mxu1 }
 0x1f2   :  { %v703_v53 = vmul.f32 0.0078125, %v629_v52  ;;  %v958_v54 = vpop.f32.mrb[9].mxu1 }
 0x1f3   :  { %v699_v55 = vpop.f32.mrb[12].mxu0 }
 0x1f4   :  { %v705_v56 = vmul.f32 %v703_v53, %v703_v53  ;;  %v704_v57 = vmul.f32 0.0078125, %v699_v55  ;;  %v993_v58 = vpop.f32.mrb[13].mxu0 }
 0x1f6   :  { %v706_v59 = vsub.f32 %v704_v57, %v705_v56 }
 0x1f8   :  { %v707_v60 = vmax.f32 %v706_v59, 0.0 }
 0x1fa   :  { %v709_v61 = vadd.f32 1e-05, %v707_v60 }
 0x1fc   :  { %1081 = vrsqrt.f32 %v709_v61 }
 0x206   :  { %v1082_v2 = vpop.eup %1081 }
 0x207   :  { %v711_v3 = vmul.f32 %v1082_v2, %v708_v0 }
 0x209   :  { %v716_v4 = vrot.slane %v711_v3, %v715_v1  ;;  %v723_v6 = vmul.f32 %v711_v3, %v703_v53 }
 0x20b   :  { %v724_v7 = vsub.f32 %v722_v5, %v723_v6  ;;  %v718_v8 = vmul.f32 %v716_v4, %v511_v25  ;;  %v719_v9 = vmul.f32 %v716_v4, %v514_v29  ;;  %v720_v10 = vmul.f32 %v716_v4, %v519_v23 }
 0x20c   :  { %v721_v11 = vmul.f32 %v716_v4, %v522_v27 }
 0x20d   :  { %v729_v12 = vrot.slane %v724_v7, %v715_v1 }
 0x20f   :  { %v731_v13 = vadd.f32 %v729_v12, %v718_v8  ;;  %v732_v14 = vadd.f32 %v729_v12, %v719_v9  ;;  %v733_v15 = vadd.f32 %v729_v12, %v720_v10  ;;  %v734_v16 = vadd.f32 %v729_v12, %v721_v11 }
 0x211   :  { %v808_v17 = vpack.c.bf16 %v732_v14, %v731_v13  ;;  %v813_v18 = vpack.c.bf16 %v734_v16, %v733_v15 }
 0x213   :  { %809 = vst [vmem:[%s1319_s5] sm:$0xff] %v808_v17   ;;  %815 = vst [vmem:[%s1319_s5 + $0x8] sm:$0xff] %v813_v18  }

// kernel: tile.78
= control target key start
LH: loop header
LB: loop body
LE: loop exit
PB: predicated region body
PF: predicated region fallthrough
CT: control target
= control target key end

     0   :  { %s22_s0 = inlined_call_operand.vmem [shape: f32[8], index: 0, kind: input, shape index: {}]   ;;  %s23_s1 = inlined_call_operand.vmem [shape: f32[4,8], index: 1, kind: output, shape index: {}]  }
   0x1   :  { %v4_v0 = vld [vmem:[%s22_s0] ss:$0 sm:$0xff] }
   0x2   :  { %5 = vst [vmem:[%s23_s1] sm:$0xf] %v4_v0 }

// kernel: tile.79
= control target key start
LH: loop header
LB: loop body
LE: loop exit
PB: predicated region body
PF: predicated region fallthrough
CT: control target
= control target key end

     0   :  { %vm7_vm0 = vcmask 64512   ;;  %s37_s8 = smov 8   ;;  %s38_s9 = smov 16   ;;  %vm13_vm1 = vcmask 261312   ;;  %vm19_vm2 = vcmask 195712   ;;  %vm25_vm3 = vcmask 130112   ;;  %s55_s0 = inlined_call_operand.vmem [shape: f32[4,8], index: 0, kind: input, shape index: {}]   ;;  %s56_s1 = inlined_call_operand.vmem [shape: f32[32], index: 1, kind: output, shape index: {}]  }
   0x1   :  { %v4_v0 = vld [vmem:[%s55_s0] sm:$0xf]  ;;  %s36_s0 = smov 24  }
   0x2   :  { %5 = vst [vmem:[#allocation1] sm:$0xf] %v4_v0 }
   0x9   :  { %v10_v1 = vld [vmem:[#allocation1 + $0x3] sm:$0x1]   ;;  %v22_v2 = vld [vmem:[#allocation1 + $0x1] sm:$0x1]   ;;  %v6_v3 = vld [vmem:[#allocation1] sm:$0x1]  }
   0xa   :  { %11 = vrot.lane.b32.xlu0 %v10_v1, %s36_s0  ;;  %23 = vrot.lane.b32.xlu1 %v22_v2, %s37_s8  ;;  %v16_v4 = vld [vmem:[#allocation1 + $0x2] sm:$0x1]   ;;  %8 = vst.msk [vmem:[#allocation0] sm:$0x1] %vm7_vm0, %v6_v3  }
   0xe   :  { %17 = vrot.lane.b32.xlu0 %v16_v4, %s38_s9 }
  0x7c   :  { %v12_v5 = vpop.permute.xlu0 %11   ;;  %v24_v6 = vpop.permute.xlu1 %23  }
  0x7d   :  { %14 = vst.msk [vmem:[#allocation0] sm:$0x1] %vm13_vm1, %v12_v5  }
  0x80   :  { %v18_v7 = vpop.permute.xlu0 %17  }
  0x81   :  { %20 = vst.msk [vmem:[#allocation0] sm:$0x1] %vm19_vm2, %v18_v7  }
  0x82   :  { %26 = vst.msk [vmem:[#allocation0] sm:$0x1] %vm25_vm3, %v24_v6  }
  0x89   :  { %v30_v8 = vld [vmem:[#allocation0] sm:$0x1] }
  0x8a   :  { %32 = vst [vmem:[%s56_s1] sm:$0x1] %v30_v8 }

// kernel: unet_forward.18
= control target key start
LH: loop header
LB: loop body
LE: loop exit
PB: predicated region body
PF: predicated region fallthrough
CT: control target
= control target key end

     0   :  { %vm317_vm0 = vcmask 261120   ;;  %vm1265_vm1 = vmmov 0   ;;  %s1663_s1 = inlined_call_operand.vmem [shape: bf16[288,128], index: 1, kind: input, shape index: {}]   ;;  %s1664_s0 = inlined_call_operand.vmem [shape: bf16[128,288], index: 0, kind: input, shape index: {}]   ;;  %s1665_s4 = inlined_call_operand.vmem [shape: f32[128,128], index: 4, kind: input, shape index: {}]   ;;  %s1666_s2 = inlined_call_operand.vmem [shape: f32[1,128], index: 2, kind: input, shape index: {}]   ;;  %s1667_s3 = inlined_call_operand.vmem [shape: f32[1,128], index: 3, kind: input, shape index: {}]   ;;  %s1668_s5 = inlined_call_operand.vmem [shape: bf16[128,128], index: 5, kind: output, shape index: {}]  }
   0x1   :  { %v1244_v0 = vld [vmem:[%s1663_s1 + $0x40] sm:$0xff]   ;;  %v1246_v2 = vld [vmem:[%s1663_s1 + $0x48] sm:$0xff]   ;;  %v1248_v4 = vld [vmem:[%s1663_s1 + $0x50] sm:$0xff]  }
   0x2   :  { %v1245_v1 = vld [vmem:[%s1663_s1] sm:$0xff]   ;;  %995 = vmatprep.subr.bf16.mxu0 %v1244_v0  ;;  %v1247_v3 = vld [vmem:[%s1663_s1 + $0x8] sm:$0xff]   ;;  %v1249_v5 = vld [vmem:[%s1663_s1 + $0x10] sm:$0xff]  }
   0x3   :  { %996 = vmatpush3.bf16.msra.mxu0 %v1245_v1  ;;  %v1250_v6 = vld [vmem:[%s1663_s1 + $0x58] sm:$0xff]   ;;  %v1252_v8 = vld [vmem:[%s1663_s1 + $0x60] sm:$0xff]   ;;  %v1254_v11 = vld [vmem:[%s1663_s1 + $0x68] sm:$0xff]  }
   0x4   :  { %997 = vmatprep.subr.bf16.mxu0 %v1246_v2  ;;  %v1251_v7 = vld [vmem:[%s1663_s1 + $0x18] sm:$0xff]   ;;  %v1258_v9 = vld [vmem:[%s1663_s1 + $0x80] sm:$0xff]   ;;  %v1261_v12 = vld [vmem:[%s1663_s1 + $0x88] sm:$0xff]  }
   0x5   :  { %v1253_v10 = vld [vmem:[%s1663_s1 + $0x20] sm:$0xff]   ;;  %1103 = vmatprep.subr.bf16.mxu1 %v1258_v9  ;;  %v23_v14 = vld [vmem:[%s1664_s0 + $0xc] sm:$0xff]  ;;  %v22_v15 = vld [vmem:[%s1664_s0 + $0x8] ss:$12 sps:$4 sm:$0xff]  }
   0x6   :  { %1104 = vmatpush3.bf16.msra.mxu1 %v1258_v9  ;;  %v21_v13 = vld [vmem:[%s1664_s0] sm:$0xff]  ;;  %v1255_v16 = vld [vmem:[%s1663_s1 + $0x28] sm:$0xff]   ;;  %v57_v18 = vunpack.c.h.bf16 %v23_v14  ;;  %v1256_v20 = vld [vmem:[%s1663_s1 + $0x70] sm:$0xff]   ;;  %v55_v21 = vunpack.c.l.bf16 %v22_v15  ;;  %v58_v22 = vunpack.c.h.bf16 %v22_v15  ;;  %v56_v28 = vunpack.c.l.bf16 %v23_v14 }
   0x7   :  { %998 = vmatpush3.bf16.msra.mxu0 %v1247_v3  ;;  %1105 = vmatprep.subr.bf16.mxu1 %v1261_v12  ;;  %v54_v17 = vunpack.c.h.bf16 %v21_v13  ;;  %v26_v19 = vld [vmem:[%s1664_s0 + $0x20] ss:$12 sps:$4 sm:$0xff]   ;;  %v25_v25 = vld [vmem:[%s1664_s0 + $0x18] sm:$0xff]  ;;  %v27_v26 = vld [vmem:[%s1664_s0 + $0x24] sm:$0xff]  ;;  %v53_v27 = vunpack.c.l.bf16 %v21_v13 }
   0x8   :  { %999 = vmatprep.subr.bf16.mxu0 %v1248_v4  ;;  %v61_v23 = vunpack.c.l.bf16 %v26_v19  ;;  %v64_v24 = vunpack.c.h.bf16 %v26_v19  ;;  %v105_v30 = vmax.f32 %v57_v18, 0.0  ;;  %v103_v31 = vmax.f32 %v55_v21, 0.0  ;;  %v1257_v35 = vld [vmem:[%s1663_s1 + $0x30] sm:$0xff]   ;;  %v1259_v39 = vld [vmem:[%s1663_s1 + $0x78] sm:$0xff]   ;;  %v42_v4 = vld [vmem:[%s1664_s0 + $0x80] ss:$12 sps:$4 sm:$0xff]  }
   0x9   :  { %v102_v29 = vmax.f32 %v54_v17, 0.0  ;;  %v106_v32 = vmax.f32 %v58_v22, 0.0  ;;  %v60_v37 = vunpack.c.h.bf16 %v25_v25  ;;  %v63_v38 = vunpack.c.h.bf16 %v27_v26  ;;  %v30_v42 = vld [vmem:[%s1664_s0 + $0x38] ss:$12 sps:$4 sm:$0xff]   ;;  %v34_v45 = vld [vmem:[%s1664_s0 + $0x50] ss:$12 sps:$4 sm:$0xff]  }
   0xa   :  { %1106 = vmatpush3.bf16.msra.mxu1 %v1261_v12  ;;  %v109_v33 = vmax.f32 %v61_v23, 0.0  ;;  %v112_v34 = vmax.f32 %v64_v24, 0.0  ;;  %v101_v43 = vmax.f32 %v53_v27, 0.0  ;;  %v104_v44 = vmax.f32 %v56_v28, 0.0  ;;  %v1260_v46 = vld [vmem:[%s1663_s1 + $0x38] sm:$0xff]   ;;  %v29_v49 = vld [vmem:[%s1664_s0 + $0x30] sm:$0xff] }
   0xb   :  { %1000 = vmatpush3.bf16.msra.mxu0 %v1249_v5  ;;  %v150_v36 = vpack.c.bf16 %v105_v30, %v102_v29  ;;  %v151_v40 = vpack.c.bf16 %v106_v32, %v103_v31  ;;  %v108_v47 = vmax.f32 %v60_v37, 0.0  ;;  %v111_v48 = vmax.f32 %v63_v38, 0.0  ;;  %v31_v51 = vld [vmem:[%s1664_s0 + $0x3c] sm:$0xff]  ;;  %v38_v2 = vld [vmem:[%s1664_s0 + $0x68] ss:$12 sps:$4 sm:$0xff]  }
   0xc   :  { %1001 = vmatprep.subr.bf16.mxu0 %v1250_v6  ;;  %v154_v41 = vpack.c.bf16 %v112_v34, %v109_v33  ;;  %v67_v50 = vunpack.c.l.bf16 %v30_v42  ;;  %v70_v52 = vunpack.c.h.bf16 %v30_v42  ;;  %v149_v53 = vpack.c.bf16 %v104_v44, %v101_v43  ;;  %v35_v12 = vld [vmem:[%s1664_s0 + $0x54] sm:$0xff]  ;;  %v50_v30 = vld [vmem:[%s1664_s0 + $0xb0] ss:$12 sps:$4 sm:$0xff]  }
   0xd   :  { %374 = vmatprep.mubr.bf16.mxu0 %v150_v36  ;;  %1107 = vmatprep.mubr.msk.bf16.mxu1 %vm317_vm0, %v151_v40  ;;  %v73_v55 = vunpack.c.l.bf16 %v34_v45  ;;  %v76_v56 = vunpack.c.h.bf16 %v34_v45  ;;  %v59_v57 = vunpack.c.l.bf16 %v25_v25  ;;  %v62_v58 = vunpack.c.l.bf16 %v27_v26  ;;  %v46_v26 = vld [vmem:[%s1664_s0 + $0x98] ss:$12 sps:$4 sm:$0xff]   ;;  %v39_v36 = vld [vmem:[%s1664_s0 + $0x6c] sm:$0xff] }
   0xe   :  { %1108 = vmatmul.mubr.msk.bf16.vlgmr.msra.gmra.mrb[0].mxu1 %vm317_vm0, %v154_v41  ;;  %v115_v54 = vmax.f32 %v67_v50, 0.0  ;;  %v66_v59 = vunpack.c.h.bf16 %v29_v49  ;;  %v118_v60 = vmax.f32 %v70_v52, 0.0  ;;  %v153_v61 = vpack.c.bf16 %v111_v48, %v108_v47 }
   0xf   :  { %1002 = vmatpush3.bf16.msra.mxu0 %v1251_v7  ;;  %v69_v62 = vunpack.c.h.bf16 %v31_v51  ;;  %v121_v63 = vmax.f32 %v73_v55, 0.0  ;;  %v124_v0 = vmax.f32 %v76_v56, 0.0  ;;  %v107_v5 = vmax.f32 %v59_v57, 0.0  ;;  %v41_v55 = vld [vmem:[%s1664_s0 + $0x78] sm:$0xff]  ;;  %v43_v56 = vld [vmem:[%s1664_s0 + $0x84] sm:$0xff] }
  0x10   :  { %1003 = vmatprep.subr.bf16.mxu0 %v1252_v8  ;;  %v157_v1 = vpack.c.bf16 %v118_v60, %v115_v54  ;;  %v110_v6 = vmax.f32 %v62_v58, 0.0  ;;  %v114_v7 = vmax.f32 %v66_v59, 0.0  ;;  %v79_v9 = vunpack.c.l.bf16 %v38_v2 }
  0x11   :  { %v160_v3 = vpack.c.bf16 %v124_v0, %v121_v63  ;;  %v117_v8 = vmax.f32 %v69_v62, 0.0  ;;  %v85_v13 = vunpack.c.l.bf16 %v42_v4  ;;  %v88_v14 = vunpack.c.h.bf16 %v42_v4  ;;  %v47_v4 = vld [vmem:[%s1664_s0 + $0x9c] sm:$0xff] }
  0x12   :  { %1111 = vmatprep.mubr.msk.bf16.mxu1 %vm317_vm0, %v157_v1  ;;  %v65_v15 = vunpack.c.l.bf16 %v29_v49  ;;  %v127_v17 = vmax.f32 %v79_v9, 0.0  ;;  %v152_v19 = vpack.c.bf16 %v110_v6, %v107_v5  ;;  %v75_v24 = vunpack.c.h.bf16 %v35_v12 }
  0x13   :  { %1004 = vmatpush3.bf16.msra.mxu0 %v1253_v10  ;;  %v82_v10 = vunpack.c.h.bf16 %v38_v2  ;;  %v136_v21 = vmax.f32 %v88_v14, 0.0  ;;  %v156_v22 = vpack.c.bf16 %v117_v8, %v114_v7  ;;  %v91_v31 = vunpack.c.l.bf16 %v46_v26 }
  0x14   :  { %1005 = vmatprep.subr.bf16.mxu0 %v1254_v11  ;;  %v33_v11 = vld [vmem:[%s1664_s0 + $0x48] sm:$0xff]  ;;  %v113_v28 = vmax.f32 %v65_v15, 0.0  ;;  %v123_v33 = vmax.f32 %v75_v24, 0.0  ;;  %v94_v34 = vunpack.c.h.bf16 %v46_v26  ;;  %v97_v38 = vunpack.c.l.bf16 %v50_v30 }
  0x15   :  { %v130_v18 = vmax.f32 %v82_v10, 0.0  ;;  %v72_v23 = vunpack.c.h.bf16 %v33_v11  ;;  %v139_v37 = vmax.f32 %v91_v31, 0.0  ;;  %v71_v42 = vunpack.c.l.bf16 %v33_v11  ;;  %v49_v15 = vld [vmem:[%s1664_s0 + $0xa8] sm:$0xff] }
  0x16   :  { %1112 = vmatmul.mubr.msk.bf16.gmra.mrb[4].mxu1 %vm317_vm0, %v160_v3  ;;  %v142_v41 = vmax.f32 %v94_v34, 0.0  ;;  %v74_v43 = vunpack.c.l.bf16 %v35_v12  ;;  %v145_v44 = vmax.f32 %v97_v38, 0.0  ;;  %v81_v48 = vunpack.c.h.bf16 %v39_v36  ;;  %v45_v3 = vld [vmem:[%s1664_s0 + $0x90] sm:$0xff]  ;;  %v594_v34 = vld [vmem:[%s1665_s4] sm:$0xff] }
  0x17   :  { %1006 = vmatpush3.bf16.msra.mxu0 %v1255_v16  ;;  %v68_v16 = vunpack.c.l.bf16 %v31_v51  ;;  %v163_v25 = vpack.c.bf16 %v130_v18, %v127_v17  ;;  %v120_v32 = vmax.f32 %v72_v23, 0.0  ;;  %v119_v51 = vmax.f32 %v71_v42, 0.0  ;;  %v596_v38 = vld [vmem:[%s1665_s4 + $0x10] sm:$0xff]  ;;  %v599_v42 = vld [vmem:[%s1665_s4 + $0x28] sm:$0xff] }
  0x18   :  { %1007 = vmatprep.subr.bf16.mxu0 %v1256_v20  ;;  %v133_v20 = vmax.f32 %v85_v13, 0.0  ;;  %v169_v49 = vpack.c.bf16 %v142_v41, %v139_v37  ;;  %v122_v52 = vmax.f32 %v74_v43, 0.0  ;;  %v129_v54 = vmax.f32 %v81_v48, 0.0  ;;  %v598_v41 = vld [vmem:[%s1665_s4 + $0x20] sm:$0xff]  ;;  %v603_v48 = vld [vmem:[%s1665_s4 + $0x48] sm:$0xff] }
  0x19   :  { %v116_v29 = vmax.f32 %v68_v16, 0.0  ;;  %1115 = vmatprep.mubr.msk.bf16.mxu1 %vm317_vm0, %v163_v25  ;;  %v80_v59 = vunpack.c.l.bf16 %v39_v36  ;;  %v87_v62 = vunpack.c.h.bf16 %v43_v56  ;;  %v83_v6 = vunpack.c.l.bf16 %v41_v55  ;;  %v51_v16 = vld [vmem:[%s1664_s0 + $0xb4] sm:$0xff] }
  0x1a   :  { %v166_v27 = vpack.c.bf16 %v136_v21, %v133_v20  ;;  %v158_v57 = vpack.c.bf16 %v122_v52, %v119_v51  ;;  %v86_v7 = vunpack.c.l.bf16 %v43_v56  ;;  %v90_v9 = vunpack.c.h.bf16 %v45_v3  ;;  %v605_v51 = vld [vmem:[%s1665_s4 + $0x58] sm:$0xff]  ;;  %v608_v56 = vld [vmem:[%s1665_s4 + $0x70] sm:$0xff] }
  0x1b   :  { %1008 = vmatpush3.bf16.msra.mxu0 %v1257_v35  ;;  %v37_v35 = vld [vmem:[%s1664_s0 + $0x60] sm:$0xff]  ;;  %v155_v40 = vpack.c.bf16 %v116_v29, %v113_v28  ;;  %v128_v0 = vmax.f32 %v80_v59, 0.0  ;;  %v135_v2 = vmax.f32 %v87_v62, 0.0  ;;  %v93_v10 = vunpack.c.h.bf16 %v47_v4 }
  0x1c   :  { %1009 = vmatprep.subr.bf16.mxu0 %v1259_v39  ;;  %v100_v39 = vunpack.c.h.bf16 %v50_v30  ;;  %v78_v47 = vunpack.c.h.bf16 %v37_v35  ;;  %v77_v58 = vunpack.c.l.bf16 %v37_v35  ;;  %v131_v11 = vmax.f32 %v83_v6, 0.0  ;;  %v595_v35 = vld [vmem:[%s1665_s4 + $0x8] sm:$0xff] }
  0x1d   :  { %v134_v12 = vmax.f32 %v86_v7, 0.0  ;;  %v138_v13 = vmax.f32 %v90_v9, 0.0  ;;  %v141_v14 = vmax.f32 %v93_v10, 0.0  ;;  %v89_v18 = vunpack.c.l.bf16 %v45_v3 }
  0x1e   :  { %1116 = vmatmul.mubr.msk.bf16.gmra.mrb[8].mxu1 %vm317_vm0, %v166_v27  ;;  %v148_v45 = vmax.f32 %v100_v39, 0.0  ;;  %v125_v63 = vmax.f32 %v77_v58, 0.0  ;;  %v96_v21 = vunpack.c.h.bf16 %v49_v15  ;;  %v95_v28 = vunpack.c.l.bf16 %v49_v15  ;;  %v597_v39 = vld [vmem:[%s1665_s4 + $0x18] sm:$0xff] }
  0x1f   :  { %1010 = vmatpush3.bf16.msra.mxu0 %v1260_v46  ;;  %v159_v46 = vpack.c.bf16 %v123_v33, %v120_v32  ;;  %1119 = vmatprep.mubr.msk.bf16.mxu1 %vm317_vm0, %v169_v49  ;;  %v164_v17 = vpack.c.bf16 %v134_v12, %v131_v11  ;;  %v168_v20 = vpack.c.bf16 %v141_v14, %v138_v13  ;;  %v137_v23 = vmax.f32 %v89_v18, 0.0 }
  0x20   :  { %v172_v50 = vpack.c.bf16 %v148_v45, %v145_v44  ;;  %v161_v5 = vpack.c.bf16 %v128_v0, %v125_v63  ;;  %v144_v25 = vmax.f32 %v96_v21, 0.0  ;;  %v98_v29 = vunpack.c.l.bf16 %v51_v16  ;;  %v600_v44 = vld [vmem:[%s1665_s4 + $0x30] sm:$0xff]  ;;  %v601_v45 = vld [vmem:[%s1665_s4 + $0x38] sm:$0xff] }
  0x21   :  { %v143_v31 = vmax.f32 %v95_v28, 0.0  ;;  %v1437_v36 = vpack.c.bf16 %v595_v35, %v594_v34  ;;  %v1264_v37 = vmov 0.0|0.0   ;;  %v1458_v43 = vpack.c.bf16 %v599_v42, %v598_v41 }
  0x22   :  { %375 = vmatmul.mubr.bf16.vlgmr.msra.gmra.mrb[0].mxu0 %v149_v53  ;;  %v126_v53 = vmax.f32 %v78_v47, 0.0  ;;  %v146_v32 = vmax.f32 %v98_v29, 0.0  ;;  %1193 = vmatprep.subr.bf16.mxu1 %v1264_v37  ;;  %v602_v47 = vld [vmem:[%s1665_s4 + $0x40] sm:$0xff]  ;;  %v1266_v59 = vmov 0.0  }
  0x23   :  { %382 = vmatprep.mubr.bf16.mxu0 %v153_v61  ;;  %v84_v61 = vunpack.c.h.bf16 %v41_v55  ;;  %1195 = vmatpush3.bf16.msra.mxu1 %v1437_v36  ;;  %v1478_v49 = vpack.c.bf16 %v603_v48, %v602_v47 }
  0x24   :  { %v162_v60 = vpack.c.bf16 %v129_v54, %v126_v53  ;;  %v170_v33 = vpack.c.bf16 %v146_v32, %v143_v31  ;;  %1196 = vmatprep.subr.bf16.mxu1 %v1264_v37  ;;  %v606_v53 = vld [vmem:[%s1665_s4 + $0x60] sm:$0xff]  ;;  %v607_v54 = vld [vmem:[%s1665_s4 + $0x68] sm:$0xff] }
  0x25   :  { %v132_v1 = vmax.f32 %v84_v61, 0.0  ;;  %v1498_v55 = vpack.c.bf16 %v607_v54, %v606_v53 }
  0x26   :  { %1120 = vmatmul.mubr.msk.bf16.gmra.mrb[12].mxu1 %vm317_vm0, %v172_v50  ;;  %v604_v50 = vld [vmem:[%s1665_s4 + $0x50] sm:$0xff] }
  0x27   :  { %v165_v8 = vpack.c.bf16 %v135_v2, %v132_v1  ;;  %v1488_v52 = vpack.c.bf16 %v605_v51, %v604_v50  ;;  %1155 = vmatprep.mubr.msk.f32.mxu1 %vm1265_vm1, %v1266_v59 }
  0x2a   :  { %383 = vmatmul.mubr.bf16.gmra.mrb[4].mxu0 %v152_v19  ;;  %v92_v19 = vunpack.c.l.bf16 %v47_v4 }
  0x2b   :  { %390 = vmatprep.mubr.bf16.mxu0 %v156_v22  ;;  %v99_v22 = vunpack.c.h.bf16 %v51_v16 }
  0x2c   :  { %v140_v24 = vmax.f32 %v92_v19, 0.0 }
  0x2d   :  { %v147_v26 = vmax.f32 %v99_v22, 0.0 }
  0x2e   :  { %v167_v27 = vpack.c.bf16 %v140_v24, %v137_v23 }
  0x2f   :  { %v171_v30 = vpack.c.bf16 %v147_v26, %v144_v25 }
  0x32   :  { %391 = vmatmul.mubr.bf16.gmra.mrb[8].mxu0 %v155_v40  ;;  %v1448_v40 = vpack.c.bf16 %v597_v39, %v596_v38 }
  0x33   :  { %398 = vmatprep.mubr.bf16.mxu0 %v159_v46  ;;  %v1468_v46 = vpack.c.bf16 %v601_v45, %v600_v44 }
  0x34   :  { %1198 = vmatpush3.bf16.msra.mxu1 %v1448_v40 }
  0x35   :  { %1199 = vmatprep.subr.bf16.mxu1 %v1264_v37 }
  0x38   :  { %1201 = vmatpush3.bf16.msra.mxu1 %v1458_v43 }
  0x39   :  { %1202 = vmatprep.subr.bf16.mxu1 %v1264_v37 }
  0x3a   :  { %399 = vmatmul.mubr.bf16.gmra.mrb[12].mxu0 %v158_v57  ;;  %v609_v57 = vld [vmem:[%s1665_s4 + $0x78] sm:$0xff] }
  0x3b   :  { %406 = vmatprep.mubr.bf16.mxu0 %v162_v60  ;;  %v1508_v58 = vpack.c.bf16 %v609_v57, %v608_v56 }
  0x3c   :  { %1204 = vmatpush3.bf16.msra.mxu1 %v1468_v46 }
  0x3d   :  { %1205 = vmatprep.subr.bf16.mxu1 %v1264_v37 }
  0x40   :  { %1207 = vmatpush3.bf16.msra.mxu1 %v1478_v49 }
  0x41   :  { %1208 = vmatprep.subr.bf16.mxu1 %v1264_v37 }
  0x42   :  { %407 = vmatmul.mubr.bf16.gmra.mrb[16].mxu0 %v161_v5 }
  0x43   :  { %414 = vmatprep.mubr.bf16.mxu0 %v165_v8 }
  0x44   :  { %1210 = vmatpush3.bf16.msra.mxu1 %v1488_v52 }
  0x45   :  { %1211 = vmatprep.subr.bf16.mxu1 %v1264_v37 }
  0x48   :  { %1213 = vmatpush3.bf16.msra.mxu1 %v1498_v55 }
  0x49   :  { %1214 = vmatprep.subr.bf16.mxu1 %v1264_v37 }
  0x4a   :  { %415 = vmatmul.mubr.bf16.gmra.mrb[20].mxu0 %v164_v17 }
  0x4b   :  { %422 = vmatprep.mubr.bf16.mxu0 %v168_v20 }
  0x4c   :  { %1216 = vmatpush3.bf16.msra.mxu1 %v1508_v58 }
  0x4d   :  { %1217 = vmatprep.subr.bf16.mxu1 %v1264_v37 }
  0x52   :  { %423 = vmatmul.mubr.bf16.gmra.mrb[24].mxu0 %v167_v27 }
  0x53   :  { %430 = vmatprep.mubr.bf16.mxu0 %v171_v30 }
  0x5a   :  { %431 = vmatmul.mubr.bf16.gmra.mrb[28].mxu0 %v170_v33 }
  0xe1   :  { %v1109_v60 = vpop.f32.mrb[0].mxu1 }
  0xe2   :  { %v473_v61 = vpop.f32.mrb[1].mxu1 }
  0xe3   :  { %v1110_v62 = vpop.f32.mrb[2].mxu1 }
  0xe4   :  { %v476_v63 = vpop.f32.mrb[3].mxu1 }
  0xe9   :  { %v1113_v2 = vpop.f32.mrb[4].mxu1 }
  0xea   :  { %v489_v5 = vpop.f32.mrb[5].mxu1 }
  0xeb   :  { %v1114_v7 = vpop.f32.mrb[6].mxu1 }
  0xec   :  { %v492_v10 = vpop.f32.mrb[7].mxu1 }
  0xf1   :  { %v1117_v14 = vpop.f32.mrb[8].mxu1 }
  0xf2   :  { %v505_v17 = vpop.f32.mrb[9].mxu1 }
  0xf3   :  { %v1118_v19 = vpop.f32.mrb[10].mxu1 }
  0xf4   :  { %v508_v22 = vpop.f32.mrb[11].mxu1 }
  0xf5   :  { %v1011_v0 = vpop.f32.mrb[0].mxu0 }
  0xf6   :  { %v1012_v1 = vpop.f32.mrb[1].mxu0 }
  0xf7   :  { %v1013_v3 = vadd.f32 %v1012_v1, %v1011_v0  ;;  %v1014_v4 = vpop.f32.mrb[2].mxu0 }
  0xf8   :  { %v1015_v6 = vpop.f32.mrb[3].mxu0 }
  0xf9   :  { %v1016_v8 = vadd.f32 %v1015_v6, %v1014_v4  ;;  %v1514_v9 = vadd.f32 %v1013_v3, %v473_v61  ;;  %v1522_v26 = vpop.f32.mrb[12].mxu1 }
  0xfa   :  { %v521_v29 = vpop.f32.mrb[13].mxu1 }
  0xfb   :  { %v1516_v11 = vadd.f32 %v1016_v8, %v476_v63  ;;  %v1524_v31 = vpop.f32.mrb[14].mxu1 }
  0xfc   :  { %v524_v34 = vpop.f32.mrb[15].mxu1 }
  0xfd   :  { %v1017_v12 = vpop.f32.mrb[4].mxu0  ;;  %v536_v38 = vadd.f32 %v1516_v11, %v1514_v9 }
  0xfe   :  { %v1018_v13 = vpop.f32.mrb[5].mxu0 }
  0xff   :  { %v1019_v15 = vadd.f32 %v1018_v13, %v1017_v12  ;;  %v1020_v16 = vpop.f32.mrb[6].mxu0 }
 0x100   :  { %v1021_v18 = vpop.f32.mrb[7].mxu0 }
 0x101   :  { %v1518_v20 = vadd.f32 %v1109_v60, %v1019_v15  ;;  %v1022_v21 = vadd.f32 %v1021_v18, %v1020_v16 }
 0x103   :  { %v1520_v23 = vadd.f32 %v1110_v62, %v1022_v21  ;;  %v537_v42 = vadd.f32 %v536_v38, %v1518_v20  ;;  %v559_v6 = vmul.f32 %v1518_v20, %v1518_v20 }
 0x105   :  { %v1023_v24 = vpop.f32.mrb[8].mxu0  ;;  %v538_v51 = vadd.f32 %v537_v42, %v1520_v23  ;;  %v560_v18 = vmul.f32 %v1520_v23, %v1520_v23 }
 0x106   :  { %v1024_v25 = vpop.f32.mrb[9].mxu0 }
 0x107   :  { %v1025_v27 = vadd.f32 %v1024_v25, %v1023_v24  ;;  %v1026_v28 = vpop.f32.mrb[10].mxu0 }
 0x108   :  { %v1027_v30 = vpop.f32.mrb[11].mxu0 }
 0x109   :  { %v1028_v32 = vadd.f32 %v1027_v30, %v1026_v28  ;;  %v1526_v33 = vadd.f32 %v1025_v27, %v489_v5  ;;  %v557_v5 = vmul.f32 %v1514_v9, %v1514_v9 }
 0x10b   :  { %v1528_v35 = vadd.f32 %v1028_v32, %v492_v10  ;;  %v539_v54 = vadd.f32 %v538_v51, %v1526_v33  ;;  %v561_v25 = vmul.f32 %v1526_v33, %v1526_v33 }
 0x10d   :  { %v1029_v39 = vpop.f32.mrb[12].mxu0  ;;  %v540_v63 = vadd.f32 %v539_v54, %v1528_v35 }
 0x10e   :  { %v1030_v41 = vpop.f32.mrb[13].mxu0 }
 0x10f   :  { %v1031_v44 = vadd.f32 %v1030_v41, %v1029_v39  ;;  %v1032_v45 = vpop.f32.mrb[14].mxu0  ;;  %v562_v41 = vmul.f32 %v1528_v35, %v1528_v35 }
 0x110   :  { %v1033_v47 = vpop.f32.mrb[15].mxu0 }
 0x111   :  { %v1533_v48 = vadd.f32 %v1113_v2, %v1031_v44  ;;  %v1034_v50 = vadd.f32 %v1033_v47, %v1032_v45  ;;  %v558_v2 = vmul.f32 %v1516_v11, %v1516_v11 }
 0x113   :  { %v1536_v53 = vadd.f32 %v1114_v7, %v1034_v50  ;;  %v541_v3 = vadd.f32 %v540_v63, %v1533_v48  ;;  %v573_v8 = vadd.f32 %v558_v2, %v557_v5  ;;  %v563_v47 = vmul.f32 %v1533_v48, %v1533_v48 }
 0x115   :  { %v1035_v56 = vpop.f32.mrb[16].mxu0  ;;  %v542_v12 = vadd.f32 %v541_v3, %v1536_v53  ;;  %v574_v16 = vadd.f32 %v573_v8, %v559_v6 }
 0x116   :  { %v1036_v57 = vpop.f32.mrb[17].mxu0 }
 0x117   :  { %v1037_v60 = vadd.f32 %v1036_v57, %v1035_v56  ;;  %v1038_v61 = vpop.f32.mrb[18].mxu0  ;;  %v575_v28 = vadd.f32 %v574_v16, %v560_v18 }
 0x118   :  { %v1039_v62 = vpop.f32.mrb[19].mxu0 }
 0x119   :  { %v1040_v0 = vadd.f32 %v1039_v62, %v1038_v61  ;;  %v1540_v1 = vadd.f32 %v1037_v60, %v505_v17  ;;  %v576_v39 = vadd.f32 %v575_v28, %v561_v25  ;;  %v564_v60 = vmul.f32 %v1536_v53, %v1536_v53 }
 0x11b   :  { %v1545_v4 = vadd.f32 %v1040_v0, %v508_v22  ;;  %v543_v21 = vadd.f32 %v542_v12, %v1540_v1  ;;  %v577_v51 = vadd.f32 %v576_v39, %v562_v41  ;;  %v565_v0 = vmul.f32 %v1540_v1, %v1540_v1 }
 0x11d   :  { %v1041_v7 = vpop.f32.mrb[20].mxu0  ;;  %v544_v30 = vadd.f32 %v543_v21, %v1545_v4  ;;  %v578_v57 = vadd.f32 %v577_v51, %v563_v47 }
 0x11e   :  { %v1042_v10 = vpop.f32.mrb[21].mxu0 }
 0x11f   :  { %v1043_v13 = vadd.f32 %v1042_v10, %v1041_v7  ;;  %v1044_v15 = vpop.f32.mrb[22].mxu0  ;;  %v579_v5 = vadd.f32 %v578_v57, %v564_v60  ;;  %v566_v10 = vmul.f32 %v1545_v4, %v1545_v4 }
 0x120   :  { %v1045_v17 = vpop.f32.mrb[23].mxu0 }
 0x121   :  { %v1555_v22 = vadd.f32 %v1117_v14, %v1043_v13  ;;  %v1046_v24 = vadd.f32 %v1045_v17, %v1044_v15  ;;  %v580_v8 = vadd.f32 %v579_v5, %v565_v0 }
 0x123   :  { %v1559_v27 = vadd.f32 %v1118_v19, %v1046_v24  ;;  %v545_v42 = vadd.f32 %v544_v30, %v1555_v22  ;;  %v567_v15 = vmul.f32 %v1555_v22, %v1555_v22  ;;  %v581_v17 = vadd.f32 %v580_v8, %v566_v10 }
 0x125   :  { %v1047_v32 = vpop.f32.mrb[24].mxu0  ;;  %v546_v54 = vadd.f32 %v545_v42, %v1559_v27  ;;  %v582_v21 = vadd.f32 %v581_v17, %v567_v15 }
 0x126   :  { %v1048_v38 = vpop.f32.mrb[25].mxu0 }
 0x127   :  { %v1049_v44 = vadd.f32 %v1048_v38, %v1047_v32  ;;  %v1050_v14 = vpop.f32.mrb[26].mxu0 }
 0x128   :  { %v1051_v45 = vpop.f32.mrb[27].mxu0 }
 0x129   :  { %v1052_v50 = vadd.f32 %v1051_v45, %v1050_v14  ;;  %v1567_v19 = vadd.f32 %v1049_v44, %v521_v29 }
 0x12b   :  { %v1570_v56 = vadd.f32 %v1052_v50, %v524_v34  ;;  %v547_v61 = vadd.f32 %v546_v54, %v1567_v19  ;;  %v569_v25 = vmul.f32 %v1567_v19, %v1567_v19 }
 0x12d   :  { %v1053_v62 = vpop.f32.mrb[28].mxu0  ;;  %v548_v6 = vadd.f32 %v547_v61, %v1570_v56  ;;  %v570_v38 = vmul.f32 %v1570_v56, %v1570_v56 }
 0x12e   :  { %v1054_v63 = vpop.f32.mrb[29].mxu0 }
 0x12f   :  { %v1055_v2 = vadd.f32 %v1054_v63, %v1053_v62  ;;  %v1056_v3 = vpop.f32.mrb[30].mxu0 }
 0x130   :  { %v1057_v29 = vpop.f32.mrb[31].mxu0 }
 0x131   :  { %v1579_v34 = vadd.f32 %v1522_v26, %v1055_v2  ;;  %v1058_v7 = vadd.f32 %v1057_v29, %v1056_v3  ;;  %v568_v26 = vmul.f32 %v1559_v27, %v1559_v27  ;;  %v760_v2 = vlaneseq }
 0x133   :  { %v549_v12 = vadd.f32 %v548_v6, %v1579_v34  ;;  %v1585_v13 = vadd.f32 %v1524_v31, %v1058_v7  ;;  %v583_v30 = vadd.f32 %v582_v21, %v568_v26  ;;  %v571_v41 = vmul.f32 %v1579_v34, %v1579_v34  ;;  %v781_v7 = vld [vmem:[%s1667_s3] sm:$0x1] }
 0x135   :  { %v550_v16 = vadd.f32 %v549_v12, %v1585_v13  ;;  %v584_v31 = vadd.f32 %v583_v30, %v569_v25  ;;  %v572_v45 = vmul.f32 %v1585_v13, %v1585_v13 }
 0x137   :  { %v551_v18 = vrot.slane %v550_v16, 4  ;;  %v585_v44 = vadd.f32 %v584_v31, %v570_v38 }
 0x139   :  { %v552_v24 = vadd.f32 %v551_v18, %v550_v16  ;;  %v586_v14 = vadd.f32 %v585_v44, %v571_v41 }
 0x13b   :  { %v553_v28 = vrot.slane %v552_v24, 2  ;;  %v587_v47 = vadd.f32 %v586_v14, %v572_v45 }
 0x13d   :  { %v554_v32 = vadd.f32 %v553_v28, %v552_v24  ;;  %v588_v50 = vrot.slane %v587_v47, 4 }
 0x13f   :  { %v555_v39 = vrot.slane %v554_v32, 1 }
 0x141   :  { %v556_v42 = vadd.f32 %v555_v39, %v554_v32 }
 0x143   :  { %1156 = vmatmul.mubr.f32.vlgmr.msra.gmra.mrb[16].mxu1 %v556_v42 }
 0x144   :  { %1219 = vmatpush3.bf16.msra.mxu1 %v1437_v36  ;;  %1190 = vmatprep.mubr.msk.f32.mxu1 %vm1265_vm1, %v1266_v59  ;;  %v589_v36 = vadd.f32 %v588_v50, %v587_v47 }
 0x145   :  { %1220 = vmatprep.subr.bf16.mxu1 %v1264_v37 }
 0x146   :  { %v590_v59 = vrot.slane %v589_v36, 2 }
 0x148   :  { %1222 = vmatpush3.bf16.msra.mxu1 %v1448_v40  ;;  %v591_v40 = vadd.f32 %v590_v59, %v589_v36 }
 0x149   :  { %1223 = vmatprep.subr.bf16.mxu1 %v1264_v37 }
 0x14c   :  { %1225 = vmatpush3.bf16.msra.mxu1 %v1458_v43  ;;  %v592_v43 = vrot.slane %v591_v40, 1 }
 0x14d   :  { %1226 = vmatprep.subr.bf16.mxu1 %v1264_v37 }
 0x150   :  { %1228 = vmatpush3.bf16.msra.mxu1 %v1468_v46  ;;  %v593_v46 = vadd.f32 %v592_v43, %v591_v40 }
 0x151   :  { %1229 = vmatprep.subr.bf16.mxu1 %v1264_v37 }
 0x154   :  { %1231 = vmatpush3.bf16.msra.mxu1 %v1478_v49 }
 0x155   :  { %1232 = vmatprep.subr.bf16.mxu1 %v1264_v37 }
 0x158   :  { %1234 = vmatpush3.bf16.msra.mxu1 %v1488_v52 }
 0x159   :  { %1235 = vmatprep.subr.bf16.mxu1 %v1264_v37 }
 0x15c   :  { %1237 = vmatpush3.bf16.msra.mxu1 %v1498_v55  ;;  %v761_v55 = vshrl.u32 %v760_v2, 7 }
 0x15d   :  { %1238 = vmatprep.subr.bf16.mxu1 %v1264_v37  ;;  %v755_v37 = vld [vmem:[%s1666_s2] sm:$0x1] }
 0x15e   :  { %v762_v3 = vsub.s32 0, %v761_v55 }
 0x160   :  { %1240 = vmatpush3.bf16.msra.mxu1 %v1508_v58 }
 0x163   :  { %1191 = vmatmul.mubr.f32.vlgmr.msra.gmra.mrb[18].mxu1 %v593_v46 }
 0x216   :  { %v676_v51 = vpop.f32.mrb[16].mxu1 }
 0x217   :  { %v1157_v54 = vpop.f32.mrb[17].mxu1  ;;  %v750_v49 = vmul.f32 0.001953125, %v676_v51 }
 0x219   :  { %v752_v60 = vmul.f32 %v750_v49, %v750_v49 }
 0x236   :  { %v746_v57 = vpop.f32.mrb[18].mxu1 }
 0x237   :  { %v751_v61 = vmul.f32 0.001953125, %v746_v57  ;;  %v1192_v62 = vpop.f32.mrb[19].mxu1 }
 0x239   :  { %v753_v52 = vsub.f32 %v751_v61, %v752_v60 }
 0x23b   :  { %v754_v63 = vmax.f32 %v753_v52, 0.0 }
 0x23d   :  { %v756_v0 = vadd.f32 1e-05, %v754_v63 }
 0x23f   :  { %1262 = vrsqrt.f32 %v756_v0 }
 0x249   :  { %v1263_v58 = vpop.eup %1262 }
 0x24a   :  { %v758_v29 = vmul.f32 %v1263_v58, %v755_v37 }
 0x24c   :  { %v782_v5 = vmul.f32 %v758_v29, %v750_v49  ;;  %v763_v6 = vrot.slane %v758_v29, %v762_v3 }
 0x24e   :  { %v765_v8 = vmul.f32 %v763_v6, %v1514_v9  ;;  %v766_v10 = vmul.f32 %v763_v6, %v1516_v11  ;;  %v767_v12 = vmul.f32 %v763_v6, %v1518_v20  ;;  %v768_v15 = vmul.f32 %v763_v6, %v1520_v23 }
 0x24f   :  { %v769_v16 = vmul.f32 %v763_v6, %v1526_v33  ;;  %v783_v17 = vsub.f32 %v781_v7, %v782_v5  ;;  %v770_v18 = vmul.f32 %v763_v6, %v1528_v35  ;;  %v771_v21 = vmul.f32 %v763_v6, %v1533_v48 }
 0x250   :  { %v772_v26 = vmul.f32 %v763_v6, %v1536_v53  ;;  %v773_v24 = vmul.f32 %v763_v6, %v1540_v1  ;;  %v774_v25 = vmul.f32 %v763_v6, %v1545_v4  ;;  %v775_v9 = vmul.f32 %v763_v6, %v1555_v22 }
 0x251   :  { %v776_v11 = vmul.f32 %v763_v6, %v1559_v27  ;;  %v788_v20 = vrot.slane %v783_v17, %v762_v3  ;;  %v777_v23 = vmul.f32 %v763_v6, %v1567_v19  ;;  %v778_v33 = vmul.f32 %v763_v6, %v1570_v56 }
 0x252   :  { %v779_v28 = vmul.f32 %v763_v6, %v1579_v34  ;;  %v780_v35 = vmul.f32 %v763_v6, %v1585_v13 }
 0x253   :  { %v790_v48 = vadd.f32 %v788_v20, %v765_v8  ;;  %v791_v30 = vadd.f32 %v788_v20, %v766_v10  ;;  %v792_v53 = vadd.f32 %v788_v20, %v767_v12  ;;  %v793_v32 = vadd.f32 %v788_v20, %v768_v15 }
 0x254   :  { %v794_v1 = vadd.f32 %v788_v20, %v769_v16  ;;  %v795_v31 = vadd.f32 %v788_v20, %v770_v18  ;;  %v796_v4 = vadd.f32 %v788_v20, %v771_v21  ;;  %v797_v38 = vadd.f32 %v788_v20, %v772_v26 }
 0x255   :  { %v798_v22 = vadd.f32 %v788_v20, %v773_v24  ;;  %v799_v39 = vadd.f32 %v788_v20, %v774_v25  ;;  %v800_v27 = vadd.f32 %v788_v20, %v775_v9  ;;  %v801_v41 = vadd.f32 %v788_v20, %v776_v11 }
 0x256   :  { %v802_v42 = vadd.f32 %v788_v20, %v777_v23  ;;  %v803_v19 = vadd.f32 %v788_v20, %v778_v33  ;;  %v804_v44 = vadd.f32 %v788_v20, %v779_v28  ;;  %v805_v56 = vadd.f32 %v788_v20, %v780_v35 }
 0x257   :  { %v951_v14 = vpack.c.bf16 %v791_v30, %v790_v48  ;;  %v956_v34 = vpack.c.bf16 %v793_v32, %v792_v53  ;;  %v961_v45 = vpack.c.bf16 %v795_v31, %v794_v1  ;;  %v966_v13 = vpack.c.bf16 %v797_v38, %v796_v4 }
 0x258   :  { %v971_v47 = vpack.c.bf16 %v799_v39, %v798_v22  ;;  %v976_v50 = vpack.c.bf16 %v801_v41, %v800_v27  ;;  %v981_v36 = vpack.c.bf16 %v803_v19, %v802_v42  ;;  %v986_v59 = vpack.c.bf16 %v805_v56, %v804_v44 }
 0x259   :  { %952 = vst [vmem:[%s1668_s5] sm:$0xff] %v951_v14   ;;  %988 = vst [vmem:[%s1668_s5 + $0x8] sm:$0xff] %v956_v34  }
 0x25a   :  { %989 = vst [vmem:[%s1668_s5 + $0x10] sm:$0xff] %v961_v45   ;;  %990 = vst [vmem:[%s1668_s5 + $0x18] sm:$0xff] %v966_v13  }
 0x25b   :  { %991 = vst [vmem:[%s1668_s5 + $0x20] sm:$0xff] %v971_v47   ;;  %992 = vst [vmem:[%s1668_s5 + $0x28] sm:$0xff] %v976_v50  }
 0x25c   :  { %993 = vst [vmem:[%s1668_s5 + $0x30] sm:$0xff] %v981_v36   ;;  %994 = vst [vmem:[%s1668_s5 + $0x38] sm:$0xff] %v986_v59  }

// kernel: tile.88
= control target key start
LH: loop header
LB: loop body
LE: loop exit
PB: predicated region body
PF: predicated region fallthrough
CT: control target
= control target key end

     0   :  { %s22_s0 = inlined_call_operand.vmem [shape: f32[3], index: 0, kind: input, shape index: {}]   ;;  %s23_s1 = inlined_call_operand.vmem [shape: f32[4,3], index: 1, kind: output, shape index: {}]  }
   0x1   :  { %v4_v0 = vld [vmem:[%s22_s0] ss:$0 sm:$0xff] }
   0x2   :  { %5 = vst [vmem:[%s23_s1] sm:$0xf] %v4_v0 }

// kernel: tile.89
= control target key start
LH: loop header
LB: loop body
LE: loop exit
PB: predicated region body
PF: predicated region fallthrough
CT: control target
= control target key end

     0   :  { %vm7_vm0 = vcmask 23552   ;;  %s37_s8 = smov 3   ;;  %s38_s9 = smov 6   ;;  %vm13_vm1 = vcmask 97352   ;;  %vm19_vm2 = vcmask 72752   ;;  %vm25_vm3 = vcmask 48152   ;;  %s55_s0 = inlined_call_operand.vmem [shape: f32[4,3], index: 0, kind: input, shape index: {}]   ;;  %s56_s1 = inlined_call_operand.vmem [shape: f32[12], index: 1, kind: output, shape index: {}]  }
   0x1   :  { %v4_v0 = vld [vmem:[%s55_s0] sm:$0xf]  ;;  %s36_s0 = smov 9  }
   0x2   :  { %5 = vst [vmem:[#allocation1] sm:$0xf] %v4_v0 }
   0x9   :  { %v10_v1 = vld [vmem:[#allocation1 + $0x3] sm:$0x1]   ;;  %v22_v2 = vld [vmem:[#allocation1 + $0x1] sm:$0x1]   ;;  %v6_v3 = vld [vmem:[#allocation1] sm:$0x1]  }
   0xa   :  { %11 = vrot.lane.b32.xlu0 %v10_v1, %s36_s0  ;;  %23 = vrot.lane.b32.xlu1 %v22_v2, %s37_s8  ;;  %v16_v4 = vld [vmem:[#allocation1 + $0x2] sm:$0x1]   ;;  %8 = vst.msk [vmem:[#allocation0] sm:$0x1] %vm7_vm0, %v6_v3  }
   0xe   :  { %17 = vrot.lane.b32.xlu0 %v16_v4, %s38_s9 }
  0x7c   :  { %v12_v5 = vpop.permute.xlu0 %11   ;;  %v24_v6 = vpop.permute.xlu1 %23  }
  0x7d   :  { %14 = vst.msk [vmem:[#allocation0] sm:$0x1] %vm13_vm1, %v12_v5  }
  0x80   :  { %v18_v7 = vpop.permute.xlu0 %17  }
  0x81   :  { %20 = vst.msk [vmem:[#allocation0] sm:$0x1] %vm19_vm2, %v18_v7  }
  0x82   :  { %26 = vst.msk [vmem:[#allocation0] sm:$0x1] %vm25_vm3, %v24_v6  }
  0x89   :  { %v30_v8 = vld [vmem:[#allocation0] sm:$0x1] }
  0x8a   :  { %32 = vst [vmem:[%s56_s1] sm:$0x1] %v30_v8 }

// kernel: unet_forward.19
= control target key start
LH: loop header
LB: loop body
LE: loop exit
PB: predicated region body
PF: predicated region fallthrough
CT: control target
= control target key end

     0   :  { %s1078_s12 = smov 0   ;;  %s1080_s13 = smov 0   ;;  %s1284_s0 = inlined_call_operand.vmem [shape: bf16[512,144], index: 0, kind: input, shape index: {}]   ;;  %s1285_s1 = inlined_call_operand.vmem [shape: bf16[144,128], index: 1, kind: input, shape index: {}]   ;;  %s1286_s2 = inlined_call_operand.vmem [shape: f32[1,128], index: 2, kind: input, shape index: {}]   ;;  %s1287_s3 = inlined_call_operand.vmem [shape: f32[512,128], index: 3, kind: output, shape index: {}]  }
   0x1   :  { %s1082_s14 = smov 0  }
   0x2 LB: > { %s25_s15 = sadd.s32 1, %s1051_s13  ;;  %p882_p0 = scmp.ge.s32.totalorder %s1055_s14, 1  ;;  %s1055_s14 = sphi %s1082_s14, %s13_s14   ;;  %s1051_s13 = sphi %s1080_s13, %s1289_s13   ;;  %s1047_s12 = sphi %s1078_s12, %s1288_s12  }
   0x3   : > { %p27_p1 = scmp.ge.s32.totalorder %s25_s15, 2  ;;  %p170_p2 = scmp.lt.s32.totalorder %s1055_s14, 3 }
   0x5   : > { %s1291_s15 = smov (%p27_p1, %s25_s15), 0  ;;  %p171_p3 = pnand %p882_p0, %p170_p2 }
   0x6   : > { %v960_v0 = vld [vmem:[%s1285_s1] sm:$0xff] (!%p171_p3)   ;;  %v1057_v1 = vmov (!%p171_p3), 0   ;;  %s883_s18 = sshll.u32 (!%p171_p3), %s1047_s12, 5  ;;  %v961_v2 = vld [vmem:[%s1285_s1 + $0x8] sm:$0xff] (!%p171_p3)   ;;  %v962_v3 = vld [vmem:[%s1285_s1 + $0x10] sm:$0xff] (!%p171_p3)   ;;  %vm500_vm0 = vcmask (!%p171_p3), 130048  }
   0x7   : > { %174 = sbr.rel (%p171_p3) target bundleno = 328 (0x148), region = 32  ;;  %549 = vmatprep.subr.bf16.mxu0 (!%p171_p3), %v1057_v1  ;;  %917 = vmatprep.subr.bf16.mxu1 (!%p171_p3), %v1057_v1  ;;  %p206_p4 = scmp.lt.s32.totalorder (!%p171_p3), %s883_s18, 63  ;;  %v963_v7 = vld [vmem:[%s1285_s1 + $0x18] sm:$0xff] (!%p171_p3)   ;;  %v964_v17 = vld [vmem:[%s1285_s1 + $0x20] sm:$0xff] (!%p171_p3)   ;;  %v965_v20 = vld [vmem:[%s1285_s1 + $0x28] sm:$0xff] (!%p171_p3)  }
   0x8   : > { %550 = vmatpush1.bf16.msra.mxu0 (!%p171_p3), %v960_v0  ;;  %926 = vmatpush1.bf16.msra.mxu1 (!%p171_p3), %v960_v0  ;;  %v966_v21 = vld [vmem:[%s1285_s1 + $0x30] sm:$0xff] (!%p171_p3)   ;;  %v967_v30 = vld [vmem:[%s1285_s1 + $0x38] sm:$0xff] (!%p171_p3)   ;;  %v968_v39 = vld [vmem:[%s1285_s1 + $0x40] sm:$0xff] (!%p171_p3)  }
   0x9   : > { %551 = vmatprep.subr.bf16.mxu0 (!%p171_p3), %v1057_v1  ;;  %918 = vmatprep.subr.bf16.mxu1 (!%p171_p3), %v1057_v1 }
   0xc   : > { %552 = vmatpush1.bf16.msra.mxu0 (!%p171_p3), %v961_v2  ;;  %927 = vmatpush1.bf16.msra.mxu1 (!%p171_p3), %v961_v2 }
   0xd   : > { %553 = vmatprep.subr.bf16.mxu0 (!%p171_p3), %v1057_v1  ;;  %919 = vmatprep.subr.bf16.mxu1 (!%p171_p3), %v1057_v1 }
   0xe   : > { %s1293_s18 = smov (!%p206_p4, %s883_s18), 63 }
   0xf   : > { %s916_s23 = sshll.u32 %s1293_s18, 3 }
  0x10   : > { %s1119_s26 = scalar_lea.vmem %s1284_s0, %s916_s23  ;;  %554 = vmatpush1.bf16.msra.mxu0 %v962_v3  ;;  %928 = vmatpush1.bf16.msra.mxu1 %v962_v3  ;;  %s1215_s20 = scalar_lea.vmem %s1287_s3, %s916_s23 }
  0x11   : > { %v229_v4 = vld [vmem:[%s1119_s26] sm:$0xff]  ;;  %v230_v5 = vld [vmem:[%s1119_s26 + $0x8] sm:$0xff]  ;;  %555 = vmatprep.subr.bf16.mxu0 %v1057_v1  ;;  %920 = vmatprep.subr.bf16.mxu1 %v1057_v1  ;;  %v231_v22 = vld [vmem:[%s1119_s26 + $0x10] sm:$0xff] }
  0x12   : > { %v245_v6 = vld [vmem:[%s1119_s26 + $0x80] sm:$0xff]  ;;  %v262_v8 = vunpack.c.h.bf16 %v229_v4  ;;  %v264_v9 = vunpack.c.h.bf16 %v230_v5  ;;  %v246_v10 = vld [vmem:[%s1119_s26 + $0x88] sm:$0xff]  ;;  %v232_v23 = vld [vmem:[%s1119_s26 + $0x18] sm:$0xff]  ;;  %v261_v26 = vunpack.c.l.bf16 %v229_v4  ;;  %v263_v27 = vunpack.c.l.bf16 %v230_v5 }
  0x13   : > { %v294_v11 = vunpack.c.h.bf16 %v245_v6  ;;  %v296_v12 = vunpack.c.h.bf16 %v246_v10  ;;  %v247_v24 = vld [vmem:[%s1119_s26 + $0x90] sm:$0xff]  ;;  %v248_v25 = vld [vmem:[%s1119_s26 + $0x98] sm:$0xff]  ;;  %v293_v28 = vunpack.c.l.bf16 %v245_v6  ;;  %v295_v29 = vunpack.c.l.bf16 %v246_v10  ;;  %v233_v44 = vld [vmem:[%s1119_s26 + $0x20] sm:$0xff] }
  0x14   : > { %v326_v13 = vmax.f32 %v262_v8, 0.0  ;;  %v328_v14 = vmax.f32 %v264_v9, 0.0  ;;  %556 = vmatpush1.bf16.msra.mxu0 %v963_v7  ;;  %929 = vmatpush1.bf16.msra.mxu1 %v963_v7  ;;  %v266_v31 = vunpack.c.h.bf16 %v231_v22  ;;  %v268_v32 = vunpack.c.h.bf16 %v232_v23  ;;  %v234_v45 = vld [vmem:[%s1119_s26 + $0x28] sm:$0xff]  ;;  %v249_v46 = vld [vmem:[%s1119_s26 + $0xa0] sm:$0xff]  ;;  %v235_v4 = vld [vmem:[%s1119_s26 + $0x30] sm:$0xff] }
  0x15   : > { %v358_v15 = vmax.f32 %v294_v11, 0.0  ;;  %v360_v16 = vmax.f32 %v296_v12, 0.0  ;;  %557 = vmatprep.subr.bf16.mxu0 %v1057_v1  ;;  %921 = vmatprep.subr.bf16.mxu1 %v1057_v1  ;;  %v298_v33 = vunpack.c.h.bf16 %v247_v24  ;;  %v300_v34 = vunpack.c.h.bf16 %v248_v25  ;;  %v250_v47 = vld [vmem:[%s1119_s26 + $0xa8] sm:$0xff]  ;;  %v236_v5 = vld [vmem:[%s1119_s26 + $0x38] sm:$0xff]  ;;  %v251_v6 = vld [vmem:[%s1119_s26 + $0xb0] sm:$0xff] }
  0x16   : > { %v390_v18 = vpack.c.bf16 %v328_v14, %v326_v13  ;;  %v325_v35 = vmax.f32 %v261_v26, 0.0  ;;  %v327_v36 = vmax.f32 %v263_v27, 0.0  ;;  %v357_v37 = vmax.f32 %v293_v28, 0.0  ;;  %v252_v7 = vld [vmem:[%s1119_s26 + $0xb8] sm:$0xff]  ;;  %v237_v28 = vld [vmem:[%s1119_s26 + $0x40] sm:$0xff] }
  0x17   : > { %v406_v19 = vpack.c.bf16 %v360_v16, %v358_v15  ;;  %v359_v38 = vmax.f32 %v295_v29, 0.0  ;;  %v330_v40 = vmax.f32 %v266_v31, 0.0  ;;  %v332_v41 = vmax.f32 %v268_v32, 0.0  ;;  %v238_v29 = vld [vmem:[%s1119_s26 + $0x48] sm:$0xff] }
  0x18   : > { %898 = vmatprep.mubr.msk.bf16.mxu0 %vm500_vm0, %v390_v18  ;;  %558 = vmatpush1.bf16.msra.mxu0 %v964_v17  ;;  %v362_v42 = vmax.f32 %v298_v33, 0.0  ;;  %v364_v43 = vmax.f32 %v300_v34, 0.0  ;;  %v389_v48 = vpack.c.bf16 %v327_v36, %v325_v35  ;;  %v265_v50 = vunpack.c.l.bf16 %v231_v22  ;;  %v254_v31 = vld [vmem:[%s1119_s26 + $0xc8] sm:$0xff] }
  0x19   : > { %906 = vmatprep.mubr.msk.bf16.mxu1 %vm500_vm0, %v406_v19  ;;  %930 = vmatpush1.bf16.msra.mxu1 %v964_v17  ;;  %v405_v49 = vpack.c.bf16 %v359_v38, %v357_v37  ;;  %v267_v51 = vunpack.c.l.bf16 %v232_v23  ;;  %v297_v52 = vunpack.c.l.bf16 %v247_v24  ;;  %v299_v53 = vunpack.c.l.bf16 %v248_v25 }
  0x1a   : > { %559 = vmatprep.subr.bf16.mxu0 %v1057_v1  ;;  %922 = vmatprep.subr.bf16.mxu1 %v1057_v1  ;;  %v270_v54 = vunpack.c.h.bf16 %v233_v44  ;;  %v272_v55 = vunpack.c.h.bf16 %v234_v45  ;;  %v392_v56 = vpack.c.bf16 %v332_v41, %v330_v40  ;;  %v408_v57 = vpack.c.bf16 %v364_v43, %v362_v42 }
  0x1b   : > { %v302_v58 = vunpack.c.h.bf16 %v249_v46  ;;  %v304_v59 = vunpack.c.h.bf16 %v250_v47  ;;  %v329_v60 = vmax.f32 %v265_v50, 0.0  ;;  %v331_v61 = vmax.f32 %v267_v51, 0.0 }
  0x1c   : > { %560 = vmatpush1.bf16.msra.mxu0 %v965_v20  ;;  %v361_v62 = vmax.f32 %v297_v52, 0.0  ;;  %v363_v63 = vmax.f32 %v299_v53, 0.0  ;;  %v334_v0 = vmax.f32 %v270_v54, 0.0  ;;  %v269_v8 = vunpack.c.l.bf16 %v233_v44  ;;  %v239_v52 = vld [vmem:[%s1119_s26 + $0x50] sm:$0xff]  ;;  %v240_v53 = vld [vmem:[%s1119_s26 + $0x58] sm:$0xff] }
  0x1d   : > { %931 = vmatpush1.bf16.msra.mxu1 %v965_v20  ;;  %561 = vmatprep.subr.bf16.mxu0 %v1057_v1  ;;  %v366_v2 = vmax.f32 %v302_v58, 0.0  ;;  %v368_v3 = vmax.f32 %v304_v59, 0.0  ;;  %v271_v9 = vunpack.c.l.bf16 %v234_v45  ;;  %v301_v10 = vunpack.c.l.bf16 %v249_v46  ;;  %v255_v54 = vld [vmem:[%s1119_s26 + $0xd0] sm:$0xff] }
  0x1e   : > { %923 = vmatprep.subr.bf16.mxu1 %v1057_v1  ;;  %v303_v11 = vunpack.c.l.bf16 %v250_v47  ;;  %v391_v12 = vpack.c.bf16 %v331_v61, %v329_v60  ;;  %v407_v13 = vpack.c.bf16 %v363_v63, %v361_v62  ;;  %v274_v15 = vunpack.c.h.bf16 %v235_v4 }
  0x1f   : > { %v410_v16 = vpack.c.bf16 %v368_v3, %v366_v2  ;;  %v276_v17 = vunpack.c.h.bf16 %v236_v5  ;;  %v306_v18 = vunpack.c.h.bf16 %v251_v6  ;;  %v308_v19 = vunpack.c.h.bf16 %v252_v7 }
  0x20   : > { %562 = vmatpush1.bf16.msra.mxu0 %v966_v21  ;;  %v333_v20 = vmax.f32 %v269_v8, 0.0  ;;  %v365_v22 = vmax.f32 %v301_v10, 0.0  ;;  %v367_v23 = vmax.f32 %v303_v11, 0.0  ;;  %v338_v24 = vmax.f32 %v274_v15, 0.0  ;;  %v258_v15 = vld [vmem:[%s1119_s26 + $0xe8] sm:$0xff] }
  0x21   : > { %932 = vmatpush1.bf16.msra.mxu1 %v966_v21  ;;  %563 = vmatprep.subr.bf16.mxu0 %v1057_v1  ;;  %v335_v21 = vmax.f32 %v271_v9, 0.0  ;;  %v340_v25 = vmax.f32 %v276_v17, 0.0  ;;  %v370_v26 = vmax.f32 %v306_v18, 0.0  ;;  %v372_v27 = vmax.f32 %v308_v19, 0.0 }
  0x22   : > { %924 = vmatprep.subr.bf16.mxu1 %v1057_v1  ;;  %v409_v33 = vpack.c.bf16 %v367_v23, %v365_v22  ;;  %v273_v34 = vunpack.c.l.bf16 %v235_v4  ;;  %v275_v35 = vunpack.c.l.bf16 %v236_v5  ;;  %v305_v36 = vunpack.c.l.bf16 %v251_v6 }
  0x23   : > { %v393_v32 = vpack.c.bf16 %v335_v21, %v333_v20  ;;  %v307_v37 = vunpack.c.l.bf16 %v252_v7  ;;  %v278_v38 = vunpack.c.h.bf16 %v237_v28  ;;  %v396_v40 = vpack.c.bf16 %v340_v25, %v338_v24 }
  0x24   : > { %564 = vmatpush1.bf16.msra.mxu0 %v967_v30  ;;  %v412_v41 = vpack.c.bf16 %v372_v27, %v370_v26  ;;  %v312_v43 = vunpack.c.h.bf16 %v254_v31  ;;  %v337_v44 = vmax.f32 %v273_v34, 0.0  ;;  %v339_v45 = vmax.f32 %v275_v35, 0.0 }
  0x25   : > { %933 = vmatpush1.bf16.msra.mxu1 %v967_v30  ;;  %565 = vmatprep.subr.bf16.mxu0 %v1057_v1  ;;  %v253_v30 = vld [vmem:[%s1119_s26 + $0xc0] sm:$0xff]  ;;  %v369_v46 = vmax.f32 %v305_v36, 0.0  ;;  %v371_v47 = vmax.f32 %v307_v37, 0.0  ;;  %v311_v59 = vunpack.c.l.bf16 %v254_v31  ;;  %v282_v63 = vunpack.c.h.bf16 %v239_v52  ;;  %v243_v36 = vld [vmem:[%s1119_s26 + $0x70] sm:$0xff]  ;;  %v244_v37 = vld [vmem:[%s1119_s26 + $0x78] sm:$0xff] }
  0x26   : > { %925 = vmatprep.subr.bf16.mxu1 %v1057_v1  ;;  %v336_v1 = vmax.f32 %v272_v55, 0.0  ;;  %v310_v42 = vunpack.c.h.bf16 %v253_v30  ;;  %v376_v51 = vmax.f32 %v312_v43, 0.0  ;;  %v256_v55 = vld [vmem:[%s1119_s26 + $0xd8] sm:$0xff]  ;;  %v309_v58 = vunpack.c.l.bf16 %v253_v30 }
  0x27   : > { %v395_v60 = vpack.c.bf16 %v339_v45, %v337_v44  ;;  %v411_v61 = vpack.c.bf16 %v371_v47, %v369_v46  ;;  %v314_v2 = vunpack.c.h.bf16 %v255_v54  ;;  %v316_v3 = vunpack.c.h.bf16 %v256_v55 }
  0x28   : > { %566 = vmatpush1.bf16.msra.mxu0 %v968_v39  ;;  %v394_v14 = vpack.c.bf16 %v336_v1, %v334_v0  ;;  %v374_v50 = vmax.f32 %v310_v42, 0.0  ;;  %v284_v1 = vunpack.c.h.bf16 %v240_v53  ;;  %v373_v6 = vmax.f32 %v309_v58, 0.0 }
  0x29   : > { %934 = vmatpush1.bf16.msra.mxu1 %v968_v39  ;;  %v280_v39 = vunpack.c.h.bf16 %v238_v29  ;;  %v375_v7 = vmax.f32 %v311_v59, 0.0  ;;  %v346_v8 = vmax.f32 %v282_v63, 0.0  ;;  %v378_v10 = vmax.f32 %v314_v2, 0.0 }
  0x2a   : > { %v414_v0 = vpack.c.bf16 %v376_v51, %v374_v50  ;;  %v348_v9 = vmax.f32 %v284_v1, 0.0  ;;  %v380_v11 = vmax.f32 %v316_v3, 0.0  ;;  %v281_v18 = vunpack.c.l.bf16 %v239_v52 }
  0x2b   : > { %582 = vmatmul.mubr.bf16.vlgmr.msra.gmra.mrb[0].mxu0 %v389_v48  ;;  %v342_v48 = vmax.f32 %v278_v38, 0.0  ;;  %v413_v17 = vpack.c.bf16 %v375_v7, %v373_v6  ;;  %v283_v19 = vunpack.c.l.bf16 %v240_v53  ;;  %v313_v20 = vunpack.c.l.bf16 %v255_v54  ;;  %v259_v38 = vld [vmem:[%s1119_s26 + $0xf0] sm:$0xff] }
  0x2c   : > { %646 = vmatmul.mubr.bf16.vlgmr.msra.gmra.mrb[0].mxu1 %v405_v49  ;;  %899 = vmatprep.mubr.msk.bf16.mxu0 %vm500_vm0, %v392_v56  ;;  %v344_v49 = vmax.f32 %v280_v39, 0.0  ;;  %v277_v56 = vunpack.c.l.bf16 %v237_v28  ;;  %v315_v21 = vunpack.c.l.bf16 %v256_v55  ;;  %v400_v24 = vpack.c.bf16 %v348_v9, %v346_v8  ;;  %v260_v39 = vld [vmem:[%s1119_s26 + $0xf8] sm:$0xff] }
  0x2d   : > { %907 = vmatprep.mubr.msk.bf16.mxu1 %vm500_vm0, %v408_v57  ;;  %v279_v57 = vunpack.c.l.bf16 %v238_v29  ;;  %v416_v25 = vpack.c.bf16 %v380_v11, %v378_v10  ;;  %v320_v27 = vunpack.c.h.bf16 %v258_v15  ;;  %v345_v28 = vmax.f32 %v281_v18, 0.0  ;;  %v1202_v10 = vld [vmem:[%s1286_s2] ss:$0 sm:$0xff] }
  0x2e   : > { %v398_v62 = vpack.c.bf16 %v344_v49, %v342_v48  ;;  %v341_v4 = vmax.f32 %v277_v56, 0.0  ;;  %v347_v29 = vmax.f32 %v283_v19, 0.0  ;;  %v377_v30 = vmax.f32 %v313_v20, 0.0 }
  0x2f   : > { %v343_v5 = vmax.f32 %v279_v57, 0.0  ;;  %v379_v31 = vmax.f32 %v315_v21, 0.0  ;;  %v384_v35 = vmax.f32 %v320_v27, 0.0  ;;  %v319_v43 = vunpack.c.l.bf16 %v258_v15 }
  0x30   : > { %v399_v44 = vpack.c.bf16 %v347_v29, %v345_v28  ;;  %v290_v47 = vunpack.c.h.bf16 %v243_v36  ;;  %v292_v49 = vunpack.c.h.bf16 %v244_v37  ;;  %v322_v50 = vunpack.c.h.bf16 %v259_v38 }
  0x31   : > { %v415_v45 = vpack.c.bf16 %v379_v31, %v377_v30  ;;  %v324_v51 = vunpack.c.h.bf16 %v260_v39  ;;  %v383_v55 = vmax.f32 %v319_v43, 0.0  ;;  %v291_v63 = vunpack.c.l.bf16 %v244_v37 }
  0x32   : > { %v354_v56 = vmax.f32 %v290_v47, 0.0  ;;  %v356_v57 = vmax.f32 %v292_v49, 0.0  ;;  %v386_v58 = vmax.f32 %v322_v50, 0.0  ;;  %v323_v1 = vunpack.c.l.bf16 %v260_v39 }
  0x33   : > { %590 = vmatmul.mubr.bf16.gmra.mrb[4].mxu0 %v391_v12  ;;  %v241_v12 = vld [vmem:[%s1119_s26 + $0x60] sm:$0xff]  ;;  %v388_v59 = vmax.f32 %v324_v51, 0.0 }
  0x34   : > { %654 = vmatmul.mubr.bf16.gmra.mrb[4].mxu1 %v407_v13  ;;  %900 = vmatprep.mubr.msk.bf16.mxu0 %vm500_vm0, %v394_v14  ;;  %v242_v13 = vld [vmem:[%s1119_s26 + $0x68] sm:$0xff]  ;;  %v257_v14 = vld [vmem:[%s1119_s26 + $0xe0] sm:$0xff]  ;;  %v286_v22 = vunpack.c.h.bf16 %v241_v12  ;;  %v404_v2 = vpack.c.bf16 %v356_v57, %v354_v56  ;;  %v387_v7 = vmax.f32 %v323_v1, 0.0 }
  0x35   : > { %908 = vmatprep.mubr.msk.bf16.mxu1 %vm500_vm0, %v410_v16  ;;  %v397_v16 = vpack.c.bf16 %v343_v5, %v341_v4  ;;  %v288_v23 = vunpack.c.h.bf16 %v242_v13  ;;  %v318_v26 = vunpack.c.h.bf16 %v257_v14  ;;  %v317_v42 = vunpack.c.l.bf16 %v257_v14 }
  0x36   : > { %v420_v3 = vpack.c.bf16 %v388_v59, %v386_v58  ;;  %v355_v5 = vmax.f32 %v291_v63, 0.0 }
  0x37   : > { %v382_v34 = vmax.f32 %v318_v26, 0.0  ;;  %v381_v54 = vmax.f32 %v317_v42, 0.0 }
  0x39   : > { %v418_v48 = vpack.c.bf16 %v384_v35, %v382_v34 }
  0x3b   : > { %598 = vmatmul.mubr.bf16.gmra.mrb[8].mxu0 %v393_v32  ;;  %v350_v32 = vmax.f32 %v286_v22, 0.0 }
  0x3c   : > { %662 = vmatmul.mubr.bf16.gmra.mrb[8].mxu1 %v409_v33  ;;  %901 = vmatprep.mubr.msk.bf16.mxu0 %vm500_vm0, %v396_v40  ;;  %v352_v33 = vmax.f32 %v288_v23, 0.0  ;;  %v285_v40 = vunpack.c.l.bf16 %v241_v12 }
  0x3d   : > { %909 = vmatprep.mubr.msk.bf16.mxu1 %vm500_vm0, %v412_v41  ;;  %v287_v41 = vunpack.c.l.bf16 %v242_v13 }
  0x3e   : > { %v402_v46 = vpack.c.bf16 %v352_v33, %v350_v32  ;;  %v349_v52 = vmax.f32 %v285_v40, 0.0 }
  0x3f   : > { %v351_v53 = vmax.f32 %v287_v41, 0.0 }
  0x43   : > { %606 = vmatmul.mubr.bf16.gmra.mrb[12].mxu0 %v395_v60  ;;  %v401_v60 = vpack.c.bf16 %v351_v53, %v349_v52 }
  0x44   : > { %670 = vmatmul.mubr.bf16.gmra.mrb[12].mxu1 %v411_v61  ;;  %902 = vmatprep.mubr.msk.bf16.mxu0 %vm500_vm0, %v398_v62  ;;  %v417_v61 = vpack.c.bf16 %v383_v55, %v381_v54  ;;  %v289_v62 = vunpack.c.l.bf16 %v243_v36 }
  0x45   : > { %910 = vmatprep.mubr.msk.bf16.mxu1 %vm500_vm0, %v414_v0  ;;  %v321_v0 = vunpack.c.l.bf16 %v259_v38 }
  0x46   : > { %v353_v4 = vmax.f32 %v289_v62, 0.0 }
  0x47   : > { %v385_v6 = vmax.f32 %v321_v0, 0.0 }
  0x48   : > { %v403_v8 = vpack.c.bf16 %v355_v5, %v353_v4 }
  0x49   : > { %v419_v9 = vpack.c.bf16 %v387_v7, %v385_v6 }
  0x4b   : > { %614 = vmatmul.mubr.bf16.gmra.mrb[16].mxu0 %v397_v16 }
  0x4c   : > { %678 = vmatmul.mubr.bf16.gmra.mrb[16].mxu1 %v413_v17  ;;  %903 = vmatprep.mubr.msk.bf16.mxu0 %vm500_vm0, %v400_v24 }
  0x4d   : > { %911 = vmatprep.mubr.msk.bf16.mxu1 %vm500_vm0, %v416_v25 }
  0x53   : > { %622 = vmatmul.mubr.bf16.gmra.mrb[20].mxu0 %v399_v44 }
  0x54   : > { %686 = vmatmul.mubr.bf16.gmra.mrb[20].mxu1 %v415_v45  ;;  %904 = vmatprep.mubr.msk.bf16.mxu0 %vm500_vm0, %v402_v46 }
  0x55   : > { %912 = vmatprep.mubr.msk.bf16.mxu1 %vm500_vm0, %v418_v48 }
  0x5b   : > { %630 = vmatmul.mubr.bf16.gmra.mrb[24].mxu0 %v401_v60 }
  0x5c   : > { %694 = vmatmul.mubr.bf16.gmra.mrb[24].mxu1 %v417_v61  ;;  %905 = vmatprep.mubr.msk.bf16.mxu0 %vm500_vm0, %v404_v2 }
  0x5d   : > { %913 = vmatprep.mubr.msk.bf16.mxu1 %vm500_vm0, %v420_v3 }
  0x63   : > { %638 = vmatmul.mubr.bf16.gmra.mrb[28].mxu0 %v403_v8 }
  0x64   : > { %702 = vmatmul.mubr.bf16.gmra.mrb[28].mxu1 %v419_v9 }
  0xfe   : > { %v583_v11 = vpop.f32.mrb[0].mxu0 }
  0xff   : > { %v647_v12 = vpop.f32.mrb[0].mxu1  ;;  %v584_v13 = vadd.f32 %v1202_v10, %v583_v11  ;;  %v585_v15 = vpop.f32.mrb[1].mxu0 }
 0x100   : > { %v648_v14 = vadd.f32 %v1202_v10, %v647_v12  ;;  %v649_v16 = vpop.f32.mrb[1].mxu1  ;;  %v586_v17 = vpop.f32.mrb[2].mxu0 }
 0x101   : > { %v650_v18 = vpop.f32.mrb[2].mxu1  ;;  %969 = vtanh.f32 %v584_v13  ;;  %v587_v19 = vadd.f32 %v1202_v10, %v586_v17  ;;  %v588_v21 = vpop.f32.mrb[3].mxu0 }
 0x102   : > { %v651_v20 = vadd.f32 %v1202_v10, %v650_v18  ;;  %v652_v22 = vpop.f32.mrb[3].mxu1  ;;  %971 = vtanh.f32 %v648_v14 }
 0x103   : > { %973 = vtanh.f32 %v587_v19 }
 0x104   : > { %975 = vtanh.f32 %v651_v20 }
 0x106   : > { %v591_v23 = vpop.f32.mrb[4].mxu0 }
 0x107   : > { %v655_v24 = vpop.f32.mrb[4].mxu1  ;;  %v592_v25 = vadd.f32 %v1202_v10, %v591_v23  ;;  %v593_v27 = vpop.f32.mrb[5].mxu0 }
 0x108   : > { %v656_v26 = vadd.f32 %v1202_v10, %v655_v24  ;;  %v657_v28 = vpop.f32.mrb[5].mxu1  ;;  %v594_v29 = vpop.f32.mrb[6].mxu0 }
 0x109   : > { %v658_v30 = vpop.f32.mrb[6].mxu1  ;;  %977 = vtanh.f32 %v592_v25  ;;  %v595_v31 = vadd.f32 %v1202_v10, %v594_v29  ;;  %v596_v33 = vpop.f32.mrb[7].mxu0 }
 0x10a   : > { %v659_v32 = vadd.f32 %v1202_v10, %v658_v30  ;;  %v660_v34 = vpop.f32.mrb[7].mxu1  ;;  %979 = vtanh.f32 %v656_v26 }
 0x10b   : > { %v970_v35 = vpop.eup %969  ;;  %981 = vtanh.f32 %v595_v31 }
 0x10c   : > { %v972_v36 = vpop.eup %971  ;;  %742 = vst [vmem:[%s1215_s20] sm:$0xff] %v970_v35  ;;  %983 = vtanh.f32 %v659_v32 }
 0x10d   : > { %v974_v37 = vpop.eup %973  ;;  %758 = vst [vmem:[%s1215_s20 + $0x80] sm:$0xff] %v972_v36 }
 0x10e   : > { %v976_v38 = vpop.eup %975  ;;  %743 = vst [vmem:[%s1215_s20 + $0x8] sm:$0xff] %v974_v37  ;;  %v599_v39 = vpop.f32.mrb[8].mxu0 }
 0x10f   : > { %v663_v40 = vpop.f32.mrb[8].mxu1  ;;  %759 = vst [vmem:[%s1215_s20 + $0x88] sm:$0xff] %v976_v38  ;;  %v600_v41 = vadd.f32 %v1202_v10, %v599_v39  ;;  %v601_v43 = vpop.f32.mrb[9].mxu0 }
 0x110   : > { %v664_v42 = vadd.f32 %v1202_v10, %v663_v40  ;;  %v665_v44 = vpop.f32.mrb[9].mxu1  ;;  %v602_v45 = vpop.f32.mrb[10].mxu0 }
 0x111   : > { %v666_v46 = vpop.f32.mrb[10].mxu1  ;;  %985 = vtanh.f32 %v600_v41  ;;  %v603_v47 = vadd.f32 %v1202_v10, %v602_v45  ;;  %v604_v49 = vpop.f32.mrb[11].mxu0 }
 0x112   : > { %v667_v48 = vadd.f32 %v1202_v10, %v666_v46  ;;  %v668_v50 = vpop.f32.mrb[11].mxu1  ;;  %987 = vtanh.f32 %v664_v42 }
 0x113   : > { %v978_v51 = vpop.eup %977  ;;  %989 = vtanh.f32 %v603_v47 }
 0x114   : > { %v980_v52 = vpop.eup %979  ;;  %744 = vst [vmem:[%s1215_s20 + $0x10] sm:$0xff] %v978_v51  ;;  %991 = vtanh.f32 %v667_v48 }
 0x115   : > { %v982_v53 = vpop.eup %981  ;;  %760 = vst [vmem:[%s1215_s20 + $0x90] sm:$0xff] %v980_v52 }
 0x116   : > { %v984_v54 = vpop.eup %983  ;;  %745 = vst [vmem:[%s1215_s20 + $0x18] sm:$0xff] %v982_v53  ;;  %v607_v55 = vpop.f32.mrb[12].mxu0 }
 0x117   : > { %v671_v56 = vpop.f32.mrb[12].mxu1  ;;  %761 = vst [vmem:[%s1215_s20 + $0x98] sm:$0xff] %v984_v54  ;;  %v608_v57 = vadd.f32 %v1202_v10, %v607_v55  ;;  %v609_v59 = vpop.f32.mrb[13].mxu0 }
 0x118   : > { %v672_v58 = vadd.f32 %v1202_v10, %v671_v56  ;;  %v673_v60 = vpop.f32.mrb[13].mxu1  ;;  %v610_v61 = vpop.f32.mrb[14].mxu0 }
 0x119   : > { %v674_v62 = vpop.f32.mrb[14].mxu1  ;;  %993 = vtanh.f32 %v608_v57  ;;  %v611_v63 = vadd.f32 %v1202_v10, %v610_v61  ;;  %v612_v1 = vpop.f32.mrb[15].mxu0 }
 0x11a   : > { %v675_v0 = vadd.f32 %v1202_v10, %v674_v62  ;;  %v676_v2 = vpop.f32.mrb[15].mxu1  ;;  %995 = vtanh.f32 %v672_v58 }
 0x11b   : > { %v986_v3 = vpop.eup %985  ;;  %997 = vtanh.f32 %v611_v63 }
 0x11c   : > { %v988_v4 = vpop.eup %987  ;;  %746 = vst [vmem:[%s1215_s20 + $0x20] sm:$0xff] %v986_v3  ;;  %999 = vtanh.f32 %v675_v0 }
 0x11d   : > { %v990_v5 = vpop.eup %989  ;;  %762 = vst [vmem:[%s1215_s20 + $0xa0] sm:$0xff] %v988_v4 }
 0x11e   : > { %v992_v6 = vpop.eup %991  ;;  %747 = vst [vmem:[%s1215_s20 + $0x28] sm:$0xff] %v990_v5  ;;  %v615_v7 = vpop.f32.mrb[16].mxu0 }
 0x11f   : > { %v679_v8 = vpop.f32.mrb[16].mxu1  ;;  %763 = vst [vmem:[%s1215_s20 + $0xa8] sm:$0xff] %v992_v6  ;;  %v616_v9 = vadd.f32 %v1202_v10, %v615_v7  ;;  %v617_v12 = vpop.f32.mrb[17].mxu0 }
 0x120   : > { %v680_v11 = vadd.f32 %v1202_v10, %v679_v8  ;;  %v681_v13 = vpop.f32.mrb[17].mxu1  ;;  %v618_v14 = vpop.f32.mrb[18].mxu0 }
 0x121   : > { %v682_v15 = vpop.f32.mrb[18].mxu1  ;;  %1001 = vtanh.f32 %v616_v9  ;;  %v619_v16 = vadd.f32 %v1202_v10, %v618_v14  ;;  %v620_v18 = vpop.f32.mrb[19].mxu0 }
 0x122   : > { %v683_v17 = vadd.f32 %v1202_v10, %v682_v15  ;;  %v684_v19 = vpop.f32.mrb[19].mxu1  ;;  %1003 = vtanh.f32 %v680_v11 }
 0x123   : > { %v994_v20 = vpop.eup %993  ;;  %1005 = vtanh.f32 %v619_v16 }
 0x124   : > { %v996_v21 = vpop.eup %995  ;;  %748 = vst [vmem:[%s1215_s20 + $0x30] sm:$0xff] %v994_v20  ;;  %1007 = vtanh.f32 %v683_v17 }
 0x125   : > { %v998_v22 = vpop.eup %997  ;;  %764 = vst [vmem:[%s1215_s20 + $0xb0] sm:$0xff] %v996_v21 }
 0x126   : > { %v1000_v23 = vpop.eup %999  ;;  %749 = vst [vmem:[%s1215_s20 + $0x38] sm:$0xff] %v998_v22  ;;  %v623_v24 = vpop.f32.mrb[20].mxu0 }
 0x127   : > { %v687_v25 = vpop.f32.mrb[20].mxu1  ;;  %765 = vst [vmem:[%s1215_s20 + $0xb8] sm:$0xff] %v1000_v23  ;;  %v624_v26 = vadd.f32 %v1202_v10, %v623_v24  ;;  %v625_v28 = vpop.f32.mrb[21].mxu0 }
 0x128   : > { %v688_v27 = vadd.f32 %v1202_v10, %v687_v25  ;;  %v689_v29 = vpop.f32.mrb[21].mxu1  ;;  %v626_v30 = vpop.f32.mrb[22].mxu0 }
 0x129   : > { %v690_v31 = vpop.f32.mrb[22].mxu1  ;;  %1009 = vtanh.f32 %v624_v26  ;;  %v627_v32 = vadd.f32 %v1202_v10, %v626_v30  ;;  %v628_v34 = vpop.f32.mrb[23].mxu0 }
 0x12a   : > { %v691_v33 = vadd.f32 %v1202_v10, %v690_v31  ;;  %v692_v35 = vpop.f32.mrb[23].mxu1  ;;  %1011 = vtanh.f32 %v688_v27 }
 0x12b   : > { %v1002_v36 = vpop.eup %1001  ;;  %1013 = vtanh.f32 %v627_v32 }
 0x12c   : > { %v1004_v37 = vpop.eup %1003  ;;  %750 = vst [vmem:[%s1215_s20 + $0x40] sm:$0xff] %v1002_v36  ;;  %1015 = vtanh.f32 %v691_v33 }
 0x12d   : > { %v1006_v38 = vpop.eup %1005  ;;  %766 = vst [vmem:[%s1215_s20 + $0xc0] sm:$0xff] %v1004_v37 }
 0x12e   : > { %v1008_v39 = vpop.eup %1007  ;;  %751 = vst [vmem:[%s1215_s20 + $0x48] sm:$0xff] %v1006_v38  ;;  %v631_v40 = vpop.f32.mrb[24].mxu0 }
 0x12f   : > { %v695_v41 = vpop.f32.mrb[24].mxu1  ;;  %767 = vst [vmem:[%s1215_s20 + $0xc8] sm:$0xff] %v1008_v39  ;;  %v632_v42 = vadd.f32 %v1202_v10, %v631_v40  ;;  %v633_v44 = vpop.f32.mrb[25].mxu0 }
 0x130   : > { %v696_v43 = vadd.f32 %v1202_v10, %v695_v41  ;;  %v697_v45 = vpop.f32.mrb[25].mxu1  ;;  %v634_v46 = vpop.f32.mrb[26].mxu0 }
 0x131   : > { %v698_v47 = vpop.f32.mrb[26].mxu1  ;;  %1017 = vtanh.f32 %v632_v42  ;;  %v635_v48 = vadd.f32 %v1202_v10, %v634_v46  ;;  %v636_v50 = vpop.f32.mrb[27].mxu0 }
 0x132   : > { %v699_v49 = vadd.f32 %v1202_v10, %v698_v47  ;;  %v700_v51 = vpop.f32.mrb[27].mxu1  ;;  %1019 = vtanh.f32 %v696_v43 }
 0x133   : > { %v1010_v52 = vpop.eup %1009  ;;  %1021 = vtanh.f32 %v635_v48 }
 0x134   : > { %v1012_v53 = vpop.eup %1011  ;;  %752 = vst [vmem:[%s1215_s20 + $0x50] sm:$0xff] %v1010_v52  ;;  %1023 = vtanh.f32 %v699_v49 }
 0x135   : > { %v1014_v54 = vpop.eup %1013  ;;  %768 = vst [vmem:[%s1215_s20 + $0xd0] sm:$0xff] %v1012_v53 }
 0x136   : > { %v1016_v55 = vpop.eup %1015  ;;  %753 = vst [vmem:[%s1215_s20 + $0x58] sm:$0xff] %v1014_v54  ;;  %v639_v56 = vpop.f32.mrb[28].mxu0 }
 0x137   : > { %v703_v57 = vpop.f32.mrb[28].mxu1  ;;  %769 = vst [vmem:[%s1215_s20 + $0xd8] sm:$0xff] %v1016_v55  ;;  %v640_v58 = vadd.f32 %v1202_v10, %v639_v56  ;;  %v641_v60 = vpop.f32.mrb[29].mxu0 }
 0x138   : > { %v704_v59 = vadd.f32 %v1202_v10, %v703_v57  ;;  %v705_v61 = vpop.f32.mrb[29].mxu1  ;;  %v642_v62 = vpop.f32.mrb[30].mxu0 }
 0x139   : > { %v706_v63 = vpop.f32.mrb[30].mxu1  ;;  %1025 = vtanh.f32 %v640_v58  ;;  %v643_v0 = vadd.f32 %v1202_v10, %v642_v62  ;;  %v644_v2 = vpop.f32.mrb[31].mxu0 }
 0x13a   : > { %v707_v1 = vadd.f32 %v1202_v10, %v706_v63  ;;  %v708_v3 = vpop.f32.mrb[31].mxu1  ;;  %1027 = vtanh.f32 %v704_v59 }
 0x13b   : > { %v1018_v4 = vpop.eup %1017  ;;  %1029 = vtanh.f32 %v643_v0 }
 0x13c   : > { %v1020_v5 = vpop.eup %1019  ;;  %754 = vst [vmem:[%s1215_s20 + $0x60] sm:$0xff] %v1018_v4  ;;  %1031 = vtanh.f32 %v707_v1 }
 0x13d   : > { %v1022_v6 = vpop.eup %1021  ;;  %770 = vst [vmem:[%s1215_s20 + $0xe0] sm:$0xff] %v1020_v5 }
 0x13e   : > { %v1024_v7 = vpop.eup %1023  ;;  %755 = vst [vmem:[%s1215_s20 + $0x68] sm:$0xff] %v1022_v6 }
 0x13f   : > { %771 = vst [vmem:[%s1215_s20 + $0xe8] sm:$0xff] %v1024_v7 }
 0x143   : > { %v1026_v8 = vpop.eup %1025 }
 0x144   : > { %v1028_v9 = vpop.eup %1027  ;;  %756 = vst [vmem:[%s1215_s20 + $0x70] sm:$0xff] %v1026_v8 }
 0x145   : > { %v1030_v10 = vpop.eup %1029  ;;  %772 = vst [vmem:[%s1215_s20 + $0xf0] sm:$0xff] %v1028_v9 }
 0x146   : > { %v1032_v11 = vpop.eup %1031  ;;  %757 = vst [vmem:[%s1215_s20 + $0x78] sm:$0xff] %v1030_v10 }
 0x147   : > { %773 = vst [vmem:[%s1215_s20 + $0xf8] sm:$0xff] %v1032_v11 }
 0x148 PF: > { %s13_s14 = sadd.s32 1, %s1055_s14   ;;  %s1288_s12 = smov %s1051_s13 }
 0x149   : > { %p10_p5 = scmp.ge.s32.totalorder %s13_s14, 4   ;;  %s1289_s13 = smov %s1291_s15 }
 0x14b   :  { %12 = sbr.rel (!%p10_p5) target bundleno = 2 (0x2), region = 68 }

</bundles_post_ra>
